<compile_context>
chip_gen: v7x
topology: tpu7x:2x2x1
jax: 0.10.0
libtpu: 0.0.40
codegen_flags: <defaults>
</compile_context>

<pallas_src>
import functools

import jax
import jax.numpy as jnp
from jax.experimental import pallas as pl
from jax.experimental.pallas import tpu as pltpu

EPS = 1e-5
NEG_SLOPE = 0.2
INIT_STD = 0.02
OUT_PAD = 128          # lane-dense padded width for the final linear output
LANE = 128
SUBLANE_BF16 = 16      # bf16 sublane packing granularity


def _round_up(x, m):
    return (x + m - 1) // m * m


def _leaky_relu(x):
    # max(x, a*x) == LeakyReLU(a) for 0 < a < 1: one vmul + one vmax.
    return jnp.maximum(x, NEG_SLOPE * x)


# --------------------------------------------------------------------------
# Packed-parameter layouts.  All chunk sizes / offsets are multiples of 128
# lanes (pvec) or 16 sublanes (bf16 weight blobs) so in-kernel static slices
# never cross a packed tile boundary.
# --------------------------------------------------------------------------
def _pvec_layout():
    names = [
        ("sf_b1", 256), ("sf_b2", 256), ("sf_g", 256), ("sf_beta", 256),
        ("lf_b1", 256), ("lf_b2", 256), ("lf_g", 256), ("lf_beta", 256),
        ("ct_b1", 512), ("ct_b2", 512), ("ct_g", 512), ("ct_beta", 512),
        ("mg_b1", 512), ("mg_b2", 256), ("mg_g", 256), ("mg_beta", 256),
        ("out_b", OUT_PAD),
    ]
    layout, off = {}, 0
    for n, s in names:
        assert off % LANE == 0 and s % LANE == 0, (n, off, s)
        layout[n] = (off, s)
        off += s
    return layout, off


PV_LAYOUT, PV_TOTAL = _pvec_layout()

# Branch-weight blob (rows, 256) bf16.  Row offsets must be multiples of 16.
WBR_SLICES = {
    "sf_w1": (0, 128), "lf_w1": (128, 128),
    "sf_w2": (256, 256), "lf_w2": (512, 256),
    "mg_w2": (768, 512),
}
for _off, _n in WBR_SLICES.values():
    assert _off % SUBLANE_BF16 == 0 and _n % SUBLANE_BF16 == 0
WBR_ROWS = 1280
assert OUT_PAD % LANE == 0

# Merge-W1 row groups (sf / ct / lf order of torch.cat([sf, cont, lf], dim=1)).
MG1_ROW_GROUPS = ((0, 256), (256, 512), (768, 256))


# --------------------------------------------------------------------------
# Kernel
# --------------------------------------------------------------------------
def mlp_d_kernel(
    sf_ref, lf_ref, cont_ref,          # activations (B, .) f32, VMEM
    wbr_ref, wout_ref, pvec_ref,       # VMEM-resident weights / biases
    wct_hbm, wmg1_hbm,                 # bf16 weights left in HBM (pl.ANY)
    out_ref,                           # (B, OUT_PAD) f32 output
    wct_vmem, wmg1_vmem, sems,         # scratch: VMEM buffers + DMA sems
    *, in_pad,
):
    # Issue all manual weight DMAs up-front; waits deferred to first use so
    # the transfers overlap the earlier branch compute.
    ct_copy = pltpu.make_async_copy(wct_hbm, wct_vmem, sems.at[0])
    ct_copy.start()
    mg_copies = []
    for i, (r0, rn) in enumerate(MG1_ROW_GROUPS):
        cp = pltpu.make_async_copy(wmg1_hbm.at[r0:r0 + rn, :],
                                   wmg1_vmem.at[r0:r0 + rn, :],
                                   sems.at[1 + i])
        cp.start()
        mg_copies.append(cp)

    def pv(name):
        off, n = PV_LAYOUT[name]
        return pvec_ref[:, off:off + n]          # (1, n) f32, lane-aligned

    def wbr(name):
        off, n = WBR_SLICES[name]
        return wbr_ref[off:off + n, :]           # bf16, sublane-aligned

    def dot(x_f32, w_bf16):
        # bf16 x bf16 on the MXU, f32 accumulation.
        return jnp.dot(x_f32.astype(jnp.bfloat16), w_bf16,
                       preferred_element_type=jnp.float32)

    def batchnorm(x, gamma, beta):
        # PyTorch BatchNorm1d training mode: batch mean, biased variance.
        mean = jnp.mean(x, axis=0, keepdims=True)
        var = jnp.mean((x - mean) ** 2, axis=0, keepdims=True)
        return (x - mean) * jax.lax.rsqrt(var + EPS) * gamma + beta

    def branch(x, w1, w2, prefix):
        h = _leaky_relu(dot(x, w1) + pv(prefix + "_b1"))
        y = dot(h, w2) + pv(prefix + "_b2")
        return _leaky_relu(batchnorm(y, pv(prefix + "_g"), pv(prefix + "_beta")))

    sf = branch(sf_ref[...], wbr("sf_w1"), wbr("sf_w2"), "sf")
    lf = branch(lf_ref[...], wbr("lf_w1"), wbr("lf_w2"), "lf")

    # Context branch runs third: its weight DMA has had the whole sf/lf
    # compute to complete.
    ct_copy.wait()
    ct = branch(cont_ref[...], wct_vmem[0:in_pad, :],
                wct_vmem[in_pad:in_pad + 512, :], "ct")

    # Merge layer: cat([sf, cont, lf], dim=1) @ mg_w1 computed as three
    # partial matmuls against row slices of mg_w1 (no lane concat); each
    # per-slice DMA wait is interleaved with the preceding matmul so the
    # tail of the 1 MiB transfer stays hidden.
    mg_copies[0].wait()
    h = dot(sf, wmg1_vmem[0:256, :])
    mg_copies[1].wait()
    h = h + dot(ct, wmg1_vmem[256:768, :])
    mg_copies[2].wait()
    h = h + dot(lf, wmg1_vmem[768:1024, :]) + pv("mg_b1")
    h = _leaky_relu(h)

    y = dot(h, wbr("mg_w2")) + pv("mg_b2")
    h = _leaky_relu(batchnorm(y, pv("mg_g"), pv("mg_beta")))

    # Lane-dense (B, 128) store; real output is columns [:output_dim].
    out_ref[...] = dot(h, wout_ref[...]) + pv("out_b")


# --------------------------------------------------------------------------
# Parameter construction (deterministic, mimics init_weights()).
# --------------------------------------------------------------------------
def init_raw_params(key, input_dim, output_dim):
    keys = iter(jax.random.split(key, 16))

    def lin(k, d_in, d_out):
        return (INIT_STD * jax.random.normal(k, (d_in, d_out), jnp.float32),
                jnp.zeros((1, d_out), jnp.float32))

    def bn(k, d):
        return (INIT_STD * jax.random.normal(k, (1, d), jnp.float32),
                jnp.zeros((1, d), jnp.float32))

    p = {}
    p["sf_w1"], p["sf_b1"] = lin(next(keys), 128, 256)
    p["sf_w2"], p["sf_b2"] = lin(next(keys), 256, 256)
    p["sf_g"], p["sf_beta"] = bn(next(keys), 256)
    p["lf_w1"], p["lf_b1"] = lin(next(keys), 128, 256)
    p["lf_w2"], p["lf_b2"] = lin(next(keys), 256, 256)
    p["lf_g"], p["lf_beta"] = bn(next(keys), 256)
    p["ct_w1"], p["ct_b1"] = lin(next(keys), input_dim, 512)
    p["ct_w2"], p["ct_b2"] = lin(next(keys), 512, 512)
    p["ct_g"], p["ct_beta"] = bn(next(keys), 512)
    p["mg_w1"], p["mg_b1"] = lin(next(keys), 1024, 512)
    p["mg_w2"], p["mg_b2"] = lin(next(keys), 512, 256)
    p["mg_g"], p["mg_beta"] = bn(next(keys), 256)
    p["out_w"], p["out_b"] = lin(next(keys), 256, output_dim)
    return p


def pack_params(p, input_dim, output_dim):
    """Pack raw f32 params into the few bf16 / f32 arrays the kernel expects."""
    assert output_dim <= OUT_PAD
    in_pad = _round_up(input_dim, LANE)
    bf = lambda x: x.astype(jnp.bfloat16)

    w_branch = jnp.concatenate(
        [p["sf_w1"], p["lf_w1"], p["sf_w2"], p["lf_w2"], p["mg_w2"]], axis=0)
    assert w_branch.shape == (WBR_ROWS, 256)

    # ct_w1 row-padded to a 128-multiple (zero rows contribute nothing).
    ct_w1_pad = jnp.zeros((in_pad, 512), jnp.float32).at[:input_dim, :].set(p["ct_w1"])
    w_ct = jnp.concatenate([ct_w1_pad, p["ct_w2"]], axis=0)

    w_mg1 = p["mg_w1"]
    w_out = jnp.zeros((256, OUT_PAD), jnp.float32).at[:, :output_dim].set(p["out_w"])

    pvec = jnp.zeros((1, PV_TOTAL), jnp.float32)
    for name in ["sf_b1", "sf_b2", "sf_g", "sf_beta",
                 "lf_b1", "lf_b2", "lf_g", "lf_beta",
                 "ct_b1", "ct_b2", "ct_g", "ct_beta",
                 "mg_b1", "mg_b2", "mg_g", "mg_beta"]:
        off, n = PV_LAYOUT[name]
        pvec = pvec.at[:, off:off + n].set(p[name])
    off, _ = PV_LAYOUT["out_b"]
    pvec = pvec.at[:, off:off + output_dim].set(p["out_b"])

    return dict(w_branch=bf(w_branch), w_ct=bf(w_ct), w_mg1=bf(w_mg1),
                w_out=bf(w_out), pvec=pvec)


# --------------------------------------------------------------------------
# Wrapper.  Inputs carry a leading axis of independent batches (e.g. real and
# fake) — one pallas_call, grid=(num_batches,), weights VMEM-resident across
# grid steps, BatchNorm computed per batch inside each grid step.
# --------------------------------------------------------------------------
@functools.partial(jax.jit, static_argnames=("output_dim",))
def mlp_d_forward(sf, lf, cont, packed, *, output_dim):
    num_batches, batch, _ = sf.shape
    in_dim = cont.shape[-1]
    in_pad = packed["w_ct"].shape[0] - 512
    if in_pad != in_dim:
        cont = jnp.pad(cont, ((0, 0), (0, 0), (0, in_pad - in_dim)))

    def act_spec(d):
        return pl.BlockSpec((None, batch, d), lambda n: (n, 0, 0))

    def resident(shape):
        # Same block for every grid step -> stays VMEM-resident (no re-DMA).
        return pl.BlockSpec(shape, lambda n, _s=len(shape): (0,) * _s)

    hbm = pl.BlockSpec(memory_space=pl.ANY)

    flops = 2 * num_batches * batch * (
        2 * (128 * 256 + 256 * 256)          # shortform + longform
        + in_pad * 512 + 512 * 512           # context
        + 1024 * 512 + 512 * 256             # merge
        + 256 * OUT_PAD)                     # output
    bytes_accessed = (sum(int(v.size) * v.dtype.itemsize for v in packed.values())
                      + sf.nbytes + lf.nbytes + cont.nbytes
                      + num_batches * batch * OUT_PAD * 4)

    out = pl.pallas_call(
        functools.partial(mlp_d_kernel, in_pad=in_pad),
        out_shape=jax.ShapeDtypeStruct((num_batches, batch, OUT_PAD), jnp.float32),
        grid=(num_batches,),
        in_specs=[act_spec(128), act_spec(128), act_spec(in_pad),   # sf, lf, cont
                  resident((WBR_ROWS, 256)),                        # w_branch
                  resident((256, OUT_PAD)),                         # w_out
                  resident((1, PV_TOTAL)),                          # pvec
                  hbm,                                              # w_ct (manual DMA)
                  hbm],                                             # w_mg1 (manual DMA)
        out_specs=act_spec(OUT_PAD),
        scratch_shapes=[pltpu.VMEM((in_pad + 512, 512), jnp.bfloat16),
                        pltpu.VMEM((1024, 512), jnp.bfloat16),
                        pltpu.SemaphoreType.DMA((4,))],
        compiler_params=pltpu.CompilerParams(
            dimension_semantics=("parallel",)),   # v7x: one batch per TC
        cost_estimate=pl.CostEstimate(flops=flops, transcendentals=0,
                                      bytes_accessed=bytes_accessed),
    )(sf, lf, cont,
      packed["w_branch"], packed["w_out"], packed["pvec"],
      packed["w_ct"], packed["w_mg1"])
    return out[:, :, :output_dim]


# --------------------------------------------------------------------------
# Pure-JAX reference (single batch; mirrors the kernel's precision model:
# bf16 MXU inputs, f32 accumulation, f32 everywhere else).
# --------------------------------------------------------------------------
def mlp_d_reference(sf, lf, cont, p):
    def dot(x, w):
        return jnp.dot(x.astype(jnp.bfloat16), w.astype(jnp.bfloat16),
                       preferred_element_type=jnp.float32)

    def linear(x, w, b):
        return dot(x, w) + b

    def bn(x, g, beta):
        mean = jnp.mean(x, axis=0, keepdims=True)
        var = jnp.mean((x - mean) ** 2, axis=0, keepdims=True)
        return (x - mean) * jax.lax.rsqrt(var + EPS) * g + beta

    def branch(x, w1, b1, w2, b2, g, beta):
        h = _leaky_relu(linear(x, w1, b1))
        return _leaky_relu(bn(linear(h, w2, b2), g, beta))

    sf_o = branch(sf, p["sf_w1"], p["sf_b1"], p["sf_w2"], p["sf_b2"],
                  p["sf_g"], p["sf_beta"])
    lf_o = branch(lf, p["lf_w1"], p["lf_b1"], p["lf_w2"], p["lf_b2"],
                  p["lf_g"], p["lf_beta"])
    ct_o = branch(cont, p["ct_w1"], p["ct_b1"], p["ct_w2"], p["ct_b2"],
                  p["ct_g"], p["ct_beta"])
    x = jnp.concatenate([sf_o, ct_o, lf_o], axis=1)
    x = branch(x, p["mg_w1"], p["mg_b1"], p["mg_w2"], p["mg_b2"],
               p["mg_g"], p["mg_beta"])
    return linear(x, p["out_w"], p["out_b"])


if __name__ == "__main__":
    NUM_BATCHES = 2    # e.g. real + fake scored in one launch
    BATCH = 8
    INPUT_DIM = 64     # context feature dim (MLP_D input_dim)
    OUTPUT_DIM = 1     # discriminator scalar output

    key = jax.random.PRNGKey(0)
    k_sf, k_lf, k_ct, k_params = jax.random.split(key, 4)

    sf = jax.random.normal(k_sf, (NUM_BATCHES, BATCH, 128), jnp.float32)
    lf = jax.random.normal(k_lf, (NUM_BATCHES, BATCH, 128), jnp.float32)
    cont = jax.random.normal(k_ct, (NUM_BATCHES, BATCH, INPUT_DIM), jnp.float32)

    raw_params = init_raw_params(k_params, INPUT_DIM, OUTPUT_DIM)
    packed_params = pack_params(raw_params, INPUT_DIM, OUTPUT_DIM)

    out = mlp_d_forward(sf, lf, cont, packed_params, output_dim=OUTPUT_DIM)
    out = jax.block_until_ready(out)

    ref = jnp.stack([mlp_d_reference(sf[i], lf[i], cont[i], raw_params)
                     for i in range(NUM_BATCHES)])
    assert out.shape == (NUM_BATCHES, BATCH, OUTPUT_DIM), out.shape
    assert jnp.allclose(out, ref, atol=3e-4, rtol=3e-3), (out, ref)

    print("KERNEL_OK")
</pallas_src>

<mosaic_0001>
module attributes {stable_mosaic.version = 11 : i64} {
  func.func @mlp_d_kernel(%arg0: i32, %arg1: memref<1x8x128xf32, #tpu.memory_space<vmem>>, %arg2: memref<1x8x128xf32, #tpu.memory_space<vmem>>, %arg3: memref<1x8x128xf32, #tpu.memory_space<vmem>>, %arg4: memref<1280x256xbf16, #tpu.memory_space<vmem>>, %arg5: memref<256x128xbf16, #tpu.memory_space<vmem>>, %arg6: memref<1x5504xf32, #tpu.memory_space<vmem>>, %arg7: memref<640x512xbf16, #tpu.memory_space<any>>, %arg8: memref<1024x512xbf16, #tpu.memory_space<any>>, %arg9: memref<1x8x128xf32, #tpu.memory_space<vmem>>, %arg10: memref<640x512xbf16, #tpu.memory_space<vmem>>, %arg11: memref<1024x512xbf16, #tpu.memory_space<vmem>>, %arg12: memref<4x!tpu.dma_semaphore, #tpu.memory_space<semaphore_mem>>) attributes {dimension_semantics = [#tpu.dimension_semantics<parallel>], iteration_bounds = array<i64: 2>, scalar_prefetch = 0 : i64, scratch_operands = 3 : i64, tpu.core_type = #tpu.core_type<tc>, window_params = [{transform_indices = @transform_0, window_bounds = array<i64: 1, 8, 128>}, {transform_indices = @transform_1, window_bounds = array<i64: 1, 8, 128>}, {transform_indices = @transform_2, window_bounds = array<i64: 1, 8, 128>}, {pipeline_mode = #tpu.pipeline_mode<synchronous>, transform_indices = @transform_3, window_bounds = array<i64: 1280, 256>}, {pipeline_mode = #tpu.pipeline_mode<synchronous>, transform_indices = @transform_4, window_bounds = array<i64: 256, 128>}, {pipeline_mode = #tpu.pipeline_mode<synchronous>, transform_indices = @transform_5, window_bounds = array<i64: 1, 5504>}, {}, {}, {transform_indices = @transform_8, window_bounds = array<i64: 1, 8, 128>}]} {
    %c0_i32 = arith.constant 0 : i32
    %0 = tpu.memref_slice %arg12[%c0_i32] : memref<4x!tpu.dma_semaphore, #tpu.memory_space<semaphore_mem>> -> memref<1x!tpu.dma_semaphore, #tpu.memory_space<semaphore_mem>>
    %1 = tpu.memref_squeeze %0 : memref<1x!tpu.dma_semaphore, #tpu.memory_space<semaphore_mem>> -> memref<!tpu.dma_semaphore, #tpu.memory_space<semaphore_mem>>
    tpu.enqueue_dma source(%arg7 : memref<640x512xbf16, #tpu.memory_space<any>>) target(%arg10 : memref<640x512xbf16, #tpu.memory_space<vmem>>) target_semaphore(%1 : memref<!tpu.dma_semaphore, #tpu.memory_space<semaphore_mem>>)
    %c1_i32 = arith.constant 1 : i32
    %c0_i32_0 = arith.constant 0 : i32
    %c0_i32_1 = arith.constant 0 : i32
    %2 = tpu.memref_slice %arg8[%c0_i32_0, %c0_i32_1] : memref<1024x512xbf16, #tpu.memory_space<any>> -> memref<256x512xbf16, #tpu.memory_space<any>>
    %c0_i32_2 = arith.constant 0 : i32
    %c0_i32_3 = arith.constant 0 : i32
    %3 = tpu.memref_slice %arg11[%c0_i32_2, %c0_i32_3] : memref<1024x512xbf16, #tpu.memory_space<vmem>> -> memref<256x512xbf16, #tpu.memory_space<vmem>>
    %4 = tpu.memref_slice %arg12[%c1_i32] : memref<4x!tpu.dma_semaphore, #tpu.memory_space<semaphore_mem>> -> memref<1x!tpu.dma_semaphore, #tpu.memory_space<semaphore_mem>>
    %5 = tpu.memref_squeeze %4 : memref<1x!tpu.dma_semaphore, #tpu.memory_space<semaphore_mem>> -> memref<!tpu.dma_semaphore, #tpu.memory_space<semaphore_mem>>
    tpu.enqueue_dma source(%2 : memref<256x512xbf16, #tpu.memory_space<any>>) target(%3 : memref<256x512xbf16, #tpu.memory_space<vmem>>) target_semaphore(%5 : memref<!tpu.dma_semaphore, #tpu.memory_space<semaphore_mem>>)
    %c2_i32 = arith.constant 2 : i32
    %c256_i32 = arith.constant 256 : i32
    %c0_i32_4 = arith.constant 0 : i32
    %6 = tpu.memref_slice %arg8[%c256_i32, %c0_i32_4] : memref<1024x512xbf16, #tpu.memory_space<any>> -> memref<512x512xbf16, #tpu.memory_space<any>>
    %c256_i32_5 = arith.constant 256 : i32
    %c0_i32_6 = arith.constant 0 : i32
    %7 = tpu.memref_slice %arg11[%c256_i32_5, %c0_i32_6] : memref<1024x512xbf16, #tpu.memory_space<vmem>> -> memref<512x512xbf16, #tpu.memory_space<vmem>>
    %8 = tpu.memref_slice %arg12[%c2_i32] : memref<4x!tpu.dma_semaphore, #tpu.memory_space<semaphore_mem>> -> memref<1x!tpu.dma_semaphore, #tpu.memory_space<semaphore_mem>>
    %9 = tpu.memref_squeeze %8 : memref<1x!tpu.dma_semaphore, #tpu.memory_space<semaphore_mem>> -> memref<!tpu.dma_semaphore, #tpu.memory_space<semaphore_mem>>
    tpu.enqueue_dma source(%6 : memref<512x512xbf16, #tpu.memory_space<any>>) target(%7 : memref<512x512xbf16, #tpu.memory_space<vmem>>) target_semaphore(%9 : memref<!tpu.dma_semaphore, #tpu.memory_space<semaphore_mem>>)
    %c3_i32 = arith.constant 3 : i32
    %c768_i32 = arith.constant 768 : i32
    %c0_i32_7 = arith.constant 0 : i32
    %10 = tpu.memref_slice %arg8[%c768_i32, %c0_i32_7] : memref<1024x512xbf16, #tpu.memory_space<any>> -> memref<256x512xbf16, #tpu.memory_space<any>>
    %c768_i32_8 = arith.constant 768 : i32
    %c0_i32_9 = arith.constant 0 : i32
    %11 = tpu.memref_slice %arg11[%c768_i32_8, %c0_i32_9] : memref<1024x512xbf16, #tpu.memory_space<vmem>> -> memref<256x512xbf16, #tpu.memory_space<vmem>>
    %12 = tpu.memref_slice %arg12[%c3_i32] : memref<4x!tpu.dma_semaphore, #tpu.memory_space<semaphore_mem>> -> memref<1x!tpu.dma_semaphore, #tpu.memory_space<semaphore_mem>>
    %13 = tpu.memref_squeeze %12 : memref<1x!tpu.dma_semaphore, #tpu.memory_space<semaphore_mem>> -> memref<!tpu.dma_semaphore, #tpu.memory_space<semaphore_mem>>
    tpu.enqueue_dma source(%10 : memref<256x512xbf16, #tpu.memory_space<any>>) target(%11 : memref<256x512xbf16, #tpu.memory_space<vmem>>) target_semaphore(%13 : memref<!tpu.dma_semaphore, #tpu.memory_space<semaphore_mem>>)
    %c0 = arith.constant 0 : index
    %c0_10 = arith.constant 0 : index
    %c0_11 = arith.constant 0 : index
    %14 = vector.load %arg1[%c0, %c0_10, %c0_11] : memref<1x8x128xf32, #tpu.memory_space<vmem>>, vector<1x8x128xf32>
    %15 = vector.shape_cast %14 : vector<1x8x128xf32> to vector<8x128xf32>
    %c0_12 = arith.constant 0 : index
    %c0_13 = arith.constant 0 : index
    %16 = vector.load %arg4[%c0_12, %c0_13] : memref<1280x256xbf16, #tpu.memory_space<vmem>>, vector<128x256xbf16>
    %c256 = arith.constant 256 : index
    %c0_14 = arith.constant 0 : index
    %17 = vector.load %arg4[%c256, %c0_14] : memref<1280x256xbf16, #tpu.memory_space<vmem>>, vector<256x256xbf16>
    %18 = arith.truncf %15 : vector<8x128xf32> to vector<8x128xbf16>
    %cst = arith.constant dense<0.000000e+00> : vector<8x256xf32>
    %19 = tpu.matmul %18, %16, %cst {dimension_numbers = #tpu.dot_dimension_numbers<[1], [0], [0], [1], [0, 0, 1, 1], [], []>} : vector<8x128xbf16>, vector<128x256xbf16>, vector<8x256xf32> -> vector<8x256xf32>
    %c0_15 = arith.constant 0 : index
    %c0_16 = arith.constant 0 : index
    %20 = vector.load %arg6[%c0_15, %c0_16] : memref<1x5504xf32, #tpu.memory_space<vmem>>, vector<1x256xf32>
    %21 = vector.broadcast %20 : vector<1x256xf32> to vector<8x256xf32>
    %22 = arith.addf %19, %21 : vector<8x256xf32>
    %cst_17 = arith.constant 2.000000e-01 : f32
    %23 = vector.broadcast %cst_17 : f32 to vector<8x256xf32>
    %24 = arith.mulf %23, %22 : vector<8x256xf32>
    %25 = arith.maximumf %22, %24 : vector<8x256xf32>
    %26 = arith.truncf %25 : vector<8x256xf32> to vector<8x256xbf16>
    %cst_18 = arith.constant dense<0.000000e+00> : vector<8x256xf32>
    %27 = tpu.matmul %26, %17, %cst_18 {dimension_numbers = #tpu.dot_dimension_numbers<[1], [0], [0], [1], [0, 0, 1, 1], [], []>} : vector<8x256xbf16>, vector<256x256xbf16>, vector<8x256xf32> -> vector<8x256xf32>
    %c0_19 = arith.constant 0 : index
    %c256_20 = arith.constant 256 : index
    %28 = vector.load %arg6[%c0_19, %c256_20] : memref<1x5504xf32, #tpu.memory_space<vmem>>, vector<1x256xf32>
    %29 = vector.broadcast %28 : vector<1x256xf32> to vector<8x256xf32>
    %30 = arith.addf %27, %29 : vector<8x256xf32>
    %c0_21 = arith.constant 0 : index
    %c512 = arith.constant 512 : index
    %31 = vector.load %arg6[%c0_21, %c512] : memref<1x5504xf32, #tpu.memory_space<vmem>>, vector<1x256xf32>
    %c0_22 = arith.constant 0 : index
    %c768 = arith.constant 768 : index
    %32 = vector.load %arg6[%c0_22, %c768] : memref<1x5504xf32, #tpu.memory_space<vmem>>, vector<1x256xf32>
    %cst_23 = arith.constant dense<0.000000e+00> : vector<256xf32>
    %33 = vector.multi_reduction <add>, %30, %cst_23 [0] : vector<8x256xf32> to vector<256xf32>
    %34 = vector.shape_cast %33 : vector<256xf32> to vector<1x256xf32>
    %cst_24 = arith.constant 8.000000e+00 : f32
    %35 = vector.broadcast %cst_24 : f32 to vector<1x256xf32>
    %36 = arith.divf %34, %35 : vector<1x256xf32>
    %37 = vector.broadcast %36 : vector<1x256xf32> to vector<8x256xf32>
    %38 = arith.subf %30, %37 : vector<8x256xf32>
    %39 = arith.mulf %38, %38 : vector<8x256xf32>
    %cst_25 = arith.constant dense<0.000000e+00> : vector<256xf32>
    %40 = vector.multi_reduction <add>, %39, %cst_25 [0] : vector<8x256xf32> to vector<256xf32>
    %41 = vector.shape_cast %40 : vector<256xf32> to vector<1x256xf32>
    %cst_26 = arith.constant 8.000000e+00 : f32
    %42 = vector.broadcast %cst_26 : f32 to vector<1x256xf32>
    %43 = arith.divf %41, %42 : vector<1x256xf32>
    %44 = vector.broadcast %36 : vector<1x256xf32> to vector<8x256xf32>
    %45 = arith.subf %30, %44 : vector<8x256xf32>
    %cst_27 = arith.constant 9.99999974E-6 : f32
    %46 = vector.broadcast %cst_27 : f32 to vector<1x256xf32>
    %47 = arith.addf %43, %46 : vector<1x256xf32>
    %48 = math.rsqrt %47 : vector<1x256xf32>
    %49 = vector.broadcast %48 : vector<1x256xf32> to vector<8x256xf32>
    %50 = arith.mulf %45, %49 : vector<8x256xf32>
    %51 = vector.broadcast %31 : vector<1x256xf32> to vector<8x256xf32>
    %52 = arith.mulf %50, %51 : vector<8x256xf32>
    %53 = vector.broadcast %32 : vector<1x256xf32> to vector<8x256xf32>
    %54 = arith.addf %52, %53 : vector<8x256xf32>
    %cst_28 = arith.constant 2.000000e-01 : f32
    %55 = vector.broadcast %cst_28 : f32 to vector<8x256xf32>
    %56 = arith.mulf %55, %54 : vector<8x256xf32>
    %57 = arith.maximumf %54, %56 : vector<8x256xf32>
    %c0_29 = arith.constant 0 : index
    %c0_30 = arith.constant 0 : index
    %c0_31 = arith.constant 0 : index
    %58 = vector.load %arg2[%c0_29, %c0_30, %c0_31] : memref<1x8x128xf32, #tpu.memory_space<vmem>>, vector<1x8x128xf32>
    %59 = vector.shape_cast %58 : vector<1x8x128xf32> to vector<8x128xf32>
    %c128 = arith.constant 128 : index
    %c0_32 = arith.constant 0 : index
    %60 = vector.load %arg4[%c128, %c0_32] : memref<1280x256xbf16, #tpu.memory_space<vmem>>, vector<128x256xbf16>
    %c512_33 = arith.constant 512 : index
    %c0_34 = arith.constant 0 : index
    %61 = vector.load %arg4[%c512_33, %c0_34] : memref<1280x256xbf16, #tpu.memory_space<vmem>>, vector<256x256xbf16>
    %62 = arith.truncf %59 : vector<8x128xf32> to vector<8x128xbf16>
    %cst_35 = arith.constant dense<0.000000e+00> : vector<8x256xf32>
    %63 = tpu.matmul %62, %60, %cst_35 {dimension_numbers = #tpu.dot_dimension_numbers<[1], [0], [0], [1], [0, 0, 1, 1], [], []>} : vector<8x128xbf16>, vector<128x256xbf16>, vector<8x256xf32> -> vector<8x256xf32>
    %c0_36 = arith.constant 0 : index
    %c1024 = arith.constant 1024 : index
    %64 = vector.load %arg6[%c0_36, %c1024] : memref<1x5504xf32, #tpu.memory_space<vmem>>, vector<1x256xf32>
    %65 = vector.broadcast %64 : vector<1x256xf32> to vector<8x256xf32>
    %66 = arith.addf %63, %65 : vector<8x256xf32>
    %cst_37 = arith.constant 2.000000e-01 : f32
    %67 = vector.broadcast %cst_37 : f32 to vector<8x256xf32>
    %68 = arith.mulf %67, %66 : vector<8x256xf32>
    %69 = arith.maximumf %66, %68 : vector<8x256xf32>
    %70 = arith.truncf %69 : vector<8x256xf32> to vector<8x256xbf16>
    %cst_38 = arith.constant dense<0.000000e+00> : vector<8x256xf32>
    %71 = tpu.matmul %70, %61, %cst_38 {dimension_numbers = #tpu.dot_dimension_numbers<[1], [0], [0], [1], [0, 0, 1, 1], [], []>} : vector<8x256xbf16>, vector<256x256xbf16>, vector<8x256xf32> -> vector<8x256xf32>
    %c0_39 = arith.constant 0 : index
    %c1280 = arith.constant 1280 : index
    %72 = vector.load %arg6[%c0_39, %c1280] : memref<1x5504xf32, #tpu.memory_space<vmem>>, vector<1x256xf32>
    %73 = vector.broadcast %72 : vector<1x256xf32> to vector<8x256xf32>
    %74 = arith.addf %71, %73 : vector<8x256xf32>
    %c0_40 = arith.constant 0 : index
    %c1536 = arith.constant 1536 : index
    %75 = vector.load %arg6[%c0_40, %c1536] : memref<1x5504xf32, #tpu.memory_space<vmem>>, vector<1x256xf32>
    %c0_41 = arith.constant 0 : index
    %c1792 = arith.constant 1792 : index
    %76 = vector.load %arg6[%c0_41, %c1792] : memref<1x5504xf32, #tpu.memory_space<vmem>>, vector<1x256xf32>
    %cst_42 = arith.constant dense<0.000000e+00> : vector<256xf32>
    %77 = vector.multi_reduction <add>, %74, %cst_42 [0] : vector<8x256xf32> to vector<256xf32>
    %78 = vector.shape_cast %77 : vector<256xf32> to vector<1x256xf32>
    %cst_43 = arith.constant 8.000000e+00 : f32
    %79 = vector.broadcast %cst_43 : f32 to vector<1x256xf32>
    %80 = arith.divf %78, %79 : vector<1x256xf32>
    %81 = vector.broadcast %80 : vector<1x256xf32> to vector<8x256xf32>
    %82 = arith.subf %74, %81 : vector<8x256xf32>
    %83 = arith.mulf %82, %82 : vector<8x256xf32>
    %cst_44 = arith.constant dense<0.000000e+00> : vector<256xf32>
    %84 = vector.multi_reduction <add>, %83, %cst_44 [0] : vector<8x256xf32> to vector<256xf32>
    %85 = vector.shape_cast %84 : vector<256xf32> to vector<1x256xf32>
    %cst_45 = arith.constant 8.000000e+00 : f32
    %86 = vector.broadcast %cst_45 : f32 to vector<1x256xf32>
    %87 = arith.divf %85, %86 : vector<1x256xf32>
    %88 = vector.broadcast %80 : vector<1x256xf32> to vector<8x256xf32>
    %89 = arith.subf %74, %88 : vector<8x256xf32>
    %cst_46 = arith.constant 9.99999974E-6 : f32
    %90 = vector.broadcast %cst_46 : f32 to vector<1x256xf32>
    %91 = arith.addf %87, %90 : vector<1x256xf32>
    %92 = math.rsqrt %91 : vector<1x256xf32>
    %93 = vector.broadcast %92 : vector<1x256xf32> to vector<8x256xf32>
    %94 = arith.mulf %89, %93 : vector<8x256xf32>
    %95 = vector.broadcast %75 : vector<1x256xf32> to vector<8x256xf32>
    %96 = arith.mulf %94, %95 : vector<8x256xf32>
    %97 = vector.broadcast %76 : vector<1x256xf32> to vector<8x256xf32>
    %98 = arith.addf %96, %97 : vector<8x256xf32>
    %cst_47 = arith.constant 2.000000e-01 : f32
    %99 = vector.broadcast %cst_47 : f32 to vector<8x256xf32>
    %100 = arith.mulf %99, %98 : vector<8x256xf32>
    %101 = arith.maximumf %98, %100 : vector<8x256xf32>
    %c0_i32_48 = arith.constant 0 : i32
    %102 = tpu.memref_slice %arg12[%c0_i32_48] : memref<4x!tpu.dma_semaphore, #tpu.memory_space<semaphore_mem>> -> memref<1x!tpu.dma_semaphore, #tpu.memory_space<semaphore_mem>>
    %103 = tpu.memref_squeeze %102 : memref<1x!tpu.dma_semaphore, #tpu.memory_space<semaphore_mem>> -> memref<!tpu.dma_semaphore, #tpu.memory_space<semaphore_mem>>
    tpu.wait_dma2 semaphore(%103 : memref<!tpu.dma_semaphore, #tpu.memory_space<semaphore_mem>>) src(%arg7 : memref<640x512xbf16, #tpu.memory_space<any>>) dst(%arg10 : memref<640x512xbf16, #tpu.memory_space<vmem>>)
    %c0_49 = arith.constant 0 : index
    %c0_50 = arith.constant 0 : index
    %c0_51 = arith.constant 0 : index
    %104 = vector.load %arg3[%c0_49, %c0_50, %c0_51] : memref<1x8x128xf32, #tpu.memory_space<vmem>>, vector<1x8x128xf32>
    %105 = vector.shape_cast %104 : vector<1x8x128xf32> to vector<8x128xf32>
    %c0_52 = arith.constant 0 : index
    %c0_53 = arith.constant 0 : index
    %106 = vector.load %arg10[%c0_52, %c0_53] : memref<640x512xbf16, #tpu.memory_space<vmem>>, vector<128x512xbf16>
    %c128_54 = arith.constant 128 : index
    %c0_55 = arith.constant 0 : index
    %107 = vector.load %arg10[%c128_54, %c0_55] : memref<640x512xbf16, #tpu.memory_space<vmem>>, vector<512x512xbf16>
    %108 = arith.truncf %105 : vector<8x128xf32> to vector<8x128xbf16>
    %cst_56 = arith.constant dense<0.000000e+00> : vector<8x512xf32>
    %109 = tpu.matmul %108, %106, %cst_56 {dimension_numbers = #tpu.dot_dimension_numbers<[1], [0], [0], [1], [0, 0, 1, 1], [], []>} : vector<8x128xbf16>, vector<128x512xbf16>, vector<8x512xf32> -> vector<8x512xf32>
    %c0_57 = arith.constant 0 : index
    %c2048 = arith.constant 2048 : index
    %110 = vector.load %arg6[%c0_57, %c2048] : memref<1x5504xf32, #tpu.memory_space<vmem>>, vector<1x512xf32>
    %111 = vector.broadcast %110 : vector<1x512xf32> to vector<8x512xf32>
    %112 = arith.addf %109, %111 : vector<8x512xf32>
    %cst_58 = arith.constant 2.000000e-01 : f32
    %113 = vector.broadcast %cst_58 : f32 to vector<8x512xf32>
    %114 = arith.mulf %113, %112 : vector<8x512xf32>
    %115 = arith.maximumf %112, %114 : vector<8x512xf32>
    %116 = arith.truncf %115 : vector<8x512xf32> to vector<8x512xbf16>
    %cst_59 = arith.constant dense<0.000000e+00> : vector<8x512xf32>
    %117 = tpu.matmul %116, %107, %cst_59 {dimension_numbers = #tpu.dot_dimension_numbers<[1], [0], [0], [1], [0, 0, 1, 1], [], []>} : vector<8x512xbf16>, vector<512x512xbf16>, vector<8x512xf32> -> vector<8x512xf32>
    %c0_60 = arith.constant 0 : index
    %c2560 = arith.constant 2560 : index
    %118 = vector.load %arg6[%c0_60, %c2560] : memref<1x5504xf32, #tpu.memory_space<vmem>>, vector<1x512xf32>
    %119 = vector.broadcast %118 : vector<1x512xf32> to vector<8x512xf32>
    %120 = arith.addf %117, %119 : vector<8x512xf32>
    %c0_61 = arith.constant 0 : index
    %c3072 = arith.constant 3072 : index
    %121 = vector.load %arg6[%c0_61, %c3072] : memref<1x5504xf32, #tpu.memory_space<vmem>>, vector<1x512xf32>
    %c0_62 = arith.constant 0 : index
    %c3584 = arith.constant 3584 : index
    %122 = vector.load %arg6[%c0_62, %c3584] : memref<1x5504xf32, #tpu.memory_space<vmem>>, vector<1x512xf32>
    %cst_63 = arith.constant dense<0.000000e+00> : vector<512xf32>
    %123 = vector.multi_reduction <add>, %120, %cst_63 [0] : vector<8x512xf32> to vector<512xf32>
    %124 = vector.shape_cast %123 : vector<512xf32> to vector<1x512xf32>
    %cst_64 = arith.constant 8.000000e+00 : f32
    %125 = vector.broadcast %cst_64 : f32 to vector<1x512xf32>
    %126 = arith.divf %124, %125 : vector<1x512xf32>
    %127 = vector.broadcast %126 : vector<1x512xf32> to vector<8x512xf32>
    %128 = arith.subf %120, %127 : vector<8x512xf32>
    %129 = arith.mulf %128, %128 : vector<8x512xf32>
    %cst_65 = arith.constant dense<0.000000e+00> : vector<512xf32>
    %130 = vector.multi_reduction <add>, %129, %cst_65 [0] : vector<8x512xf32> to vector<512xf32>
    %131 = vector.shape_cast %130 : vector<512xf32> to vector<1x512xf32>
    %cst_66 = arith.constant 8.000000e+00 : f32
    %132 = vector.broadcast %cst_66 : f32 to vector<1x512xf32>
    %133 = arith.divf %131, %132 : vector<1x512xf32>
    %134 = vector.broadcast %126 : vector<1x512xf32> to vector<8x512xf32>
    %135 = arith.subf %120, %134 : vector<8x512xf32>
    %cst_67 = arith.constant 9.99999974E-6 : f32
    %136 = vector.broadcast %cst_67 : f32 to vector<1x512xf32>
    %137 = arith.addf %133, %136 : vector<1x512xf32>
    %138 = math.rsqrt %137 : vector<1x512xf32>
    %139 = vector.broadcast %138 : vector<1x512xf32> to vector<8x512xf32>
    %140 = arith.mulf %135, %139 : vector<8x512xf32>
    %141 = vector.broadcast %121 : vector<1x512xf32> to vector<8x512xf32>
    %142 = arith.mulf %140, %141 : vector<8x512xf32>
    %143 = vector.broadcast %122 : vector<1x512xf32> to vector<8x512xf32>
    %144 = arith.addf %142, %143 : vector<8x512xf32>
    %cst_68 = arith.constant 2.000000e-01 : f32
    %145 = vector.broadcast %cst_68 : f32 to vector<8x512xf32>
    %146 = arith.mulf %145, %144 : vector<8x512xf32>
    %147 = arith.maximumf %144, %146 : vector<8x512xf32>
    %c1_i32_69 = arith.constant 1 : i32
    %c0_i32_70 = arith.constant 0 : i32
    %c0_i32_71 = arith.constant 0 : i32
    %148 = tpu.memref_slice %arg8[%c0_i32_70, %c0_i32_71] : memref<1024x512xbf16, #tpu.memory_space<any>> -> memref<256x512xbf16, #tpu.memory_space<any>>
    %c0_i32_72 = arith.constant 0 : i32
    %c0_i32_73 = arith.constant 0 : i32
    %149 = tpu.memref_slice %arg11[%c0_i32_72, %c0_i32_73] : memref<1024x512xbf16, #tpu.memory_space<vmem>> -> memref<256x512xbf16, #tpu.memory_space<vmem>>
    %150 = tpu.memref_slice %arg12[%c1_i32_69] : memref<4x!tpu.dma_semaphore, #tpu.memory_space<semaphore_mem>> -> memref<1x!tpu.dma_semaphore, #tpu.memory_space<semaphore_mem>>
    %151 = tpu.memref_squeeze %150 : memref<1x!tpu.dma_semaphore, #tpu.memory_space<semaphore_mem>> -> memref<!tpu.dma_semaphore, #tpu.memory_space<semaphore_mem>>
    tpu.wait_dma2 semaphore(%151 : memref<!tpu.dma_semaphore, #tpu.memory_space<semaphore_mem>>) src(%148 : memref<256x512xbf16, #tpu.memory_space<any>>) dst(%149 : memref<256x512xbf16, #tpu.memory_space<vmem>>)
    %c0_74 = arith.constant 0 : index
    %c0_75 = arith.constant 0 : index
    %152 = vector.load %arg11[%c0_74, %c0_75] : memref<1024x512xbf16, #tpu.memory_space<vmem>>, vector<256x512xbf16>
    %153 = arith.truncf %57 : vector<8x256xf32> to vector<8x256xbf16>
    %cst_76 = arith.constant dense<0.000000e+00> : vector<8x512xf32>
    %154 = tpu.matmul %153, %152, %cst_76 {dimension_numbers = #tpu.dot_dimension_numbers<[1], [0], [0], [1], [0, 0, 1, 1], [], []>} : vector<8x256xbf16>, vector<256x512xbf16>, vector<8x512xf32> -> vector<8x512xf32>
    %c2_i32_77 = arith.constant 2 : i32
    %c256_i32_78 = arith.constant 256 : i32
    %c0_i32_79 = arith.constant 0 : i32
    %155 = tpu.memref_slice %arg8[%c256_i32_78, %c0_i32_79] : memref<1024x512xbf16, #tpu.memory_space<any>> -> memref<512x512xbf16, #tpu.memory_space<any>>
    %c256_i32_80 = arith.constant 256 : i32
    %c0_i32_81 = arith.constant 0 : i32
    %156 = tpu.memref_slice %arg11[%c256_i32_80, %c0_i32_81] : memref<1024x512xbf16, #tpu.memory_space<vmem>> -> memref<512x512xbf16, #tpu.memory_space<vmem>>
    %157 = tpu.memref_slice %arg12[%c2_i32_77] : memref<4x!tpu.dma_semaphore, #tpu.memory_space<semaphore_mem>> -> memref<1x!tpu.dma_semaphore, #tpu.memory_space<semaphore_mem>>
    %158 = tpu.memref_squeeze %157 : memref<1x!tpu.dma_semaphore, #tpu.memory_space<semaphore_mem>> -> memref<!tpu.dma_semaphore, #tpu.memory_space<semaphore_mem>>
    tpu.wait_dma2 semaphore(%158 : memref<!tpu.dma_semaphore, #tpu.memory_space<semaphore_mem>>) src(%155 : memref<512x512xbf16, #tpu.memory_space<any>>) dst(%156 : memref<512x512xbf16, #tpu.memory_space<vmem>>)
    %c256_82 = arith.constant 256 : index
    %c0_83 = arith.constant 0 : index
    %159 = vector.load %arg11[%c256_82, %c0_83] : memref<1024x512xbf16, #tpu.memory_space<vmem>>, vector<512x512xbf16>
    %160 = arith.truncf %147 : vector<8x512xf32> to vector<8x512xbf16>
    %cst_84 = arith.constant dense<0.000000e+00> : vector<8x512xf32>
    %161 = tpu.matmul %160, %159, %cst_84 {dimension_numbers = #tpu.dot_dimension_numbers<[1], [0], [0], [1], [0, 0, 1, 1], [], []>} : vector<8x512xbf16>, vector<512x512xbf16>, vector<8x512xf32> -> vector<8x512xf32>
    %162 = arith.addf %154, %161 : vector<8x512xf32>
    %c3_i32_85 = arith.constant 3 : i32
    %c768_i32_86 = arith.constant 768 : i32
    %c0_i32_87 = arith.constant 0 : i32
    %163 = tpu.memref_slice %arg8[%c768_i32_86, %c0_i32_87] : memref<1024x512xbf16, #tpu.memory_space<any>> -> memref<256x512xbf16, #tpu.memory_space<any>>
    %c768_i32_88 = arith.constant 768 : i32
    %c0_i32_89 = arith.constant 0 : i32
    %164 = tpu.memref_slice %arg11[%c768_i32_88, %c0_i32_89] : memref<1024x512xbf16, #tpu.memory_space<vmem>> -> memref<256x512xbf16, #tpu.memory_space<vmem>>
    %165 = tpu.memref_slice %arg12[%c3_i32_85] : memref<4x!tpu.dma_semaphore, #tpu.memory_space<semaphore_mem>> -> memref<1x!tpu.dma_semaphore, #tpu.memory_space<semaphore_mem>>
    %166 = tpu.memref_squeeze %165 : memref<1x!tpu.dma_semaphore, #tpu.memory_space<semaphore_mem>> -> memref<!tpu.dma_semaphore, #tpu.memory_space<semaphore_mem>>
    tpu.wait_dma2 semaphore(%166 : memref<!tpu.dma_semaphore, #tpu.memory_space<semaphore_mem>>) src(%163 : memref<256x512xbf16, #tpu.memory_space<any>>) dst(%164 : memref<256x512xbf16, #tpu.memory_space<vmem>>)
    %c768_90 = arith.constant 768 : index
    %c0_91 = arith.constant 0 : index
    %167 = vector.load %arg11[%c768_90, %c0_91] : memref<1024x512xbf16, #tpu.memory_space<vmem>>, vector<256x512xbf16>
    %168 = arith.truncf %101 : vector<8x256xf32> to vector<8x256xbf16>
    %cst_92 = arith.constant dense<0.000000e+00> : vector<8x512xf32>
    %169 = tpu.matmul %168, %167, %cst_92 {dimension_numbers = #tpu.dot_dimension_numbers<[1], [0], [0], [1], [0, 0, 1, 1], [], []>} : vector<8x256xbf16>, vector<256x512xbf16>, vector<8x512xf32> -> vector<8x512xf32>
    %170 = arith.addf %162, %169 : vector<8x512xf32>
    %c0_93 = arith.constant 0 : index
    %c4096 = arith.constant 4096 : index
    %171 = vector.load %arg6[%c0_93, %c4096] : memref<1x5504xf32, #tpu.memory_space<vmem>>, vector<1x512xf32>
    %172 = vector.broadcast %171 : vector<1x512xf32> to vector<8x512xf32>
    %173 = arith.addf %170, %172 : vector<8x512xf32>
    %cst_94 = arith.constant 2.000000e-01 : f32
    %174 = vector.broadcast %cst_94 : f32 to vector<8x512xf32>
    %175 = arith.mulf %174, %173 : vector<8x512xf32>
    %176 = arith.maximumf %173, %175 : vector<8x512xf32>
    %c768_95 = arith.constant 768 : index
    %c0_96 = arith.constant 0 : index
    %177 = vector.load %arg4[%c768_95, %c0_96] : memref<1280x256xbf16, #tpu.memory_space<vmem>>, vector<512x256xbf16>
    %178 = arith.truncf %176 : vector<8x512xf32> to vector<8x512xbf16>
    %cst_97 = arith.constant dense<0.000000e+00> : vector<8x256xf32>
    %179 = tpu.matmul %178, %177, %cst_97 {dimension_numbers = #tpu.dot_dimension_numbers<[1], [0], [0], [1], [0, 0, 1, 1], [], []>} : vector<8x512xbf16>, vector<512x256xbf16>, vector<8x256xf32> -> vector<8x256xf32>
    %c0_98 = arith.constant 0 : index
    %c4608 = arith.constant 4608 : index
    %180 = vector.load %arg6[%c0_98, %c4608] : memref<1x5504xf32, #tpu.memory_space<vmem>>, vector<1x256xf32>
    %181 = vector.broadcast %180 : vector<1x256xf32> to vector<8x256xf32>
    %182 = arith.addf %179, %181 : vector<8x256xf32>
    %c0_99 = arith.constant 0 : index
    %c4864 = arith.constant 4864 : index
    %183 = vector.load %arg6[%c0_99, %c4864] : memref<1x5504xf32, #tpu.memory_space<vmem>>, vector<1x256xf32>
    %c0_100 = arith.constant 0 : index
    %c5120 = arith.constant 5120 : index
    %184 = vector.load %arg6[%c0_100, %c5120] : memref<1x5504xf32, #tpu.memory_space<vmem>>, vector<1x256xf32>
    %cst_101 = arith.constant dense<0.000000e+00> : vector<256xf32>
    %185 = vector.multi_reduction <add>, %182, %cst_101 [0] : vector<8x256xf32> to vector<256xf32>
    %186 = vector.shape_cast %185 : vector<256xf32> to vector<1x256xf32>
    %cst_102 = arith.constant 8.000000e+00 : f32
    %187 = vector.broadcast %cst_102 : f32 to vector<1x256xf32>
    %188 = arith.divf %186, %187 : vector<1x256xf32>
    %189 = vector.broadcast %188 : vector<1x256xf32> to vector<8x256xf32>
    %190 = arith.subf %182, %189 : vector<8x256xf32>
    %191 = arith.mulf %190, %190 : vector<8x256xf32>
    %cst_103 = arith.constant dense<0.000000e+00> : vector<256xf32>
    %192 = vector.multi_reduction <add>, %191, %cst_103 [0] : vector<8x256xf32> to vector<256xf32>
    %193 = vector.shape_cast %192 : vector<256xf32> to vector<1x256xf32>
    %cst_104 = arith.constant 8.000000e+00 : f32
    %194 = vector.broadcast %cst_104 : f32 to vector<1x256xf32>
    %195 = arith.divf %193, %194 : vector<1x256xf32>
    %196 = vector.broadcast %188 : vector<1x256xf32> to vector<8x256xf32>
    %197 = arith.subf %182, %196 : vector<8x256xf32>
    %cst_105 = arith.constant 9.99999974E-6 : f32
    %198 = vector.broadcast %cst_105 : f32 to vector<1x256xf32>
    %199 = arith.addf %195, %198 : vector<1x256xf32>
    %200 = math.rsqrt %199 : vector<1x256xf32>
    %201 = vector.broadcast %200 : vector<1x256xf32> to vector<8x256xf32>
    %202 = arith.mulf %197, %201 : vector<8x256xf32>
    %203 = vector.broadcast %183 : vector<1x256xf32> to vector<8x256xf32>
    %204 = arith.mulf %202, %203 : vector<8x256xf32>
    %205 = vector.broadcast %184 : vector<1x256xf32> to vector<8x256xf32>
    %206 = arith.addf %204, %205 : vector<8x256xf32>
    %cst_106 = arith.constant 2.000000e-01 : f32
    %207 = vector.broadcast %cst_106 : f32 to vector<8x256xf32>
    %208 = arith.mulf %207, %206 : vector<8x256xf32>
    %209 = arith.maximumf %206, %208 : vector<8x256xf32>
    %c0_107 = arith.constant 0 : index
    %c0_108 = arith.constant 0 : index
    %210 = vector.load %arg5[%c0_107, %c0_108] : memref<256x128xbf16, #tpu.memory_space<vmem>>, vector<256x128xbf16>
    %211 = arith.truncf %209 : vector<8x256xf32> to vector<8x256xbf16>
    %cst_109 = arith.constant dense<0.000000e+00> : vector<8x128xf32>
    %212 = tpu.matmul %211, %210, %cst_109 {dimension_numbers = #tpu.dot_dimension_numbers<[1], [0], [0], [1], [0, 0, 1, 1], [], []>} : vector<8x256xbf16>, vector<256x128xbf16>, vector<8x128xf32> -> vector<8x128xf32>
    %c0_110 = arith.constant 0 : index
    %c5376 = arith.constant 5376 : index
    %213 = vector.load %arg6[%c0_110, %c5376] : memref<1x5504xf32, #tpu.memory_space<vmem>>, vector<1x128xf32>
    %214 = vector.broadcast %213 : vector<1x128xf32> to vector<8x128xf32>
    %215 = arith.addf %212, %214 : vector<8x128xf32>
    %c0_111 = arith.constant 0 : index
    %c0_112 = arith.constant 0 : index
    %c0_113 = arith.constant 0 : index
    %216 = vector.load %arg9[%c0_111, %c0_112, %c0_113] : memref<1x8x128xf32, #tpu.memory_space<vmem>>, vector<1x8x128xf32>
    %217 = vector.shape_cast %216 : vector<1x8x128xf32> to vector<8x128xf32>
    %218 = vector.shape_cast %215 : vector<8x128xf32> to vector<1x8x128xf32>
    tpu.vector_store %arg9[%c0_111, %c0_112, %c0_113], %218 {strides = array<i32>} : memref<1x8x128xf32, #tpu.memory_space<vmem>>, vector<1x8x128xf32>,
    return
  }
  func.func @transform_0(%arg0: i32) -> (i32, i32, i32) {
    %c0_i32 = arith.constant 0 : i32
    %c0_i32_0 = arith.constant 0 : i32
    %c0_i32_1 = arith.constant 0 : i32
    return %arg0, %c0_i32, %c0_i32_0 : i32, i32, i32
  }
  func.func @transform_1(%arg0: i32) -> (i32, i32, i32) {
    %c0_i32 = arith.constant 0 : i32
    %c0_i32_0 = arith.constant 0 : i32
    %c0_i32_1 = arith.constant 0 : i32
    return %arg0, %c0_i32, %c0_i32_0 : i32, i32, i32
  }
  func.func @transform_2(%arg0: i32) -> (i32, i32, i32) {
    %c0_i32 = arith.constant 0 : i32
    %c0_i32_0 = arith.constant 0 : i32
    %c0_i32_1 = arith.constant 0 : i32
    return %arg0, %c0_i32, %c0_i32_0 : i32, i32, i32
  }
  func.func @transform_3(%arg0: i32) -> (i32, i32) {
    %c0_i32 = arith.constant 0 : i32
    %c0_i32_0 = arith.constant 0 : i32
    %c0_i32_1 = arith.constant 0 : i32
    return %c0_i32, %c0_i32_0 : i32, i32
  }
  func.func @transform_4(%arg0: i32) -> (i32, i32) {
    %c0_i32 = arith.constant 0 : i32
    %c0_i32_0 = arith.constant 0 : i32
    %c0_i32_1 = arith.constant 0 : i32
    return %c0_i32, %c0_i32_0 : i32, i32
  }
  func.func @transform_5(%arg0: i32) -> (i32, i32) {
    %c0_i32 = arith.constant 0 : i32
    %c0_i32_0 = arith.constant 0 : i32
    %c0_i32_1 = arith.constant 0 : i32
    return %c0_i32, %c0_i32_0 : i32, i32
  }
  func.func @transform_8(%arg0: i32) -> (i32, i32, i32) {
    %c0_i32 = arith.constant 0 : i32
    %c0_i32_0 = arith.constant 0 : i32
    %c0_i32_1 = arith.constant 0 : i32
    return %arg0, %c0_i32, %c0_i32_0 : i32, i32, i32
  }
}

</mosaic_0001>

<bundles_post_ra>
// kernel: mlp_d_forward.1
= control target key start
LH: loop header
LB: loop body
LE: loop exit
PB: predicated region body
PF: predicated region fallthrough
CT: control target
= control target key end

     0   :  { %s5086_s0 = inlined_call_operand.hbm [shape: f32[2,8,128], index: 0, kind: input, shape index: {}]   ;;  %s5087_s1 = inlined_call_operand.hbm [shape: f32[2,8,128], index: 1, kind: input, shape index: {}]   ;;  %s5088_s2 = inlined_call_operand.vmem [shape: f32[2,8,128], index: 2, kind: input, shape index: {}]   ;;  %s5089_s3 = inlined_call_operand.hbm [shape: bf16[1280,256], index: 3, kind: input, shape index: {}]   ;;  %s5090_s4 = inlined_call_operand.hbm [shape: bf16[256,128], index: 4, kind: input, shape index: {}]   ;;  %s5091_s5 = inlined_call_operand.vmem [shape: f32[1,5504], index: 5, kind: input, shape index: {}]   ;;  %s5092_s6 = inlined_call_operand.hbm [shape: bf16[640,512], index: 6, kind: input, shape index: {}]   ;;  %s5093_s7 = inlined_call_operand.hbm [shape: bf16[1024,512], index: 7, kind: input, shape index: {}]   ;;  %s5094_s8 = inlined_call_operand.vmem [shape: f32[2,8,128], index: 8, kind: output, shape index: {}]  }
   0x1   :  { %5105 = sst [smem:[#allocation53_spill]] %s5089_s3 }
   0x2   :  { %5106 = sst [smem:[#allocation54_spill]] %s5090_s4 }
   0x3   :  { %13 = vsyncpa [#allocation6], 0 }
   0x4   :  { %15 = vsyncpa [#allocation6 + $0x1], 0 }
   0x5   :  { %16 = vsyncpa [#allocation8], 0 }
   0x6   :  { %18 = vsyncpa [#allocation8 + $0x1], 0 }
   0x7   :  { %19 = vsyncpa [#allocation11], 0  ;;  %s4417_s27 = smov 0   ;;  %s4419_s28 = smov 0  }
   0x8   :  { %s4421_s29 = smov 0   ;;  %s4423_s30 = smov 0  }
   0x9 LB: > { %s4436_s9 = sadd.s32 4294967295, %s4343_s30   ;;  %p45_p0 = scmp.ne.s32.totalorder %s4335_s28, %s4331_s27  ;;  %s4343_s30 = sphi %s4423_s30, %s5175_s30   ;;  %s4339_s29 = sphi %s4421_s29, %s5174_s29   ;;  %s4335_s28 = sphi %s4419_s28, %s5173_s28   ;;  %s4331_s27 = sphi %s4417_s27, %s5172_s27  }
   0xa   : > { %p5095_p1 = scmp.eq.s32.totalorder %s4436_s9, 0  ;;  %p3563_p2 = scmp.ge.s32.totalorder %s4343_s30, 1 }
   0xb   : > { %p197_p3 = scmp.lt.s32.totalorder %s4343_s30, 3  ;;  %s4345_s12 = smov [#allocation9]  }
   0xc   : > { %p4444_p4 = por %p5095_p1, %p45_p0  ;;  %s209_s13 = sshll.u32 %s4345_s12, 4  ;;  %s210_s13 = int_to_ptr.vmem [resolvable:$true] %s209_s13 }
   0xd   : > { %p4448_p5 = pnand %p3563_p2, %p197_p3  ;;  %s4346_s15 = smov [#allocation10]  }
   0xe   : > { %s5107_s10 = scalar_select %p4444_p4, 1, 0 }
   0xf   : > { %s5108_s11 = scalar_select %p4448_p5, 1, 0 }
  0x10   : > { %p3821_p6 = pneg %p4448_p5  ;;  %s222_s16 = sshll.u32 %s4346_s15, 4  ;;  %s4460_s16 = int_to_ptr.vmem [resolvable:$true] %s222_s16 }
  0x11   : > { %s5110_s3 = sld [smem:[#allocation53_spill]] }
  0x12   : > { %p4456_p7 = pnand %p3821_p6, %p5095_p1 }
  0x14   : > { %p4175_p9 = pneg %p4456_p7 }
  0x17   : > { %s4173_s19 = scalar_lea.hbm %s5110_s3, 20480 }
  0x18   : > { %p4174_p8 = scmp.ne.s32.totalorder %s5110_s3, %s4173_s19  ;;  %p4180_p12 = scmp.lt.u32.totalorder %s4173_s19, %s5110_s3 }
  0x1a   : > { %p4176_p10 = pnand %p4175_p9, %p4174_p8 }
  0x1c   : > { %p4177_p11 = pneg %p4176_p10 }
  0x1e   : > { %p4182_p13 = pnand %p4180_p12, %p4177_p11 }
  0x20   : > { %4185 = shalt.err (!%p4182_p13)
}
  0x21   : > { %s4186_s24 = scalar_lea.vmem %s210_s13, 20480  ;;  %p4194_p6 = scmp.lt.s32.totalorder %s210_s13, %s210_s13 }
  0x22   : > { %p4187_p0 = scmp.ne.s32.totalorder %s210_s13, %s4186_s24  ;;  %p4195_p1 = scmp.lt.s32.totalorder %s4186_s24, %s4186_s24 }
  0x24   : > { %p4189_p2 = pnand %p4187_p0, %p4175_p9  ;;  %p4196_p4 = por %p4195_p1, %p4194_p6 }
  0x26   : > { %p4190_p3 = pneg %p4189_p2 }
  0x28   : > { %p4197_p5 = pnand %p4196_p4, %p4190_p3 }
  0x2a   : > { %4200 = shalt.err (!%p4197_p5)
}
  0x2b   : > { %s4347_s25 = smov 128   ;;  %s4348_s26 = smov 8  }
  0x2c   : > { %3824 = dma.hbm_to_vmem [thread:$0]  (!%p4456_p7), %s5110_s3, 20480, %s210_s13, [#allocation8], %s4347_s25, %s4347_s25, %s4348_s26  }
  0x2d   : > { %s5111_s4 = sld [smem:[#allocation54_spill]] }
  0x33   : > { %s4201_s18 = scalar_lea.hbm %s5111_s4, 2048 }
  0x34   : > { %p4202_p8 = scmp.ne.s32.totalorder %s5111_s4, %s4201_s18  ;;  %p4208_p5 = scmp.lt.u32.totalorder %s4201_s18, %s5111_s4 }
  0x36   : > { %p4204_p1 = pnand %p4202_p8, %p4175_p9 }
  0x38   : > { %p4205_p4 = pneg %p4204_p1 }
  0x3a   : > { %p4210_p10 = pnand %p4208_p5, %p4205_p4 }
  0x3c   : > { %4213 = shalt.err (!%p4210_p10)
}
  0x3d   : > { %s4214_s13 = scalar_lea.vmem %s4460_s16, 2048  ;;  %p4222_p0 = scmp.lt.s32.totalorder %s4460_s16, %s4460_s16 }
  0x3e   : > { %p4215_p11 = scmp.ne.s32.totalorder %s4460_s16, %s4214_s13  ;;  %p4223_p2 = scmp.lt.s32.totalorder %s4214_s13, %s4214_s13 }
  0x40   : > { %p4217_p12 = pnand %p4215_p11, %p4175_p9  ;;  %p4224_p3 = por %p4223_p2, %p4222_p0 }
  0x42   : > { %p4218_p13 = pneg %p4217_p12 }
  0x44   : > { %p4225_p6 = pnand %p4224_p3, %p4218_p13 }
  0x46   : > { %4228 = shalt.err (!%p4225_p6)
}
  0x47   : > { %s4349_s23 = smov 64   ;;  %s4350_s24 = smov 4  }
  0x48   : > { %3827 = dma.hbm_to_vmem [thread:$0]  (!%p4456_p7), %s5111_s4, 2048, %s4460_s16, [#allocation11], %s4349_s23, %s4349_s23, %s4350_s24  }
  0x49   : > { %s4510_s27 = sadd.s32 1, %s4343_s30   ;;  %s32_s15 = sadd.s32 1, %s4339_s29 }
  0x4a   : > { %s29_s12 = ssub.s32 %s4343_s30, %s4510_s27  ;;  %p39_p8 = scmp.ne.s32.totalorder %s4339_s29, %s4335_s28 }
  0x4b   : > { %p30_p9 = scmp.eq.s32.totalorder %s29_s12, 0  ;;  %p40_p1 = scmp.eq.s32.totalorder %s4343_s30, 0 }
  0x4c   : > { %p3837_p5 = scmp.lt.s32.totalorder %s4343_s30, 2  ;;  %s239_s18 = sand.u32 1, %s4339_s29  }
  0x4d   : > { %s4519_s17 = scalar_select %p30_p9, %s4339_s29, %s32_s15  }
  0x4e   : > { %p41_p4 = por %p40_p1, %p39_p8  ;;  %s3568_s19 = sshll.u32 %s4343_s30, 7 }
  0x4f   : > { %s4524_s20 = sshll.u32 %s239_s18, 3  ;;  %s4529_s16 = scalar_lea.hbm %s5086_s0, %s3568_s19 }
  0x50   : > { %s243_s22 = scalar_lea.vmem [#allocation5], %s4524_s20  ;;  %p4532_p7 = pnand %p3837_p5, %p41_p4 }
  0x51   : > { %s250_s13 = sshll.u32 %s243_s22, 4  ;;  %s4541_s26 = scalar_lea.hbm %s5087_s1, %s3568_s19  ;;  %s4536_s13 = int_to_ptr.vmem [resolvable:$true] %s250_s13 }
  0x52   : > { %s240_s12 = scalar_lea.sflag [#allocation6], %s239_s18  ;;  %s4229_s15 = scalar_lea.hbm %s4529_s16, 128 }
  0x53   : > { %p4230_p10 = scmp.ne.s32.totalorder %s4529_s16, %s4229_s15  ;;  %p4231_p11 = pneg %p4532_p7 }
  0x54   : > { %s4234_s22 = scalar_lea.hbm %s5086_s0, 256  ;;  %p4235_p0 = scmp.lt.u32.totalorder %s4529_s16, %s5086_s0 }
  0x55   : > { %p4232_p12 = pnand %p4231_p11, %p4230_p10  ;;  %p4236_p2 = scmp.lt.u32.totalorder %s4234_s22, %s4229_s15 }
  0x56   : > { %p4238_p6 = scmp.lt.u32.totalorder %s4229_s15, %s4529_s16 }
  0x57   : > { %p4233_p13 = pneg %p4232_p12  ;;  %p4237_p3 = por %p4236_p2, %p4235_p0 }
  0x59   : > { %p4239_p9 = por %p4238_p6, %p4237_p3 }
  0x5b   : > { %p4240_p8 = pnand %p4239_p9, %p4233_p13 }
  0x5d   : > { %4243 = shalt.err (!%p4240_p8)
}
  0x5e   : > { %s4244_s18 = scalar_lea.vmem %s4536_s13, 128  ;;  %s4351_s19 = smov [#allocation5]  }
  0x5f   : > { %p4245_p1 = scmp.ne.s32.totalorder %s4536_s13, %s4244_s18  ;;  %s4249_s24 = sshll.u32 %s4351_s19, 4  ;;  %s4250_s24 = int_to_ptr.vmem [resolvable:$false] %s4249_s24 }
  0x60   : > { %s4251_s3 = scalar_lea.vmem %s4250_s24, 256  ;;  %p4252_p10 = scmp.lt.s32.totalorder %s4536_s13, %s4250_s24 }
  0x61   : > { %p4247_p4 = pnand %p4245_p1, %p4231_p11  ;;  %p4253_p12 = scmp.lt.s32.totalorder %s4251_s3, %s4244_s18 }
  0x63   : > { %p4248_p5 = pneg %p4247_p4  ;;  %p4254_p0 = por %p4253_p12, %p4252_p10 }
  0x65   : > { %p4255_p2 = pnand %p4254_p0, %p4248_p5 }
  0x67   : > { %4258 = shalt.err (!%p4255_p2)
}
  0x68   : > { %3831 = dma.hbm_to_vmem [thread:$0]  (!%p4532_p7), %s4529_s16, 128, %s4536_s13, %s240_s12  }
  0x69   : > { %s257_s4 = sand.u32 1, %s4343_s30   ;;  %s261_s25 = scalar_lea.vmem [#allocation7], %s4524_s20 }
  0x6a   : > { %s268_s15 = sshll.u32 %s261_s25, 4  ;;  %s258_s14 = scalar_lea.sflag [#allocation8], %s257_s4  ;;  %s269_s15 = int_to_ptr.vmem [resolvable:$true] %s268_s15 }
  0x6b   : > { %s4259_s21 = scalar_lea.hbm %s4541_s26, 128  ;;  %s4264_s19 = scalar_lea.hbm %s5087_s1, 256 }
  0x6c   : > { %p4260_p13 = scmp.ne.s32.totalorder %s4541_s26, %s4259_s21  ;;  %p4265_p9 = scmp.lt.u32.totalorder %s4541_s26, %s5087_s1 }
  0x6d   : > { %p4266_p8 = scmp.lt.u32.totalorder %s4264_s19, %s4259_s21  ;;  %p4268_p4 = scmp.lt.u32.totalorder %s4259_s21, %s4541_s26 }
  0x6e   : > { %p4262_p3 = pnand %p4260_p13, %p4231_p11 }
  0x6f   : > { %p4267_p1 = por %p4266_p8, %p4265_p9 }
  0x70   : > { %p4263_p6 = pneg %p4262_p3 }
  0x71   : > { %p4269_p5 = por %p4268_p4, %p4267_p1 }
  0x73   : > { %p4270_p10 = pnand %p4269_p5, %p4263_p6 }
  0x75   : > { %4273 = shalt.err (!%p4270_p10)
}
  0x76   : > { %s4274_s30 = scalar_lea.vmem %s269_s15, 128  ;;  %s4352_s20 = smov [#allocation7]  }
  0x77   : > { %p4275_p12 = scmp.ne.s32.totalorder %s269_s15, %s4274_s30  ;;  %s4279_s16 = sshll.u32 %s4352_s20, 4  ;;  %s4280_s16 = int_to_ptr.vmem [resolvable:$false] %s4279_s16 }
  0x78   : > { %s4281_s13 = scalar_lea.vmem %s4280_s16, 256  ;;  %p4282_p13 = scmp.lt.s32.totalorder %s269_s15, %s4280_s16 }
  0x79   : > { %p4277_p0 = pnand %p4275_p12, %p4231_p11  ;;  %p4283_p3 = scmp.lt.s32.totalorder %s4281_s13, %s4274_s30 }
  0x7b   : > { %p4278_p2 = pneg %p4277_p0  ;;  %p4284_p8 = por %p4283_p3, %p4282_p13 }
  0x7d   : > { %p4285_p9 = pnand %p4284_p8, %p4278_p2 }
  0x7f   : > { %4288 = shalt.err (!%p4285_p9)
}
  0x80   : > { %3834 = dma.hbm_to_vmem [thread:$0]  (!%p4532_p7), %s4541_s26, 128, %s269_s15, %s258_s14  }
  0x81   : > { %p5113_p6 = scmp.ne.s32.totalorder %s5108_s11, 0 }
  0x83   : > { %284 = sbr.rel (%p5113_p6) target bundleno = 2598 (0xa26), region = 44 }
  0x8a   : > { %s286_s12 = sand.u32 1, %s4335_s28   ;;  %p5114_p11 = scmp.ne.s32.totalorder %s5107_s10, 0 }
  0x8b   : > { %s4592_s4 = sshll.u32 %s286_s12, 3  ;;  %s287_s25 = scalar_lea.sflag [#allocation6], %s286_s12 }
  0x8c   : > { %4306 = dma.done.wait (%p5114_p11), %s287_s25, 128  }
  0x8d   : > { %4308 = vsyncadd (%p5114_p11), %s287_s25, 4294967168  ;;  %s295_s23 = sand.u32 1, %s4436_s9  }
  0x8e   : > { %s296_s26 = scalar_lea.sflag [#allocation8], %s295_s23 }
  0x8f   : > { %4310 = dma.done.wait (%p5114_p11), %s296_s26, 128  }
  0x90   : > { %4312 = vsyncadd (%p5114_p11), %s296_s26, 4294967168  ;;  %p5115_p7 = scmp.eq.s32.totalorder %s4436_s9, 0 }
  0x92   : > { %4314 = dma.done.wait (%p5115_p7), [#allocation8], 20480   ;;  %p5116_p1 = pmov %p5115_p7 }
  0x94   : > { %4316 = vsyncadd (%p5116_p1), [#allocation8], 4294946816  ;;  %p5117_p4 = pmov %p5116_p1 }
  0x95   : > { %p5118_p5 = pmov %p5116_p1 }
  0x96   : > { %4318 = dma.done.wait (%p5117_p4), [#allocation11], 2048  }
  0x97   : > { %4320 = vsyncadd (%p5118_p5), [#allocation11], 4294965248  ;;  %s357_s15 = sld [smem:[#allocation0]]   ;;  %s4353_s14 = smov 512   ;;  %v4354_v0 = vmov 0  }
  0x98   : > { %369 = sst [smem:[#allocation13]] %s4353_s14  ;;  %671 = vmatprep.mubr.bf16.mxu1 %v4354_v0  ;;  %1144 = vmatprep.mubr.bf16.mxu0 %v4354_v0  ;;  %s4355_s10 = smov 4  }
  0x99   : > { %371 = sst [smem:[#allocation13 + $0x1]] %s4353_s14  ;;  %p344_p10 = scmp.lt.s32.totalorder %s4436_s9, 1 }
  0x9a   : > { %373 = sst [smem:[#allocation13 + $0x2]] %s4355_s10  ;;  %s4356_s22 = smov 64  }
  0x9b   : > { %375 = sst [smem:[#allocation13 + $0x3]] %s4356_s22  ;;  %s4357_s18 = smov [#allocation2]  }
  0x9c   : > { %383 = sst [smem:[#allocation13 + $0x7]] %s4356_s22  ;;  %s365_s19 = sshll.u32 %s4357_s18, 4  ;;  %s366_s19 = int_to_ptr.vmem [resolvable:$true] %s365_s19 }
  0x9d   : > { %385 = sst [smem:[#allocation13 + $0x8]] %s4355_s10  ;;  %s3578_s24 = sshll.u32 %s357_s15, 26 }
  0x9e   : > { %s4622_s3 = sadd.s32 134217728, %s3578_s24  ;;  %s4358_s30 = smov 128  }
  0x9f   : > { %377 = sst [smem:[#allocation13 + $0x4]] %s4358_s30  ;;  %s5177_s9 = smov (!%p344_p10, %s4436_s9), 1 }
  0xa0   : > { %s3576_s20 = sshll.u32 %s5177_s9, 3  ;;  %s4359_s16 = smov 2  }
  0xa1   : > { %379 = sst [smem:[#allocation13 + $0x5]] %s4359_s16  ;;  %s4630_s25 = scalar_lea.vmem %s5088_s2, %s3576_s20 }
  0xa2   : > { %s4635_s15 = scalar_lea.vmem %s5094_s8, %s3576_s20  ;;  %s4360_s18 = smov 256  }
  0xa3   : > { %381 = sst [smem:[#allocation13 + $0x6]] %s4360_s18  ;;  %s4361_s24 = smov [#allocation4]  }
  0xa4   : > { %s4362_s11 = smov [#allocation12]   ;;  %s4363_s13 = smov [#allocation3]  }
  0xa5   : > { %387 = dma.general %s5092_s6, 20480, %s366_s19, %s4361_s24, %s4362_s11, [#allocation13], %s4622_s3, 0  }
  0xa6   : > { %404 = sst [smem:[#allocation15]] %s4353_s14  ;;  %s400_s12 = sshll.u32 %s4363_s13, 4  ;;  %s401_s12 = int_to_ptr.vmem [resolvable:$true] %s400_s12 }
  0xa7   : > { %406 = sst [smem:[#allocation15 + $0x1]] %s4353_s14  ;;  %s4364_s21 = smov [#allocation4 + $0x1]  }
  0xa8   : > { %408 = sst [smem:[#allocation15 + $0x2]] %s4355_s10  ;;  %s4365_s11 = smov [#allocation14]  }
  0xa9   : > { %410 = sst [smem:[#allocation15 + $0x3]] %s4356_s22  ;;  %s4366_s23 = smov [#allocation3 + $0x200]  }
  0xaa   : > { %412 = sst [smem:[#allocation15 + $0x4]] %s4358_s30  ;;  %s437_s26 = sshll.u32 %s4366_s23, 4  ;;  %s438_s26 = int_to_ptr.vmem [resolvable:$true] %s437_s26 }
  0xab   : > { %414 = sst [smem:[#allocation15 + $0x5]] %s4359_s16  ;;  %s423_s13 = scalar_lea.hbm %s5093_s7, 8192 }
  0xac   : > { %416 = sst [smem:[#allocation15 + $0x6]] %s4360_s18  ;;  %s460_s24 = scalar_lea.hbm %s5093_s7, 24576 }
  0xad   : > { %418 = sst [smem:[#allocation15 + $0x7]] %s4356_s22 }
  0xae   : > { %420 = sst [smem:[#allocation15 + $0x8]] %s4355_s10 }
  0xaf   : > { %422 = dma.general %s5093_s7, 8192, %s401_s12, %s4364_s21, %s4365_s11, [#allocation15], %s4622_s3, 0  }
  0xb0   : > { %441 = sst [smem:[#allocation17]] %s4353_s14  ;;  %s4367_s12 = smov [#allocation4 + $0x2]  }
  0xb1   : > { %443 = sst [smem:[#allocation17 + $0x1]] %s4353_s14  ;;  %s4368_s21 = smov [#allocation16]  }
  0xb2   : > { %445 = sst [smem:[#allocation17 + $0x2]] %s4355_s10  ;;  %s4369_s11 = smov [#allocation3 + $0x600]  }
  0xb3   : > { %447 = sst [smem:[#allocation17 + $0x3]] %s4356_s22  ;;  %s474_s19 = sshll.u32 %s4369_s11, 4  ;;  %s475_s19 = int_to_ptr.vmem [resolvable:$true] %s474_s19 }
  0xb4   : > { %449 = sst [smem:[#allocation17 + $0x4]] %s4358_s30 }
  0xb5   : > { %451 = sst [smem:[#allocation17 + $0x5]] %s4359_s16 }
  0xb6   : > { %453 = sst [smem:[#allocation17 + $0x6]] %s4360_s18 }
  0xb7   : > { %455 = sst [smem:[#allocation17 + $0x7]] %s4356_s22 }
  0xb8   : > { %457 = sst [smem:[#allocation17 + $0x8]] %s4355_s10 }
  0xb9   : > { %459 = dma.general %s423_s13, 16384, %s438_s26, %s4367_s12, %s4368_s21, [#allocation17], %s4622_s3, 0  }
  0xba   : > { %478 = sst [smem:[#allocation19]] %s4353_s14  ;;  %s4371_s26 = smov [#allocation18]  }
  0xbb   : > { %480 = sst [smem:[#allocation19 + $0x1]] %s4353_s14  ;;  %s4370_s14 = smov [#allocation4 + $0x3]  }
  0xbc   : > { %482 = sst [smem:[#allocation19 + $0x2]] %s4355_s10 }
  0xbd   : > { %484 = sst [smem:[#allocation19 + $0x3]] %s4356_s22 }
  0xbe   : > { %486 = sst [smem:[#allocation19 + $0x4]] %s4358_s30 }
  0xbf   : > { %488 = sst [smem:[#allocation19 + $0x5]] %s4359_s16 }
  0xc0   : > { %490 = sst [smem:[#allocation19 + $0x6]] %s4360_s18 }
  0xc1   : > { %492 = sst [smem:[#allocation19 + $0x7]] %s4356_s22  ;;  %s5120_s22 = scalar_lea.vmem [#allocation7], %s4592_s4 }
  0xc2   : > { %494 = sst [smem:[#allocation19 + $0x8]] %s4355_s10  ;;  %s5119_s10 = scalar_lea.vmem [#allocation5], %s4592_s4 }
  0xc3   : > { %496 = dma.general %s460_s24, 8192, %s475_s19, %s4370_s14, %s4371_s26, [#allocation19], %s4622_s3, 0  }
  0xc4   : > { %v3897_v1 = vld [vmem:[#allocation9 + $0x4] ss:$8 sps:$4 sm:$0xff]   ;;  %v3901_v3 = vld [vmem:[#allocation9] ss:$8 sps:$4 sm:$0xff]   ;;  %v3903_v5 = vld [vmem:[#allocation9 + $0x14] ss:$8 sps:$4 sm:$0xff]  }
  0xc5   : > { %v3899_v2 = vld [vmem:[#allocation9 + $0x84] ss:$8 sps:$4 sm:$0xff]   ;;  %639 = vmatprep.subr.bf16.mxu1 %v3897_v1  ;;  %v3902_v4 = vld [vmem:[#allocation9 + $0x80] ss:$8 sps:$4 sm:$0xff]   ;;  %v3905_v6 = vld [vmem:[#allocation9 + $0x94] ss:$8 sps:$4 sm:$0xff]  }
  0xc6   : > { %1112 = vmatprep.subr.bf16.mxu0 %v3899_v2  ;;  %640 = vmatpush1.bf16.msra.mxu1 %v3901_v3  ;;  %v3907_v7 = vld [vmem:[#allocation9 + $0x10] ss:$8 sps:$4 sm:$0xff]   ;;  %v3909_v9 = vld [vmem:[#allocation9 + $0x24] ss:$8 sps:$4 sm:$0xff]   ;;  %v3913_v11 = vld [vmem:[#allocation9 + $0x20] ss:$8 sps:$4 sm:$0xff]  }
  0xc7   : > { %1113 = vmatpush1.bf16.msra.mxu0 %v3902_v4  ;;  %641 = vmatprep.subr.bf16.mxu1 %v3903_v5  ;;  %v3908_v8 = vld [vmem:[#allocation9 + $0x90] ss:$8 sps:$4 sm:$0xff]   ;;  %v3911_v10 = vld [vmem:[#allocation9 + $0xa4] ss:$8 sps:$4 sm:$0xff]   ;;  %v3914_v12 = vld [vmem:[#allocation9 + $0xa0] ss:$8 sps:$4 sm:$0xff]  }
  0xc8   : > { %1114 = vmatprep.subr.bf16.mxu0 %v3905_v6  ;;  %v3915_v13 = vld [vmem:[#allocation9 + $0x34] ss:$8 sps:$4 sm:$0xff]   ;;  %v3919_v15 = vld [vmem:[#allocation9 + $0x30] ss:$8 sps:$4 sm:$0xff]   ;;  %v3921_v17 = vld [vmem:[#allocation9 + $0x44] ss:$8 sps:$4 sm:$0xff]  }
  0xc9   : > { %v3917_v14 = vld [vmem:[#allocation9 + $0xb4] ss:$8 sps:$4 sm:$0xff]   ;;  %v3920_v16 = vld [vmem:[#allocation9 + $0xb0] ss:$8 sps:$4 sm:$0xff]   ;;  %v3923_v18 = vld [vmem:[#allocation9 + $0xc4] ss:$8 sps:$4 sm:$0xff]  }
  0xca   : > { %642 = vmatpush1.bf16.msra.mxu1 %v3907_v7  ;;  %v3925_v19 = vld [vmem:[#allocation9 + $0x40] ss:$8 sps:$4 sm:$0xff]   ;;  %v3927_v21 = vld [vmem:[#allocation9 + $0x54] ss:$8 sps:$4 sm:$0xff]   ;;  %v3931_v23 = vld [vmem:[#allocation9 + $0x50] ss:$8 sps:$4 sm:$0xff]  }
  0xcb   : > { %1115 = vmatpush1.bf16.msra.mxu0 %v3908_v8  ;;  %643 = vmatprep.subr.bf16.mxu1 %v3909_v9  ;;  %v3926_v20 = vld [vmem:[#allocation9 + $0xc0] ss:$8 sps:$4 sm:$0xff]   ;;  %v3929_v22 = vld [vmem:[#allocation9 + $0xd4] ss:$8 sps:$4 sm:$0xff]   ;;  %v3932_v24 = vld [vmem:[#allocation9 + $0xd0] ss:$8 sps:$4 sm:$0xff]  }
  0xcc   : > { %1116 = vmatprep.subr.bf16.mxu0 %v3911_v10  ;;  %v3933_v25 = vld [vmem:[#allocation9 + $0x64] ss:$8 sps:$4 sm:$0xff]   ;;  %v3937_v27 = vld [vmem:[#allocation9 + $0x60] ss:$8 sps:$4 sm:$0xff]   ;;  %v3939_v29 = vld [vmem:[#allocation9 + $0x74] ss:$8 sps:$4 sm:$0xff]  }
  0xcd   : > { %v3935_v26 = vld [vmem:[#allocation9 + $0xe4] ss:$8 sps:$4 sm:$0xff]   ;;  %v3938_v28 = vld [vmem:[#allocation9 + $0xe0] ss:$8 sps:$4 sm:$0xff]   ;;  %v3941_v30 = vld [vmem:[#allocation9 + $0xf4] ss:$8 sps:$4 sm:$0xff]  }
  0xce   : > { %644 = vmatpush1.bf16.msra.mxu1 %v3913_v11  ;;  %v3943_v31 = vld [vmem:[#allocation9 + $0x70] ss:$8 sps:$4 sm:$0xff]   ;;  %v497_v33 = vld [vmem:[%s5119_s10] sm:$0xff]  ;;  %v3953_v41 = vld [vmem:[#allocation9 + $0x114] ss:$8 sps:$4 sm:$0xff]  }
  0xcf   : > { %1117 = vmatpush1.bf16.msra.mxu0 %v3914_v12  ;;  %645 = vmatprep.subr.bf16.mxu1 %v3915_v13  ;;  %v3944_v32 = vld [vmem:[#allocation9 + $0xf0] ss:$8 sps:$4 sm:$0xff]   ;;  %v3947_v35 = vld [vmem:[#allocation9 + $0x104] ss:$8 sps:$4 sm:$0xff]   ;;  %v546_v37 = vpack.c.bf16 %v497_v33, %v497_v33  ;;  %v3945_v39 = vld [vmem:[#allocation9 + $0x100] ss:$8 sps:$4 sm:$0xff]  }
  0xd0   : > { %1118 = vmatprep.subr.bf16.mxu0 %v3917_v14  ;;  %v970_v34 = vld [vmem:[%s5120_s22] sm:$0xff]  ;;  %v3950_v36 = vld [vmem:[#allocation9 + $0x204] ss:$8 sps:$4 sm:$0xff]   ;;  %v3948_v40 = vld [vmem:[#allocation9 + $0x200] ss:$8 sps:$4 sm:$0xff]  }
  0xd1   : > { %v1019_v38 = vpack.c.bf16 %v970_v34, %v970_v34  ;;  %v3956_v42 = vld [vmem:[#allocation9 + $0x214] ss:$8 sps:$4 sm:$0xff]   ;;  %v3951_v43 = vld [vmem:[#allocation9 + $0x110] ss:$8 sps:$4 sm:$0xff]   ;;  %v3959_v45 = vld [vmem:[#allocation9 + $0x124] ss:$8 sps:$4 sm:$0xff]  }
  0xd2   : > { %646 = vmatpush1.bf16.msra.mxu1 %v3919_v15  ;;  %v3954_v44 = vld [vmem:[#allocation9 + $0x210] ss:$8 sps:$4 sm:$0xff]   ;;  %v3962_v46 = vld [vmem:[#allocation9 + $0x224] ss:$8 sps:$4 sm:$0xff]   ;;  %v3957_v47 = vld [vmem:[#allocation9 + $0x120] ss:$8 sps:$4 sm:$0xff]  }
  0xd3   : > { %1119 = vmatpush1.bf16.msra.mxu0 %v3920_v16  ;;  %647 = vmatprep.subr.bf16.mxu1 %v3921_v17  ;;  %v3960_v48 = vld [vmem:[#allocation9 + $0x220] ss:$8 sps:$4 sm:$0xff]   ;;  %v3965_v49 = vld [vmem:[#allocation9 + $0x134] ss:$8 sps:$4 sm:$0xff]   ;;  %v3963_v51 = vld [vmem:[#allocation9 + $0x130] ss:$8 sps:$4 sm:$0xff]  }
  0xd4   : > { %1120 = vmatprep.subr.bf16.mxu0 %v3923_v18  ;;  %v3968_v50 = vld [vmem:[#allocation9 + $0x234] ss:$8 sps:$4 sm:$0xff]   ;;  %v3966_v52 = vld [vmem:[#allocation9 + $0x230] ss:$8 sps:$4 sm:$0xff]   ;;  %v3971_v53 = vld [vmem:[#allocation9 + $0x144] ss:$8 sps:$4 sm:$0xff]  }
  0xd5   : > { %v3974_v54 = vld [vmem:[#allocation9 + $0x244] ss:$8 sps:$4 sm:$0xff]   ;;  %v3969_v55 = vld [vmem:[#allocation9 + $0x140] ss:$8 sps:$4 sm:$0xff]   ;;  %v3977_v57 = vld [vmem:[#allocation9 + $0x154] ss:$8 sps:$4 sm:$0xff]  }
  0xd6   : > { %648 = vmatpush1.bf16.msra.mxu1 %v3925_v19  ;;  %v3972_v56 = vld [vmem:[#allocation9 + $0x240] ss:$8 sps:$4 sm:$0xff]   ;;  %v3980_v58 = vld [vmem:[#allocation9 + $0x254] ss:$8 sps:$4 sm:$0xff]   ;;  %v3975_v59 = vld [vmem:[#allocation9 + $0x150] ss:$8 sps:$4 sm:$0xff]  }
  0xd7   : > { %1121 = vmatpush1.bf16.msra.mxu0 %v3926_v20  ;;  %649 = vmatprep.subr.bf16.mxu1 %v3927_v21  ;;  %v3978_v60 = vld [vmem:[#allocation9 + $0x250] ss:$8 sps:$4 sm:$0xff]   ;;  %v3983_v61 = vld [vmem:[#allocation9 + $0x164] ss:$8 sps:$4 sm:$0xff]   ;;  %v3981_v63 = vld [vmem:[#allocation9 + $0x160] ss:$8 sps:$4 sm:$0xff]  }
  0xd8   : > { %1122 = vmatprep.subr.bf16.mxu0 %v3929_v22  ;;  %v3986_v62 = vld [vmem:[#allocation9 + $0x264] ss:$8 sps:$4 sm:$0xff]   ;;  %v3984_v1 = vld [vmem:[#allocation9 + $0x260] ss:$8 sps:$4 sm:$0xff]   ;;  %v3989_v2 = vld [vmem:[#allocation9 + $0x174] ss:$8 sps:$4 sm:$0xff]  }
  0xd9   : > { %v3992_v3 = vld [vmem:[#allocation9 + $0x274] ss:$8 sps:$4 sm:$0xff]   ;;  %v3987_v4 = vld [vmem:[#allocation9 + $0x170] ss:$8 sps:$4 sm:$0xff]   ;;  %v3995_v6 = vld [vmem:[#allocation9 + $0x184] ss:$8 sps:$4 sm:$0xff]  }
  0xda   : > { %650 = vmatpush1.bf16.msra.mxu1 %v3931_v23  ;;  %v3990_v5 = vld [vmem:[#allocation9 + $0x270] ss:$8 sps:$4 sm:$0xff]   ;;  %v3998_v7 = vld [vmem:[#allocation9 + $0x284] ss:$8 sps:$4 sm:$0xff]   ;;  %v3993_v8 = vld [vmem:[#allocation9 + $0x180] ss:$8 sps:$4 sm:$0xff]  }
  0xdb   : > { %1123 = vmatpush1.bf16.msra.mxu0 %v3932_v24  ;;  %651 = vmatprep.subr.bf16.mxu1 %v3933_v25  ;;  %v3996_v9 = vld [vmem:[#allocation9 + $0x280] ss:$8 sps:$4 sm:$0xff]   ;;  %v4001_v10 = vld [vmem:[#allocation9 + $0x194] ss:$8 sps:$4 sm:$0xff]   ;;  %v3999_v12 = vld [vmem:[#allocation9 + $0x190] ss:$8 sps:$4 sm:$0xff]  }
  0xdc   : > { %1124 = vmatprep.subr.bf16.mxu0 %v3935_v26  ;;  %v4004_v11 = vld [vmem:[#allocation9 + $0x294] ss:$8 sps:$4 sm:$0xff]   ;;  %v4002_v13 = vld [vmem:[#allocation9 + $0x290] ss:$8 sps:$4 sm:$0xff]   ;;  %v4007_v14 = vld [vmem:[#allocation9 + $0x1a4] ss:$8 sps:$4 sm:$0xff]  }
  0xdd   : > { %v4010_v15 = vld [vmem:[#allocation9 + $0x2a4] ss:$8 sps:$4 sm:$0xff]   ;;  %v4005_v16 = vld [vmem:[#allocation9 + $0x1a0] ss:$8 sps:$4 sm:$0xff]   ;;  %v4013_v18 = vld [vmem:[#allocation9 + $0x1b4] ss:$8 sps:$4 sm:$0xff]  }
  0xde   : > { %652 = vmatpush1.bf16.msra.mxu1 %v3937_v27  ;;  %v4008_v17 = vld [vmem:[#allocation9 + $0x2a0] ss:$8 sps:$4 sm:$0xff]   ;;  %v4016_v19 = vld [vmem:[#allocation9 + $0x2b4] ss:$8 sps:$4 sm:$0xff]   ;;  %v4011_v20 = vld [vmem:[#allocation9 + $0x1b0] ss:$8 sps:$4 sm:$0xff]  }
  0xdf   : > { %1125 = vmatpush1.bf16.msra.mxu0 %v3938_v28  ;;  %653 = vmatprep.subr.bf16.mxu1 %v3939_v29  ;;  %v4014_v21 = vld [vmem:[#allocation9 + $0x2b0] ss:$8 sps:$4 sm:$0xff]   ;;  %v4019_v22 = vld [vmem:[#allocation9 + $0x1c4] ss:$8 sps:$4 sm:$0xff]   ;;  %v4017_v24 = vld [vmem:[#allocation9 + $0x1c0] ss:$8 sps:$4 sm:$0xff]  }
  0xe0   : > { %1126 = vmatprep.subr.bf16.mxu0 %v3941_v30  ;;  %v4022_v23 = vld [vmem:[#allocation9 + $0x2c4] ss:$8 sps:$4 sm:$0xff]   ;;  %v4020_v25 = vld [vmem:[#allocation9 + $0x2c0] ss:$8 sps:$4 sm:$0xff]   ;;  %v4025_v26 = vld [vmem:[#allocation9 + $0x1d4] ss:$8 sps:$4 sm:$0xff]  }
  0xe1   : > { %v4028_v27 = vld [vmem:[#allocation9 + $0x2d4] ss:$8 sps:$4 sm:$0xff]   ;;  %v4023_v28 = vld [vmem:[#allocation9 + $0x1d0] ss:$8 sps:$4 sm:$0xff]   ;;  %v4031_v30 = vld [vmem:[#allocation9 + $0x1e4] ss:$8 sps:$4 sm:$0xff]  }
  0xe2   : > { %654 = vmatpush1.bf16.msra.mxu1 %v3943_v31  ;;  %v4026_v29 = vld [vmem:[#allocation9 + $0x2d0] ss:$8 sps:$4 sm:$0xff]   ;;  %v4034_v31 = vld [vmem:[#allocation9 + $0x2e4] ss:$8 sps:$4 sm:$0xff]   ;;  %v4032_v33 = vld [vmem:[#allocation9 + $0x2e0] ss:$8 sps:$4 sm:$0xff]  }
  0xe3   : > { %1127 = vmatpush1.bf16.msra.mxu0 %v3944_v32  ;;  %858 = vmatprep.subr.bf16.mxu1 %v3947_v35  ;;  %v4029_v32 = vld [vmem:[#allocation9 + $0x1e0] ss:$8 sps:$4 sm:$0xff]   ;;  %v4037_v34 = vld [vmem:[#allocation9 + $0x1f4] ss:$8 sps:$4 sm:$0xff]  }
  0xe4   : > { %1331 = vmatprep.subr.bf16.mxu0 %v3950_v36  ;;  %v4040_v35 = vld [vmem:[#allocation9 + $0x2f4] ss:$8 sps:$4 sm:$0xff]   ;;  %v4035_v36 = vld [vmem:[#allocation9 + $0x1f0] ss:$8 sps:$4 sm:$0xff]  }
  0xe5   : > { %672 = vmatmul.mubr.bf16.vlgmr.msra.gmra.mrb[0].mxu1 %v546_v37  ;;  %v4038_v37 = vld [vmem:[#allocation9 + $0x2f0] ss:$8 sps:$4 sm:$0xff]  }
  0xe6   : > { %1145 = vmatmul.mubr.bf16.vlgmr.msra.gmra.mrb[0].mxu0 %v1019_v38  ;;  %859 = vmatpush1.bf16.msra.mxu1 %v3945_v39  ;;  %v549_v38 = vlaneseq }
  0xe7   : > { %1332 = vmatpush1.bf16.msra.mxu0 %v3948_v40  ;;  %860 = vmatprep.subr.bf16.mxu1 %v3953_v41  ;;  %v547_v41 = vld [vmem:[%s5091_s5] sm:$0x3] }
  0xe8   : > { %1333 = vmatprep.subr.bf16.mxu0 %v3956_v42  ;;  %v4685_v39 = vshrl.u32 %v549_v38, 7  ;;  %v1020_v42 = vld [vmem:[%s5091_s5 + $0x8] sm:$0x3] }
  0xea   : > { %861 = vmatpush1.bf16.msra.mxu1 %v3951_v43  ;;  %v4688_v40 = vsub.s32 0, %v4685_v39  ;;  %v4697_v43 = vsub.s32 1, %v4685_v39 }
  0xeb   : > { %1334 = vmatpush1.bf16.msra.mxu0 %v3954_v44  ;;  %862 = vmatprep.subr.bf16.mxu1 %v3959_v45 }
  0xec   : > { %1335 = vmatprep.subr.bf16.mxu0 %v3962_v46  ;;  %5121 = vst [vmem:[#allocation28_spill] sm:$0xff] %v4688_v40  ;;  %5122 = vst [vmem:[#allocation29_spill] sm:$0xff] %v4697_v43  ;;  %v552_v44 = vrot.slane %v547_v41, %v4688_v40  ;;  %v1025_v45 = vrot.slane %v1020_v42, %v4688_v40  ;;  %v556_v46 = vrot.slane %v547_v41, %v4697_v43 }
  0xee   : > { %863 = vmatpush1.bf16.msra.mxu1 %v3957_v47  ;;  %v1029_v47 = vrot.slane %v1020_v42, %v4697_v43 }
  0xef   : > { %1336 = vmatpush1.bf16.msra.mxu0 %v3960_v48  ;;  %864 = vmatprep.subr.bf16.mxu1 %v3965_v49 }
  0xf0   : > { %1337 = vmatprep.subr.bf16.mxu0 %v3968_v50 }
  0xf2   : > { %865 = vmatpush1.bf16.msra.mxu1 %v3963_v51 }
  0xf3   : > { %1338 = vmatpush1.bf16.msra.mxu0 %v3966_v52  ;;  %866 = vmatprep.subr.bf16.mxu1 %v3971_v53 }
  0xf4   : > { %1339 = vmatprep.subr.bf16.mxu0 %v3974_v54 }
  0xf6   : > { %867 = vmatpush1.bf16.msra.mxu1 %v3969_v55 }
  0xf7   : > { %1340 = vmatpush1.bf16.msra.mxu0 %v3972_v56  ;;  %868 = vmatprep.subr.bf16.mxu1 %v3977_v57 }
  0xf8   : > { %1341 = vmatprep.subr.bf16.mxu0 %v3980_v58 }
  0xfa   : > { %869 = vmatpush1.bf16.msra.mxu1 %v3975_v59 }
  0xfb   : > { %1342 = vmatpush1.bf16.msra.mxu0 %v3978_v60  ;;  %870 = vmatprep.subr.bf16.mxu1 %v3983_v61 }
  0xfc   : > { %1343 = vmatprep.subr.bf16.mxu0 %v3986_v62 }
  0xfe   : > { %871 = vmatpush1.bf16.msra.mxu1 %v3981_v63 }
  0xff   : > { %1344 = vmatpush1.bf16.msra.mxu0 %v3984_v1  ;;  %872 = vmatprep.subr.bf16.mxu1 %v3989_v2 }
 0x100   : > { %1345 = vmatprep.subr.bf16.mxu0 %v3992_v3 }
 0x102   : > { %873 = vmatpush1.bf16.msra.mxu1 %v3987_v4 }
 0x103   : > { %1346 = vmatpush1.bf16.msra.mxu0 %v3990_v5  ;;  %874 = vmatprep.subr.bf16.mxu1 %v3995_v6 }
 0x104   : > { %1347 = vmatprep.subr.bf16.mxu0 %v3998_v7 }
 0x106   : > { %875 = vmatpush1.bf16.msra.mxu1 %v3993_v8 }
 0x107   : > { %1348 = vmatpush1.bf16.msra.mxu0 %v3996_v9  ;;  %876 = vmatprep.subr.bf16.mxu1 %v4001_v10  ;;  %v686_v9 = vld [vmem:[%s5091_s5 + $0x2] sm:$0x3]  ;;  %v1159_v10 = vld [vmem:[%s5091_s5 + $0xa] sm:$0x3] }
 0x108   : > { %1349 = vmatprep.subr.bf16.mxu0 %v4004_v11  ;;  %v691_v11 = vrot.slane %v686_v9, %v4688_v40 }
 0x10a   : > { %877 = vmatpush1.bf16.msra.mxu1 %v3999_v12  ;;  %v1164_v12 = vrot.slane %v1159_v10, %v4688_v40 }
 0x10b   : > { %1350 = vmatpush1.bf16.msra.mxu0 %v4002_v13  ;;  %878 = vmatprep.subr.bf16.mxu1 %v4007_v14  ;;  %v695_v13 = vrot.slane %v686_v9, %v4697_v43  ;;  %v1168_v14 = vrot.slane %v1159_v10, %v4697_v43 }
 0x10c   : > { %1351 = vmatprep.subr.bf16.mxu0 %v4010_v15 }
 0x10e   : > { %879 = vmatpush1.bf16.msra.mxu1 %v4005_v16 }
 0x10f   : > { %1352 = vmatpush1.bf16.msra.mxu0 %v4008_v17  ;;  %880 = vmatprep.subr.bf16.mxu1 %v4013_v18 }
 0x110   : > { %1353 = vmatprep.subr.bf16.mxu0 %v4016_v19 }
 0x112   : > { %881 = vmatpush1.bf16.msra.mxu1 %v4011_v20 }
 0x113   : > { %1354 = vmatpush1.bf16.msra.mxu0 %v4014_v21  ;;  %882 = vmatprep.subr.bf16.mxu1 %v4019_v22 }
 0x114   : > { %1355 = vmatprep.subr.bf16.mxu0 %v4022_v23 }
 0x116   : > { %883 = vmatpush1.bf16.msra.mxu1 %v4017_v24 }
 0x117   : > { %1356 = vmatpush1.bf16.msra.mxu0 %v4020_v25  ;;  %884 = vmatprep.subr.bf16.mxu1 %v4025_v26 }
 0x118   : > { %1357 = vmatprep.subr.bf16.mxu0 %v4028_v27 }
 0x11a   : > { %885 = vmatpush1.bf16.msra.mxu1 %v4023_v28 }
 0x11b   : > { %1358 = vmatpush1.bf16.msra.mxu0 %v4026_v29  ;;  %886 = vmatprep.subr.bf16.mxu1 %v4031_v30 }
 0x11c   : > { %1359 = vmatprep.subr.bf16.mxu0 %v4034_v31 }
 0x11e   : > { %887 = vmatpush1.bf16.msra.mxu1 %v4029_v32 }
 0x11f   : > { %1360 = vmatpush1.bf16.msra.mxu0 %v4032_v33  ;;  %888 = vmatprep.subr.bf16.mxu1 %v4037_v34 }
 0x120   : > { %1361 = vmatprep.subr.bf16.mxu0 %v4040_v35 }
 0x122   : > { %889 = vmatpush1.bf16.msra.mxu1 %v4035_v36 }
 0x123   : > { %1362 = vmatpush1.bf16.msra.mxu0 %v4038_v37 }
 0x1b8   : > { %v673_v48 = vpop.f32.mrb[0].mxu1 }
 0x1b9   : > { %v1146_v49 = vpop.f32.mrb[0].mxu0  ;;  %v674_v50 = vadd.f32 %v673_v48, %v552_v44  ;;  %v675_v52 = vpop.f32.mrb[1].mxu1 }
 0x1ba   : > { %v1147_v51 = vadd.f32 %v1146_v49, %v1025_v45  ;;  %v1148_v53 = vpop.f32.mrb[1].mxu0  ;;  %v676_v54 = vadd.f32 %v675_v52, %v556_v46  ;;  %v677_v56 = vpop.f32.mrb[2].mxu1 }
 0x1bb   : > { %v1149_v55 = vadd.f32 %v1148_v53, %v1029_v47  ;;  %v1150_v57 = vpop.f32.mrb[2].mxu0  ;;  %v680_v58 = vmul.f32 0.2, %v674_v50  ;;  %v678_v60 = vpop.f32.mrb[3].mxu1 }
 0x1bc   : > { %v1153_v59 = vmul.f32 0.2, %v1147_v51  ;;  %v1151_v61 = vpop.f32.mrb[3].mxu0  ;;  %v681_v62 = vmul.f32 0.2, %v676_v54 }
 0x1bd   : > { %v1154_v63 = vmul.f32 0.2, %v1149_v55  ;;  %v682_v1 = vmax.f32 %v674_v50, %v680_v58 }
 0x1be   : > { %v1155_v2 = vmax.f32 %v1147_v51, %v1153_v59  ;;  %v683_v3 = vmax.f32 %v676_v54, %v681_v62 }
 0x1bf   : > { %v1156_v4 = vmax.f32 %v1149_v55, %v1154_v63  ;;  %v684_v7 = vpack.c.bf16 %v682_v1, %v682_v1 }
 0x1c0   : > { %v685_v5 = vpack.c.bf16 %v683_v3, %v683_v3  ;;  %v1157_v8 = vpack.c.bf16 %v1155_v2, %v1155_v2 }
 0x1c1   : > { %v1158_v6 = vpack.c.bf16 %v1156_v4, %v1156_v4 }
 0x1c2   : > { %890 = vmatprep.mubr.bf16.mxu1 %v685_v5 }
 0x1c3   : > { %1363 = vmatprep.mubr.bf16.mxu0 %v1158_v6  ;;  %891 = vmatmul.mubr.bf16.vlgmr.msra.gmra.mrb[4].mxu1 %v684_v7 }
 0x1c4   : > { %1364 = vmatmul.mubr.bf16.vlgmr.msra.gmra.mrb[4].mxu0 %v1157_v8 }
 0x296   : > { %v892_v15 = vpop.f32.mrb[4].mxu1 }
 0x297   : > { %v1365_v16 = vpop.f32.mrb[4].mxu0  ;;  %v893_v17 = vadd.f32 %v892_v15, %v691_v11  ;;  %v894_v19 = vpop.f32.mrb[5].mxu1 }
 0x298   : > { %v1366_v18 = vadd.f32 %v1365_v16, %v1164_v12  ;;  %v1367_v20 = vpop.f32.mrb[5].mxu0  ;;  %v895_v21 = vadd.f32 %v894_v19, %v695_v13  ;;  %v896_v23 = vpop.f32.mrb[6].mxu1 }
 0x299   : > { %v1368_v22 = vadd.f32 %v1367_v20, %v1168_v14  ;;  %v1369_v24 = vpop.f32.mrb[6].mxu0  ;;  %v901_v25 = vrot.slane %v893_v17, 4  ;;  %v897_v27 = vpop.f32.mrb[7].mxu1 }
 0x29a   : > { %v1374_v26 = vrot.slane %v1366_v18, 4  ;;  %v1370_v28 = vpop.f32.mrb[7].mxu0  ;;  %v907_v29 = vrot.slane %v895_v21, 4 }
 0x29b   : > { %v1380_v30 = vrot.slane %v1368_v22, 4  ;;  %v902_v31 = vadd.f32 %v901_v25, %v893_v17 }
 0x29c   : > { %v1375_v32 = vadd.f32 %v1374_v26, %v1366_v18  ;;  %v908_v33 = vadd.f32 %v907_v29, %v895_v21 }
 0x29d   : > { %v1381_v34 = vadd.f32 %v1380_v30, %v1368_v22  ;;  %v903_v35 = vrot.slane %v902_v31, 2 }
 0x29e   : > { %v1376_v36 = vrot.slane %v1375_v32, 2  ;;  %v909_v37 = vrot.slane %v908_v33, 2 }
 0x29f   : > { %v1382_v38 = vrot.slane %v1381_v34, 2  ;;  %v904_v41 = vadd.f32 %v903_v35, %v902_v31  ;;  %v899_v35 = vld [vmem:[%s5091_s5 + $0x4] sm:$0x3] }
 0x2a0   : > { %v1377_v42 = vadd.f32 %v1376_v36, %v1375_v32  ;;  %v910_v44 = vadd.f32 %v909_v37, %v908_v33  ;;  %v1372_v36 = vld [vmem:[%s5091_s5 + $0xc] sm:$0x3]  ;;  %v900_v37 = vld [vmem:[%s5091_s5 + $0x6] sm:$0x3] }
 0x2a1   : > { %v1383_v45 = vadd.f32 %v1382_v38, %v1381_v34  ;;  %v905_v46 = vrot.slane %v904_v41, 1  ;;  %v944_v38 = vrot.slane %v899_v35, %v4688_v40 }
 0x2a2   : > { %v1378_v47 = vrot.slane %v1377_v42, 1  ;;  %v911_v48 = vrot.slane %v910_v44, 1 }
 0x2a3   : > { %v1384_v49 = vrot.slane %v1383_v45, 1  ;;  %v906_v50 = vadd.f32 %v905_v46, %v904_v41  ;;  %v1373_v41 = vld [vmem:[%s5091_s5 + $0xe] sm:$0x3] }
 0x2a4   : > { %v1379_v51 = vadd.f32 %v1378_v47, %v1377_v42  ;;  %v912_v52 = vadd.f32 %v911_v48, %v910_v44  ;;  %v1416_v44 = vrot.slane %v1372_v36, %v4688_v40  ;;  %v957_v47 = vrot.slane %v900_v37, %v4688_v40 }
 0x2a5   : > { %v1385_v53 = vadd.f32 %v1384_v49, %v1383_v45  ;;  %v914_v54 = vmul.f32 0.125, %v906_v50  ;;  %v948_v48 = vrot.slane %v899_v35, %v4697_v43 }
 0x2a6   : > { %v1386_v55 = vmul.f32 0.125, %v1379_v51  ;;  %v915_v56 = vmul.f32 0.125, %v912_v52  ;;  %v1429_v51 = vrot.slane %v1373_v41, %v4688_v40  ;;  %v1420_v52 = vrot.slane %v1372_v36, %v4697_v43 }
 0x2a7   : > { %v1387_v57 = vmul.f32 0.125, %v1385_v53  ;;  %v916_v58 = vsub.f32 %v893_v17, %v914_v54 }
 0x2a8   : > { %v1388_v59 = vsub.f32 %v1366_v18, %v1386_v55  ;;  %v917_v60 = vsub.f32 %v895_v21, %v915_v56  ;;  %v961_v56 = vrot.slane %v900_v37, %v4697_v43 }
 0x2a9   : > { %v1389_v61 = vsub.f32 %v1368_v22, %v1387_v57  ;;  %v918_v62 = vmul.f32 %v916_v58, %v916_v58 }
 0x2aa   : > { %v1390_v63 = vmul.f32 %v1388_v59, %v1388_v59  ;;  %v919_v1 = vmul.f32 %v917_v60, %v917_v60 }
 0x2ab   : > { %v1391_v2 = vmul.f32 %v1389_v61, %v1389_v61  ;;  %v920_v3 = vrot.slane %v918_v62, 4 }
 0x2ac   : > { %v1392_v4 = vrot.slane %v1390_v63, 4  ;;  %v926_v5 = vrot.slane %v919_v1, 4 }
 0x2ad   : > { %v1398_v6 = vrot.slane %v1391_v2, 4  ;;  %v921_v7 = vadd.f32 %v920_v3, %v918_v62 }
 0x2ae   : > { %v1393_v8 = vadd.f32 %v1392_v4, %v1390_v63  ;;  %v927_v9 = vadd.f32 %v926_v5, %v919_v1  ;;  %v1433_v63 = vrot.slane %v1373_v41, %v4697_v43 }
 0x2af   : > { %v1399_v10 = vadd.f32 %v1398_v6, %v1391_v2  ;;  %v922_v11 = vrot.slane %v921_v7, 2 }
 0x2b0   : > { %v1394_v12 = vrot.slane %v1393_v8, 2  ;;  %v928_v13 = vrot.slane %v927_v9, 2 }
 0x2b1   : > { %v1400_v14 = vrot.slane %v1399_v10, 2  ;;  %v923_v15 = vadd.f32 %v922_v11, %v921_v7 }
 0x2b2   : > { %v1395_v16 = vadd.f32 %v1394_v12, %v1393_v8  ;;  %v929_v17 = vadd.f32 %v928_v13, %v927_v9 }
 0x2b3   : > { %v1401_v18 = vadd.f32 %v1400_v14, %v1399_v10  ;;  %v924_v19 = vrot.slane %v923_v15, 1 }
 0x2b4   : > { %v1396_v20 = vrot.slane %v1395_v16, 1  ;;  %v930_v21 = vrot.slane %v929_v17, 1 }
 0x2b5   : > { %v1402_v22 = vrot.slane %v1401_v18, 1  ;;  %v925_v23 = vadd.f32 %v924_v19, %v923_v15 }
 0x2b6   : > { %v1397_v24 = vadd.f32 %v1396_v20, %v1395_v16  ;;  %v931_v25 = vadd.f32 %v930_v21, %v929_v17 }
 0x2b7   : > { %v1403_v26 = vadd.f32 %v1402_v22, %v1401_v18  ;;  %v932_v27 = vmul.f32 0.125, %v925_v23 }
 0x2b8   : > { %v1404_v28 = vmul.f32 0.125, %v1397_v24  ;;  %v933_v29 = vmul.f32 0.125, %v931_v25 }
 0x2b9   : > { %v1405_v30 = vmul.f32 0.125, %v1403_v26  ;;  %v934_v31 = vadd.f32 1e-05, %v932_v27 }
 0x2ba   : > { %v1406_v32 = vadd.f32 1e-05, %v1404_v28  ;;  %v935_v33 = vadd.f32 1e-05, %v933_v29 }
 0x2bb   : > { %v1407_v34 = vadd.f32 1e-05, %v1405_v30  ;;  %4041 = vrsqrt.f32 %v934_v31 }
 0x2bc   : > { %4043 = vrsqrt.f32 %v1406_v32 }
 0x2bd   : > { %4045 = vrsqrt.f32 %v935_v33 }
 0x2be   : > { %4047 = vrsqrt.f32 %v1407_v34 }
 0x2c5   : > { %v4042_v42 = vpop.eup %4041 }
 0x2c6   : > { %v4044_v45 = vpop.eup %4043  ;;  %v938_v46 = vmul.f32 %v4042_v42, %v916_v58 }
 0x2c7   : > { %v4046_v49 = vpop.eup %4045  ;;  %v1410_v50 = vmul.f32 %v4044_v45, %v1388_v59 }
 0x2c8   : > { %v4048_v53 = vpop.eup %4047  ;;  %v951_v54 = vmul.f32 %v944_v38, %v938_v46  ;;  %v939_v55 = vmul.f32 %v4046_v49, %v917_v60 }
 0x2c9   : > { %v1423_v57 = vmul.f32 %v1416_v44, %v1410_v50  ;;  %v1411_v62 = vmul.f32 %v4048_v53, %v1389_v61 }
 0x2ca   : > { %v964_v58 = vadd.f32 %v957_v47, %v951_v54  ;;  %v952_v1 = vmul.f32 %v948_v48, %v939_v55 }
 0x2cb   : > { %v1436_v2 = vadd.f32 %v1429_v51, %v1423_v57  ;;  %v1424_v3 = vmul.f32 %v1420_v52, %v1411_v62 }
 0x2cc   : > { %v966_v4 = vmul.f32 0.2, %v964_v58  ;;  %v965_v5 = vadd.f32 %v961_v56, %v952_v1 }
 0x2cd   : > { %v1438_v59 = vmul.f32 0.2, %v1436_v2  ;;  %v1437_v6 = vadd.f32 %v1433_v63, %v1424_v3 }
 0x2ce   : > { %v4733_v7 = vmax.f32 %v964_v58, %v966_v4  ;;  %v967_v8 = vmul.f32 0.2, %v965_v5 }
 0x2cf   : > { %v4735_v9 = vmax.f32 %v1436_v2, %v1438_v59  ;;  %v1439_v60 = vmul.f32 0.2, %v1437_v6 }
 0x2d0   : > { %v4737_v10 = vmax.f32 %v965_v5, %v967_v8 }
 0x2d1   : > { %5123 = vst [vmem:[#allocation30_spill] sm:$0xff] %v4735_v9  ;;  %v4739_v11 = vmax.f32 %v1437_v6, %v1439_v60 }
 0x2d3   : > { %5124 = vst [vmem:[#allocation31_spill] sm:$0xff] %v4739_v11 }
 0x2d4   : > { %4321 = dma.done.wait [#allocation4], 20480 }
 0x2d5   : > { %4322 = vsyncadd [#allocation4], 4294946816  ;;  %1662 = vmatprep.mubr.bf16.mxu1 %v4354_v0  ;;  %v1448_v61 = vld [vmem:[#allocation2 + $0x8] sm:$0xff]  ;;  %v1447_v12 = vld [vmem:[#allocation2] sm:$0xff] }
 0x2d6   : > { %v1452_v13 = vld [vmem:[#allocation2 + $0x28] sm:$0xff]  ;;  %1630 = vmatprep.subr.bf16.mxu1 %v1448_v61  ;;  %v1451_v14 = vld [vmem:[#allocation2 + $0x20] sm:$0xff]  ;;  %v1450_v41 = vld [vmem:[#allocation2 + $0x18] sm:$0xff] }
 0x2d7   : > { %1631 = vmatpush1.bf16.msra.mxu1 %v1447_v12  ;;  %v1456_v15 = vld [vmem:[#allocation2 + $0x48] sm:$0xff]  ;;  %v1455_v16 = vld [vmem:[#allocation2 + $0x40] sm:$0xff]  ;;  %v1449_v45 = vld [vmem:[#allocation2 + $0x10] sm:$0xff] }
 0x2d8   : > { %1632 = vmatprep.subr.bf16.mxu1 %v1452_v13  ;;  %v1460_v17 = vld [vmem:[#allocation2 + $0x68] sm:$0xff]  ;;  %v1459_v18 = vld [vmem:[#allocation2 + $0x60] sm:$0xff]  ;;  %v1454_v46 = vld [vmem:[#allocation2 + $0x38] sm:$0xff] }
 0x2d9   : > { %v1480_v19 = vld [vmem:[#allocation2 + $0x108] sm:$0xff]  ;;  %v1479_v20 = vld [vmem:[#allocation2 + $0x100] sm:$0xff]  ;;  %v1453_v49 = vld [vmem:[#allocation2 + $0x30] sm:$0xff] }
 0x2da   : > { %v1464_v21 = vld [vmem:[#allocation2 + $0x88] sm:$0xff]  ;;  %1746 = vmatprep.subr.bf16.mxu0 %v1480_v19  ;;  %v1483_v23 = vld [vmem:[#allocation2 + $0x120] sm:$0xff]  ;;  %v1458_v51 = vld [vmem:[#allocation2 + $0x58] sm:$0xff] }
 0x2db   : > { %1633 = vmatpush1.bf16.msra.mxu1 %v1451_v14  ;;  %v1484_v22 = vld [vmem:[#allocation2 + $0x128] sm:$0xff]  ;;  %1747 = vmatpush1.bf16.msra.mxu0 %v1479_v20  ;;  %v1463_v24 = vld [vmem:[#allocation2 + $0x80] sm:$0xff]  ;;  %v1457_v53 = vld [vmem:[#allocation2 + $0x50] sm:$0xff] }
 0x2dc   : > { %1634 = vmatprep.subr.bf16.mxu1 %v1456_v15  ;;  %1748 = vmatprep.subr.bf16.mxu0 %v1484_v22  ;;  %v1488_v25 = vld [vmem:[#allocation2 + $0x148] sm:$0xff]  ;;  %v1487_v27 = vld [vmem:[#allocation2 + $0x140] sm:$0xff]  ;;  %v1462_v55 = vld [vmem:[#allocation2 + $0x78] sm:$0xff] }
 0x2dd   : > { %v1468_v26 = vld [vmem:[#allocation2 + $0xa8] sm:$0xff]  ;;  %v1467_v28 = vld [vmem:[#allocation2 + $0xa0] sm:$0xff]  ;;  %v1466_v62 = vld [vmem:[#allocation2 + $0x98] sm:$0xff] }
 0x2de   : > { %v1492_v29 = vld [vmem:[#allocation2 + $0x168] sm:$0xff]  ;;  %v1491_v31 = vld [vmem:[#allocation2 + $0x160] sm:$0xff]  ;;  %v1465_v58 = vld [vmem:[#allocation2 + $0x90] sm:$0xff] }
 0x2df   : > { %1635 = vmatpush1.bf16.msra.mxu1 %v1455_v16  ;;  %1749 = vmatpush1.bf16.msra.mxu0 %v1483_v23  ;;  %v1472_v30 = vld [vmem:[#allocation2 + $0xc8] sm:$0xff]  ;;  %v1471_v32 = vld [vmem:[#allocation2 + $0xc0] sm:$0xff]  ;;  %v1470_v2 = vld [vmem:[#allocation2 + $0xb8] sm:$0xff] }
 0x2e0   : > { %1636 = vmatprep.subr.bf16.mxu1 %v1460_v17  ;;  %1750 = vmatprep.subr.bf16.mxu0 %v1488_v25  ;;  %v1496_v33 = vld [vmem:[#allocation2 + $0x188] sm:$0xff]  ;;  %v1446_v35 = vld [vmem:[%s4630_s25] sm:$0xff]  ;;  %v1469_v4 = vld [vmem:[#allocation2 + $0xb0] sm:$0xff] }
 0x2e1   : > { %v1476_v34 = vld [vmem:[#allocation2 + $0xe8] sm:$0xff]  ;;  %v1495_v36 = vld [vmem:[#allocation2 + $0x180] sm:$0xff]  ;;  %v4743_v42 = vpack.c.bf16 %v1446_v35, %v1446_v35  ;;  %v1474_v59 = vld [vmem:[#allocation2 + $0xd8] sm:$0xff] }
 0x2e2   : > { %v1475_v37 = vld [vmem:[#allocation2 + $0xe0] sm:$0xff]  ;;  %v1500_v38 = vld [vmem:[#allocation2 + $0x1a8] sm:$0xff]  ;;  %v1473_v8 = vld [vmem:[#allocation2 + $0xd0] sm:$0xff] }
 0x2e3   : > { %1637 = vmatpush1.bf16.msra.mxu1 %v1459_v18  ;;  %1751 = vmatpush1.bf16.msra.mxu0 %v1487_v27  ;;  %v1499_v44 = vld [vmem:[#allocation2 + $0x1a0] sm:$0xff]  ;;  %v1504_v47 = vld [vmem:[#allocation2 + $0x1c8] sm:$0xff]  ;;  %v1478_v61 = vld [vmem:[#allocation2 + $0xf8] sm:$0xff] }
 0x2e4   : > { %1638 = vmatprep.subr.bf16.mxu1 %v1464_v21  ;;  %1752 = vmatprep.subr.bf16.mxu0 %v1492_v29  ;;  %v1503_v48 = vld [vmem:[#allocation2 + $0x1c0] sm:$0xff]  ;;  %v1508_v50 = vld [vmem:[#allocation2 + $0x1e8] sm:$0xff]  ;;  %v1477_v13 = vld [vmem:[#allocation2 + $0xf0] sm:$0xff] }
 0x2e5   : > { %v1507_v52 = vld [vmem:[#allocation2 + $0x1e0] sm:$0xff]  ;;  %v1512_v54 = vld [vmem:[#allocation2 + $0x208] sm:$0xff]  ;;  %v1482_v15 = vld [vmem:[#allocation2 + $0x118] sm:$0xff] }
 0x2e6   : > { %v1511_v56 = vld [vmem:[#allocation2 + $0x200] sm:$0xff]  ;;  %v1516_v57 = vld [vmem:[#allocation2 + $0x228] sm:$0xff]  ;;  %v1481_v17 = vld [vmem:[#allocation2 + $0x110] sm:$0xff] }
 0x2e7   : > { %1639 = vmatpush1.bf16.msra.mxu1 %v1463_v24  ;;  %1753 = vmatpush1.bf16.msra.mxu0 %v1491_v31  ;;  %v1515_v63 = vld [vmem:[#allocation2 + $0x220] sm:$0xff]  ;;  %v1520_v1 = vld [vmem:[#allocation2 + $0x248] sm:$0xff]  ;;  %v1486_v18 = vld [vmem:[#allocation2 + $0x138] sm:$0xff] }
 0x2e8   : > { %1640 = vmatprep.subr.bf16.mxu1 %v1468_v26  ;;  %1754 = vmatprep.subr.bf16.mxu0 %v1496_v33  ;;  %v1519_v3 = vld [vmem:[#allocation2 + $0x240] sm:$0xff]  ;;  %v1524_v5 = vld [vmem:[#allocation2 + $0x268] sm:$0xff]  ;;  %v1485_v19 = vld [vmem:[#allocation2 + $0x130] sm:$0xff] }
 0x2e9   : > { %v1523_v6 = vld [vmem:[#allocation2 + $0x260] sm:$0xff]  ;;  %v1528_v60 = vld [vmem:[#allocation2 + $0x288] sm:$0xff]  ;;  %v1490_v20 = vld [vmem:[#allocation2 + $0x158] sm:$0xff] }
 0x2ea   : > { %v1527_v12 = vld [vmem:[#allocation2 + $0x280] sm:$0xff]  ;;  %v1532_v14 = vld [vmem:[#allocation2 + $0x2a8] sm:$0xff]  ;;  %v1489_v21 = vld [vmem:[#allocation2 + $0x150] sm:$0xff] }
 0x2eb   : > { %1641 = vmatpush1.bf16.msra.mxu1 %v1467_v28  ;;  %1755 = vmatpush1.bf16.msra.mxu0 %v1495_v36  ;;  %v1531_v16 = vld [vmem:[#allocation2 + $0x2a0] sm:$0xff]  ;;  %v1494_v22 = vld [vmem:[#allocation2 + $0x178] sm:$0xff]  ;;  %v1493_v23 = vld [vmem:[#allocation2 + $0x170] sm:$0xff] }
 0x2ec   : > { %1642 = vmatprep.subr.bf16.mxu1 %v1472_v30  ;;  %1756 = vmatprep.subr.bf16.mxu0 %v1500_v38  ;;  %v1498_v24 = vld [vmem:[#allocation2 + $0x198] sm:$0xff]  ;;  %v1497_v25 = vld [vmem:[#allocation2 + $0x190] sm:$0xff] }
 0x2ed   : > { %v1502_v26 = vld [vmem:[#allocation2 + $0x1b8] sm:$0xff]  ;;  %v1501_v27 = vld [vmem:[#allocation2 + $0x1b0] sm:$0xff] }
 0x2ee   : > { %v1506_v28 = vld [vmem:[#allocation2 + $0x1d8] sm:$0xff]  ;;  %v1505_v29 = vld [vmem:[#allocation2 + $0x1d0] sm:$0xff] }
 0x2ef   : > { %1643 = vmatpush1.bf16.msra.mxu1 %v1471_v32  ;;  %1757 = vmatpush1.bf16.msra.mxu0 %v1499_v44  ;;  %v1510_v30 = vld [vmem:[#allocation2 + $0x1f8] sm:$0xff]  ;;  %v1509_v31 = vld [vmem:[#allocation2 + $0x1f0] sm:$0xff] }
 0x2f0   : > { %1644 = vmatprep.subr.bf16.mxu1 %v1476_v34  ;;  %1758 = vmatprep.subr.bf16.mxu0 %v1504_v47  ;;  %v1514_v32 = vld [vmem:[#allocation2 + $0x218] sm:$0xff]  ;;  %v1513_v33 = vld [vmem:[#allocation2 + $0x210] sm:$0xff]  ;;  %v1536_v47 = vld [vmem:[#allocation2 + $0x2c8] sm:$0xff] }
 0x2f1   : > { %v1518_v34 = vld [vmem:[#allocation2 + $0x238] sm:$0xff]  ;;  %v1517_v35 = vld [vmem:[#allocation2 + $0x230] sm:$0xff] }
 0x2f2   : > { %v1522_v36 = vld [vmem:[#allocation2 + $0x258] sm:$0xff]  ;;  %v1529_v44 = vld [vmem:[#allocation2 + $0x290] sm:$0xff] }
 0x2f3   : > { %1645 = vmatpush1.bf16.msra.mxu1 %v1475_v37  ;;  %1759 = vmatpush1.bf16.msra.mxu0 %v1503_v48  ;;  %v1521_v37 = vld [vmem:[#allocation2 + $0x250] sm:$0xff]  ;;  %v1526_v38 = vld [vmem:[#allocation2 + $0x278] sm:$0xff] }
 0x2f4   : > { %1671 = vmatprep.subr.bf16.mxu1 %v1450_v41  ;;  %1760 = vmatprep.subr.bf16.mxu0 %v1508_v50  ;;  %v1525_v41 = vld [vmem:[#allocation2 + $0x270] sm:$0xff]  ;;  %v1538_v48 = vld [vmem:[#allocation2 + $0x2d8] sm:$0xff] }
 0x2f5   : > { %v1537_v50 = vld [vmem:[#allocation2 + $0x2d0] sm:$0xff] }
 0x2f6   : > { %1663 = vmatmul.mubr.bf16.vlgmr.msra.gmra.mrb[8].mxu1 %v4743_v42 }
 0x2f7   : > { %1672 = vmatpush1.bf16.msra.mxu1 %v1449_v45  ;;  %1703 = vmatprep.mubr.bf16.mxu1 %v4354_v0  ;;  %v1461_v0 = vld [vmem:[#allocation2 + $0x70] sm:$0xff]  ;;  %v1534_v45 = vld [vmem:[#allocation2 + $0x2b8] sm:$0xff] }
 0x2f8   : > { %1673 = vmatprep.subr.bf16.mxu1 %v1454_v46  ;;  %1761 = vmatpush1.bf16.msra.mxu0 %v1507_v52  ;;  %v1533_v46 = vld [vmem:[#allocation2 + $0x2b0] sm:$0xff]  ;;  %v1542_v52 = vld [vmem:[#allocation2 + $0x2f8] sm:$0xff] }
 0x2f9   : > { %1762 = vmatprep.subr.bf16.mxu0 %v1512_v54  ;;  %v1541_v54 = vld [vmem:[#allocation2 + $0x2f0] sm:$0xff] }
 0x2fb   : > { %1674 = vmatpush1.bf16.msra.mxu1 %v1453_v49  ;;  %v1535_v49 = vld [vmem:[#allocation2 + $0x2c0] sm:$0xff] }
 0x2fc   : > { %1675 = vmatprep.subr.bf16.mxu1 %v1458_v51  ;;  %1763 = vmatpush1.bf16.msra.mxu0 %v1511_v56  ;;  %v1540_v51 = vld [vmem:[#allocation2 + $0x2e8] sm:$0xff]  ;;  %v1546_v56 = vld [vmem:[#allocation2 + $0x318] sm:$0xff] }
 0x2fd   : > { %1764 = vmatprep.subr.bf16.mxu0 %v1516_v57 }
 0x2ff   : > { %1676 = vmatpush1.bf16.msra.mxu1 %v1457_v53  ;;  %v1539_v53 = vld [vmem:[#allocation2 + $0x2e0] sm:$0xff] }
 0x300   : > { %1677 = vmatprep.subr.bf16.mxu1 %v1462_v55  ;;  %1765 = vmatpush1.bf16.msra.mxu0 %v1515_v63  ;;  %v1544_v55 = vld [vmem:[#allocation2 + $0x308] sm:$0xff] }
 0x301   : > { %1766 = vmatprep.subr.bf16.mxu0 %v1520_v1 }
 0x303   : > { %1678 = vmatpush1.bf16.msra.mxu1 %v1461_v0  ;;  %v4751_v0 = vld [vmem:[%s5091_s5 + $0x10] sm:$0xf] }
 0x304   : > { %1679 = vmatprep.subr.bf16.mxu1 %v1466_v62  ;;  %1767 = vmatpush1.bf16.msra.mxu0 %v1519_v3  ;;  %v1613_v57 = vrot.slane %v4751_v0, %v4688_v40  ;;  %v1617_v62 = vrot.slane %v4751_v0, %v4697_v43 }
 0x305   : > { %1768 = vmatprep.subr.bf16.mxu0 %v1524_v5 }
 0x307   : > { %1680 = vmatpush1.bf16.msra.mxu1 %v1465_v58 }
 0x308   : > { %1681 = vmatprep.subr.bf16.mxu1 %v1470_v2  ;;  %1769 = vmatpush1.bf16.msra.mxu0 %v1523_v6 }
 0x309   : > { %1770 = vmatprep.subr.bf16.mxu0 %v1528_v60 }
 0x30b   : > { %1682 = vmatpush1.bf16.msra.mxu1 %v1469_v4 }
 0x30c   : > { %1683 = vmatprep.subr.bf16.mxu1 %v1474_v59  ;;  %1771 = vmatpush1.bf16.msra.mxu0 %v1527_v12  ;;  %v1543_v12 = vld [vmem:[#allocation2 + $0x300] sm:$0xff] }
 0x30d   : > { %1772 = vmatprep.subr.bf16.mxu0 %v1532_v14  ;;  %v1548_v14 = vld [vmem:[#allocation2 + $0x328] sm:$0xff] }
 0x30f   : > { %1684 = vmatpush1.bf16.msra.mxu1 %v1473_v8 }
 0x310   : > { %1685 = vmatprep.subr.bf16.mxu1 %v1478_v61  ;;  %1773 = vmatpush1.bf16.msra.mxu0 %v1531_v16  ;;  %v1547_v16 = vld [vmem:[#allocation2 + $0x320] sm:$0xff] }
 0x311   : > { %1774 = vmatprep.subr.bf16.mxu0 %v1536_v47 }
 0x313   : > { %1686 = vmatpush1.bf16.msra.mxu1 %v1477_v13  ;;  %v1545_v13 = vld [vmem:[#allocation2 + $0x310] sm:$0xff] }
 0x314   : > { %1828 = vmatprep.subr.bf16.mxu1 %v1482_v15  ;;  %1775 = vmatpush1.bf16.msra.mxu0 %v1535_v49  ;;  %v1550_v15 = vld [vmem:[#allocation2 + $0x338] sm:$0xff] }
 0x315   : > { %1776 = vmatprep.subr.bf16.mxu0 %v1540_v51  ;;  %v1571_v51 = vld [vmem:[#allocation2 + $0x3e0] sm:$0xff] }
 0x316   : > { %1704 = vmatmul.mubr.bf16.vlgmr.msra.gmra.mrb[12].mxu1 %v4743_v42  ;;  %v1530_v42 = vld [vmem:[#allocation2 + $0x298] sm:$0xff] }
 0x317   : > { %1829 = vmatpush1.bf16.msra.mxu1 %v1481_v17  ;;  %v1549_v17 = vld [vmem:[#allocation2 + $0x330] sm:$0xff] }
 0x318   : > { %1830 = vmatprep.subr.bf16.mxu1 %v1486_v18  ;;  %1777 = vmatpush1.bf16.msra.mxu0 %v1539_v53  ;;  %v1552_v18 = vld [vmem:[#allocation2 + $0x348] sm:$0xff] }
 0x319   : > { %1787 = vmatprep.subr.bf16.mxu0 %v1544_v55  ;;  %v1576_v53 = vld [vmem:[#allocation2 + $0x408] sm:$0xff] }
 0x31b   : > { %1831 = vmatpush1.bf16.msra.mxu1 %v1485_v19  ;;  %v1554_v19 = vld [vmem:[#allocation2 + $0x358] sm:$0xff] }
 0x31c   : > { %1832 = vmatprep.subr.bf16.mxu1 %v1490_v20  ;;  %v1551_v20 = vld [vmem:[#allocation2 + $0x340] sm:$0xff] }
 0x31f   : > { %1833 = vmatpush1.bf16.msra.mxu1 %v1489_v21  ;;  %v1553_v21 = vld [vmem:[#allocation2 + $0x350] sm:$0xff] }
 0x320   : > { %1834 = vmatprep.subr.bf16.mxu1 %v1494_v22  ;;  %v1556_v22 = vld [vmem:[#allocation2 + $0x368] sm:$0xff] }
 0x323   : > { %1835 = vmatpush1.bf16.msra.mxu1 %v1493_v23  ;;  %v1558_v23 = vld [vmem:[#allocation2 + $0x378] sm:$0xff] }
 0x324   : > { %1836 = vmatprep.subr.bf16.mxu1 %v1498_v24  ;;  %v1555_v24 = vld [vmem:[#allocation2 + $0x360] sm:$0xff] }
 0x327   : > { %1837 = vmatpush1.bf16.msra.mxu1 %v1497_v25  ;;  %v1557_v25 = vld [vmem:[#allocation2 + $0x370] sm:$0xff] }
 0x328   : > { %1838 = vmatprep.subr.bf16.mxu1 %v1502_v26  ;;  %v1560_v26 = vld [vmem:[#allocation2 + $0x388] sm:$0xff] }
 0x32b   : > { %1839 = vmatpush1.bf16.msra.mxu1 %v1501_v27  ;;  %v1562_v27 = vld [vmem:[#allocation2 + $0x398] sm:$0xff] }
 0x32c   : > { %1840 = vmatprep.subr.bf16.mxu1 %v1506_v28  ;;  %v1559_v28 = vld [vmem:[#allocation2 + $0x380] sm:$0xff] }
 0x32f   : > { %1841 = vmatpush1.bf16.msra.mxu1 %v1505_v29  ;;  %v1561_v29 = vld [vmem:[#allocation2 + $0x390] sm:$0xff] }
 0x330   : > { %1842 = vmatprep.subr.bf16.mxu1 %v1510_v30  ;;  %v1564_v30 = vld [vmem:[#allocation2 + $0x3a8] sm:$0xff] }
 0x333   : > { %1843 = vmatpush1.bf16.msra.mxu1 %v1509_v31  ;;  %v1566_v31 = vld [vmem:[#allocation2 + $0x3b8] sm:$0xff] }
 0x334   : > { %1844 = vmatprep.subr.bf16.mxu1 %v1514_v32  ;;  %v4758_v32 = vsub.s32 3, %v4685_v39 }
 0x336   : > { %5125 = vst [vmem:[#allocation32_spill] sm:$0xff] %v4758_v32 }
 0x337   : > { %1845 = vmatpush1.bf16.msra.mxu1 %v1513_v33  ;;  %v1563_v33 = vld [vmem:[#allocation2 + $0x3a0] sm:$0xff] }
 0x338   : > { %1846 = vmatprep.subr.bf16.mxu1 %v1518_v34  ;;  %v1565_v34 = vld [vmem:[#allocation2 + $0x3b0] sm:$0xff] }
 0x33b   : > { %1847 = vmatpush1.bf16.msra.mxu1 %v1517_v35  ;;  %v1568_v35 = vld [vmem:[#allocation2 + $0x3c8] sm:$0xff] }
 0x33c   : > { %1848 = vmatprep.subr.bf16.mxu1 %v1522_v36  ;;  %v1570_v36 = vld [vmem:[#allocation2 + $0x3d8] sm:$0xff] }
 0x33f   : > { %1849 = vmatpush1.bf16.msra.mxu1 %v1521_v37  ;;  %v1625_v37 = vrot.slane %v4751_v0, %v4758_v32 }
 0x340   : > { %1850 = vmatprep.subr.bf16.mxu1 %v1526_v38 }
 0x343   : > { %1851 = vmatpush1.bf16.msra.mxu1 %v1525_v41  ;;  %v1567_v41 = vld [vmem:[#allocation2 + $0x3c0] sm:$0xff] }
 0x344   : > { %1852 = vmatprep.subr.bf16.mxu1 %v1530_v42  ;;  %v1569_v42 = vld [vmem:[#allocation2 + $0x3d0] sm:$0xff] }
 0x347   : > { %1853 = vmatpush1.bf16.msra.mxu1 %v1529_v44 }
 0x348   : > { %1854 = vmatprep.subr.bf16.mxu1 %v1534_v45  ;;  %v1572_v45 = vld [vmem:[#allocation2 + $0x3e8] sm:$0xff] }
 0x34b   : > { %1855 = vmatpush1.bf16.msra.mxu1 %v1533_v46  ;;  %v1574_v46 = vld [vmem:[#allocation2 + $0x3f8] sm:$0xff] }
 0x34c   : > { %1856 = vmatprep.subr.bf16.mxu1 %v1538_v48 }
 0x34f   : > { %1857 = vmatpush1.bf16.msra.mxu1 %v1537_v50 }
 0x350   : > { %1858 = vmatprep.subr.bf16.mxu1 %v1542_v52  ;;  %v1573_v52 = vld [vmem:[#allocation2 + $0x3f0] sm:$0xff] }
 0x353   : > { %1859 = vmatpush1.bf16.msra.mxu1 %v1541_v54  ;;  %v1578_v54 = vld [vmem:[#allocation2 + $0x418] sm:$0xff] }
 0x354   : > { %1869 = vmatprep.subr.bf16.mxu1 %v1546_v56 }
 0x3c9   : > { %v1664_v63 = vpop.f32.mrb[8].mxu1 }
 0x3ca   : > { %v1665_v58 = vadd.f32 %v1664_v63, %v1613_v57  ;;  %v1666_v1 = vpop.f32.mrb[9].mxu1  ;;  %v1575_v57 = vld [vmem:[#allocation2 + $0x400] sm:$0xff]  ;;  %v1580_v63 = vld [vmem:[#allocation2 + $0x428] sm:$0xff] }
 0x3cb   : > { %v1667_v2 = vadd.f32 %v1666_v1, %v1617_v62  ;;  %v1668_v3 = vpop.f32.mrb[10].mxu1  ;;  %v1577_v62 = vld [vmem:[#allocation2 + $0x410] sm:$0xff]  ;;  %v1579_v1 = vld [vmem:[#allocation2 + $0x420] sm:$0xff] }
 0x3cc   : > { %v1712_v4 = vmul.f32 0.2, %v1665_v58  ;;  %v1669_v5 = vpop.f32.mrb[11].mxu1  ;;  %v1584_v3 = vld [vmem:[#allocation2 + $0x448] sm:$0xff] }
 0x3cd   : > { %v1713_v59 = vmul.f32 0.2, %v1667_v2  ;;  %v1583_v5 = vld [vmem:[#allocation2 + $0x440] sm:$0xff] }
 0x3ce   : > { %v1716_v6 = vmax.f32 %v1665_v58, %v1712_v4  ;;  %v1582_v58 = vld [vmem:[#allocation2 + $0x438] sm:$0xff] }
 0x3cf   : > { %v1717_v8 = vmax.f32 %v1667_v2, %v1713_v59  ;;  %v1581_v2 = vld [vmem:[#allocation2 + $0x430] sm:$0xff]  ;;  %v1586_v4 = vld [vmem:[#allocation2 + $0x458] sm:$0xff] }
 0x3d0   : > { %v1720_v61 = vpack.c.bf16 %v1716_v6, %v1716_v6  ;;  %v1585_v59 = vld [vmem:[#allocation2 + $0x450] sm:$0xff]  ;;  %v1588_v6 = vld [vmem:[#allocation2 + $0x468] sm:$0xff] }
 0x3d1   : > { %v1721_v60 = vpack.c.bf16 %v1717_v8, %v1717_v8  ;;  %v1590_v8 = vld [vmem:[#allocation2 + $0x478] sm:$0xff] }
 0x3d3   : > { %1778 = vmatprep.mubr.bf16.mxu0 %v1721_v60  ;;  %1860 = vmatprep.mubr.bf16.mxu1 %v1721_v60  ;;  %v1587_v60 = vld [vmem:[#allocation2 + $0x460] sm:$0xff] }
 0x3d4   : > { %1779 = vmatmul.mubr.bf16.vlgmr.msra.gmra.mrb[8].mxu0 %v1720_v61  ;;  %1861 = vmatmul.mubr.bf16.vlgmr.msra.gmra.mrb[16].mxu1 %v1720_v61  ;;  %v1589_v61 = vld [vmem:[#allocation2 + $0x470] sm:$0xff] }
 0x3d5   : > { %1788 = vmatpush1.bf16.msra.mxu0 %v1543_v12  ;;  %1870 = vmatpush1.bf16.msra.mxu1 %v1545_v13  ;;  %v4765_v12 = vsub.s32 2, %v4685_v39  ;;  %v1592_v13 = vld [vmem:[#allocation2 + $0x488] sm:$0xff]  ;;  %v1595_v39 = vld [vmem:[#allocation2 + $0x4a0] sm:$0xff] }
 0x3d6   : > { %1789 = vmatprep.subr.bf16.mxu0 %v1548_v14  ;;  %1871 = vmatprep.subr.bf16.mxu1 %v1550_v15  ;;  %v1594_v14 = vld [vmem:[#allocation2 + $0x498] sm:$0xff]  ;;  %v1591_v15 = vld [vmem:[#allocation2 + $0x480] sm:$0xff] }
 0x3d7   : > { %5126 = vst [vmem:[#allocation33_spill] sm:$0xff] %v4765_v12 }
 0x3d9   : > { %1790 = vmatpush1.bf16.msra.mxu0 %v1547_v16  ;;  %1872 = vmatpush1.bf16.msra.mxu1 %v1549_v17  ;;  %v1593_v16 = vld [vmem:[#allocation2 + $0x490] sm:$0xff]  ;;  %v1621_v17 = vrot.slane %v4751_v0, %v4765_v12  ;;  %v1604_v0 = vld [vmem:[#allocation2 + $0x4e8] sm:$0xff] }
 0x3da   : > { %1791 = vmatprep.subr.bf16.mxu0 %v1552_v18  ;;  %1873 = vmatprep.subr.bf16.mxu1 %v1554_v19  ;;  %v1596_v18 = vld [vmem:[#allocation2 + $0x4a8] sm:$0xff]  ;;  %v1598_v19 = vld [vmem:[#allocation2 + $0x4b8] sm:$0xff] }
 0x3dd   : > { %1792 = vmatpush1.bf16.msra.mxu0 %v1551_v20  ;;  %1874 = vmatpush1.bf16.msra.mxu1 %v1553_v21  ;;  %v1597_v21 = vld [vmem:[#allocation2 + $0x4b0] sm:$0xff] }
 0x3de   : > { %1793 = vmatprep.subr.bf16.mxu0 %v1556_v22  ;;  %1875 = vmatprep.subr.bf16.mxu1 %v1558_v23  ;;  %v1600_v22 = vld [vmem:[#allocation2 + $0x4c8] sm:$0xff]  ;;  %v1602_v23 = vld [vmem:[#allocation2 + $0x4d8] sm:$0xff] }
 0x3e1   : > { %1794 = vmatpush1.bf16.msra.mxu0 %v1555_v24  ;;  %1876 = vmatpush1.bf16.msra.mxu1 %v1557_v25  ;;  %v1599_v25 = vld [vmem:[#allocation2 + $0x4c0] sm:$0xff] }
 0x3e2   : > { %1795 = vmatprep.subr.bf16.mxu0 %v1560_v26  ;;  %1877 = vmatprep.subr.bf16.mxu1 %v1562_v27  ;;  %v1601_v26 = vld [vmem:[#allocation2 + $0x4d0] sm:$0xff]  ;;  %v1606_v27 = vld [vmem:[#allocation2 + $0x4f8] sm:$0xff] }
 0x3e5   : > { %1796 = vmatpush1.bf16.msra.mxu0 %v1559_v28  ;;  %1878 = vmatpush1.bf16.msra.mxu1 %v1561_v29  ;;  %v1603_v29 = vld [vmem:[#allocation2 + $0x4e0] sm:$0xff] }
 0x3e6   : > { %1797 = vmatprep.subr.bf16.mxu0 %v1564_v30  ;;  %1879 = vmatprep.subr.bf16.mxu1 %v1566_v31  ;;  %v1605_v30 = vld [vmem:[#allocation2 + $0x4f0] sm:$0xff] }
 0x3e9   : > { %1798 = vmatpush1.bf16.msra.mxu0 %v1563_v33  ;;  %1880 = vmatpush1.bf16.msra.mxu1 %v1565_v34  ;;  %v4762_v38 = vpop.f32.mrb[12].mxu1  ;;  %v1724_v33 = vld [vmem:[%s5091_s5 + $0x14] sm:$0xf] }
 0x3ea   : > { %1799 = vmatprep.subr.bf16.mxu0 %v1568_v35  ;;  %1881 = vmatprep.subr.bf16.mxu1 %v1570_v36  ;;  %v1707_v44 = vpop.f32.mrb[13].mxu1  ;;  %v1706_v20 = vadd.f32 %v4762_v38, %v1621_v17  ;;  %v1729_v34 = vrot.slane %v1724_v33, %v4688_v40  ;;  %v1737_v35 = vrot.slane %v1724_v33, %v4765_v12 }
 0x3eb   : > { %v1708_v47 = vadd.f32 %v1707_v44, %v1625_v37  ;;  %v1709_v48 = vpop.f32.mrb[14].mxu1  ;;  %v1733_v36 = vrot.slane %v1724_v33, %v4697_v43  ;;  %v1741_v37 = vrot.slane %v1724_v33, %v4758_v32 }
 0x3ec   : > { %v1710_v49 = vpop.f32.mrb[15].mxu1  ;;  %v1714_v24 = vmul.f32 0.2, %v1706_v20 }
 0x3ed   : > { %1800 = vmatpush1.bf16.msra.mxu0 %v1567_v41  ;;  %1882 = vmatpush1.bf16.msra.mxu1 %v1569_v42  ;;  %v1715_v50 = vmul.f32 0.2, %v1708_v47 }
 0x3ee   : > { %1801 = vmatprep.subr.bf16.mxu0 %v1572_v45  ;;  %1883 = vmatprep.subr.bf16.mxu1 %v1574_v46  ;;  %v1718_v28 = vmax.f32 %v1706_v20, %v1714_v24 }
 0x3ef   : > { %v1719_v55 = vmax.f32 %v1708_v47, %v1715_v50 }
 0x3f0   : > { %v1722_v31 = vpack.c.bf16 %v1718_v28, %v1718_v28 }
 0x3f1   : > { %1802 = vmatpush1.bf16.msra.mxu0 %v1571_v51  ;;  %1884 = vmatpush1.bf16.msra.mxu1 %v1573_v52  ;;  %v1723_v56 = vpack.c.bf16 %v1719_v55, %v1719_v55 }
 0x3f2   : > { %1803 = vmatprep.subr.bf16.mxu0 %v1576_v53  ;;  %1885 = vmatprep.subr.bf16.mxu1 %v1578_v54 }
 0x3f3   : > { %1819 = vmatprep.mubr.bf16.mxu0 %v1723_v56  ;;  %1901 = vmatprep.mubr.bf16.mxu1 %v1723_v56 }
 0x3f5   : > { %1804 = vmatpush1.bf16.msra.mxu0 %v1575_v57  ;;  %1886 = vmatpush1.bf16.msra.mxu1 %v1577_v62 }
 0x3f6   : > { %1805 = vmatprep.subr.bf16.mxu0 %v1580_v63  ;;  %1887 = vmatprep.subr.bf16.mxu1 %v1582_v58 }
 0x3f9   : > { %1806 = vmatpush1.bf16.msra.mxu0 %v1579_v1  ;;  %1888 = vmatpush1.bf16.msra.mxu1 %v1581_v2 }
 0x3fa   : > { %1807 = vmatprep.subr.bf16.mxu0 %v1584_v3  ;;  %1889 = vmatprep.subr.bf16.mxu1 %v1586_v4 }
 0x3fd   : > { %1808 = vmatpush1.bf16.msra.mxu0 %v1583_v5  ;;  %1890 = vmatpush1.bf16.msra.mxu1 %v1585_v59 }
 0x3fe   : > { %1809 = vmatprep.subr.bf16.mxu0 %v1588_v6  ;;  %1891 = vmatprep.subr.bf16.mxu1 %v1590_v8 }
 0x401   : > { %1810 = vmatpush1.bf16.msra.mxu0 %v1587_v60  ;;  %1892 = vmatpush1.bf16.msra.mxu1 %v1589_v61 }
 0x402   : > { %1811 = vmatprep.subr.bf16.mxu0 %v1592_v13  ;;  %1893 = vmatprep.subr.bf16.mxu1 %v1594_v14 }
 0x405   : > { %1812 = vmatpush1.bf16.msra.mxu0 %v1591_v15  ;;  %1894 = vmatpush1.bf16.msra.mxu1 %v1593_v16 }
 0x406   : > { %1813 = vmatprep.subr.bf16.mxu0 %v1596_v18  ;;  %1895 = vmatprep.subr.bf16.mxu1 %v1598_v19 }
 0x409   : > { %1814 = vmatpush1.bf16.msra.mxu0 %v1595_v39  ;;  %1896 = vmatpush1.bf16.msra.mxu1 %v1597_v21 }
 0x40a   : > { %1815 = vmatprep.subr.bf16.mxu0 %v1600_v22  ;;  %1897 = vmatprep.subr.bf16.mxu1 %v1602_v23 }
 0x40d   : > { %1816 = vmatpush1.bf16.msra.mxu0 %v1599_v25  ;;  %1898 = vmatpush1.bf16.msra.mxu1 %v1601_v26 }
 0x40e   : > { %1817 = vmatprep.subr.bf16.mxu0 %v1604_v0  ;;  %1899 = vmatprep.subr.bf16.mxu1 %v1606_v27 }
 0x411   : > { %1818 = vmatpush1.bf16.msra.mxu0 %v1603_v29  ;;  %1900 = vmatpush1.bf16.msra.mxu1 %v1605_v30 }
 0x414   : > { %1820 = vmatmul.mubr.bf16.vlgmr.msra.gmra.mrb[8].mxu0 %v1722_v31  ;;  %1902 = vmatmul.mubr.bf16.vlgmr.msra.gmra.mrb[16].mxu1 %v1722_v31 }
 0x4e7   : > { %v1821_v38 = vpop.f32.mrb[8].mxu0  ;;  %v1903_v41 = vpop.f32.mrb[16].mxu1 }
 0x4e8   : > { %v3791_v42 = vadd.f32 %v1821_v38, %v1729_v34  ;;  %v3793_v44 = vadd.f32 %v1903_v41, %v1737_v35  ;;  %v1823_v45 = vpop.f32.mrb[9].mxu0  ;;  %v1905_v46 = vpop.f32.mrb[17].mxu1 }
 0x4e9   : > { %v3792_v47 = vadd.f32 %v1823_v45, %v1733_v36  ;;  %v3794_v48 = vadd.f32 %v1905_v46, %v1741_v37  ;;  %v1825_v49 = vpop.f32.mrb[10].mxu0  ;;  %v1907_v50 = vpop.f32.mrb[18].mxu1 }
 0x4ea   : > { %v1912_v51 = vrot.slane %v3791_v42, 4  ;;  %v1924_v52 = vrot.slane %v3793_v44, 4  ;;  %v1826_v53 = vpop.f32.mrb[11].mxu0  ;;  %v1908_v54 = vpop.f32.mrb[19].mxu1 }
 0x4eb   : > { %v1918_v55 = vrot.slane %v3792_v47, 4  ;;  %v1930_v56 = vrot.slane %v3794_v48, 4 }
 0x4ec   : > { %v1913_v57 = vadd.f32 %v3791_v42, %v1912_v51  ;;  %v1925_v62 = vadd.f32 %v3793_v44, %v1924_v52 }
 0x4ed   : > { %v1919_v63 = vadd.f32 %v3792_v47, %v1918_v55  ;;  %v1931_v58 = vadd.f32 %v3794_v48, %v1930_v56 }
 0x4ee   : > { %v1914_v1 = vrot.slane %v1913_v57, 2  ;;  %v1926_v2 = vrot.slane %v1925_v62, 2 }
 0x4ef   : > { %v1920_v3 = vrot.slane %v1919_v63, 2  ;;  %v1932_v4 = vrot.slane %v1931_v58, 2 }
 0x4f0   : > { %v1915_v5 = vadd.f32 %v1914_v1, %v1913_v57  ;;  %v1927_v59 = vadd.f32 %v1926_v2, %v1925_v62 }
 0x4f1   : > { %v1921_v6 = vadd.f32 %v1920_v3, %v1919_v63  ;;  %v1933_v8 = vadd.f32 %v1932_v4, %v1931_v58 }
 0x4f2   : > { %v1916_v60 = vrot.slane %v1915_v5, 1  ;;  %v1928_v61 = vrot.slane %v1927_v59, 1 }
 0x4f3   : > { %v1922_v13 = vrot.slane %v1921_v6, 1  ;;  %v1934_v14 = vrot.slane %v1933_v8, 1 }
 0x4f4   : > { %v1917_v15 = vadd.f32 %v1916_v60, %v1915_v5  ;;  %v1929_v16 = vadd.f32 %v1928_v61, %v1927_v59  ;;  %v1910_v5 = vld [vmem:[%s5091_s5 + $0x18] sm:$0xf]  ;;  %v1911_v59 = vld [vmem:[%s5091_s5 + $0x1c] sm:$0xf] }
 0x4f5   : > { %v1923_v17 = vadd.f32 %v1922_v13, %v1921_v6  ;;  %v1935_v18 = vadd.f32 %v1934_v14, %v1933_v8  ;;  %v1992_v6 = vrot.slane %v1910_v5, %v4688_v40  ;;  %v2000_v60 = vrot.slane %v1910_v5, %v4765_v12 }
 0x4f6   : > { %v1936_v19 = vmul.f32 0.125, %v1917_v15  ;;  %v1938_v20 = vmul.f32 0.125, %v1929_v16  ;;  %v2017_v14 = vrot.slane %v1911_v59, %v4688_v40  ;;  %v1996_v15 = vrot.slane %v1910_v5, %v4697_v43 }
 0x4f7   : > { %v1937_v39 = vmul.f32 0.125, %v1923_v17  ;;  %v1939_v21 = vmul.f32 0.125, %v1935_v18  ;;  %v2025_v18 = vrot.slane %v1911_v59, %v4765_v12 }
 0x4f8   : > { %v1940_v22 = vsub.f32 %v3791_v42, %v1936_v19  ;;  %v1942_v23 = vsub.f32 %v3793_v44, %v1938_v20  ;;  %v2004_v19 = vrot.slane %v1910_v5, %v4758_v32 }
 0x4f9   : > { %v1941_v24 = vsub.f32 %v3792_v47, %v1937_v39  ;;  %v1943_v25 = vsub.f32 %v3794_v48, %v1939_v21 }
 0x4fa   : > { %v1944_v26 = vmul.f32 %v1940_v22, %v1940_v22  ;;  %v1946_v0 = vmul.f32 %v1942_v23, %v1942_v23 }
 0x4fb   : > { %v1945_v27 = vmul.f32 %v1941_v24, %v1941_v24  ;;  %v1947_v28 = vmul.f32 %v1943_v25, %v1943_v25 }
 0x4fc   : > { %v1948_v29 = vrot.slane %v1944_v26, 4  ;;  %v1960_v30 = vrot.slane %v1946_v0, 4 }
 0x4fd   : > { %v1954_v31 = vrot.slane %v1945_v27, 4  ;;  %v1966_v33 = vrot.slane %v1947_v28, 4 }
 0x4fe   : > { %v1949_v34 = vadd.f32 %v1948_v29, %v1944_v26  ;;  %v1961_v35 = vadd.f32 %v1960_v30, %v1946_v0  ;;  %v2021_v26 = vrot.slane %v1911_v59, %v4697_v43 }
 0x4ff   : > { %v1955_v36 = vadd.f32 %v1954_v31, %v1945_v27  ;;  %v1967_v37 = vadd.f32 %v1966_v33, %v1947_v28  ;;  %v2029_v28 = vrot.slane %v1911_v59, %v4758_v32 }
 0x500   : > { %v1950_v38 = vrot.slane %v1949_v34, 2  ;;  %v1962_v41 = vrot.slane %v1961_v35, 2 }
 0x501   : > { %v1956_v45 = vrot.slane %v1955_v36, 2  ;;  %v1968_v46 = vrot.slane %v1967_v37, 2 }
 0x502   : > { %v1951_v42 = vadd.f32 %v1950_v38, %v1949_v34  ;;  %v1963_v44 = vadd.f32 %v1962_v41, %v1961_v35 }
 0x503   : > { %v1957_v47 = vadd.f32 %v1956_v45, %v1955_v36  ;;  %v1969_v48 = vadd.f32 %v1968_v46, %v1967_v37 }
 0x504   : > { %v1952_v49 = vrot.slane %v1951_v42, 1  ;;  %v1964_v50 = vrot.slane %v1963_v44, 1 }
 0x505   : > { %v1958_v51 = vrot.slane %v1957_v47, 1  ;;  %v1970_v52 = vrot.slane %v1969_v48, 1 }
 0x506   : > { %v1953_v53 = vadd.f32 %v1952_v49, %v1951_v42  ;;  %v1965_v54 = vadd.f32 %v1964_v50, %v1963_v44 }
 0x507   : > { %v1959_v55 = vadd.f32 %v1958_v51, %v1957_v47  ;;  %v1971_v56 = vadd.f32 %v1970_v52, %v1969_v48 }
 0x508   : > { %v1972_v57 = vmul.f32 0.125, %v1953_v53  ;;  %v1974_v62 = vmul.f32 0.125, %v1965_v54 }
 0x509   : > { %v1973_v63 = vmul.f32 0.125, %v1959_v55  ;;  %v1975_v58 = vmul.f32 0.125, %v1971_v56 }
 0x50a   : > { %v1976_v1 = vadd.f32 1e-05, %v1972_v57  ;;  %v1978_v2 = vadd.f32 1e-05, %v1974_v62 }
 0x50b   : > { %v1977_v3 = vadd.f32 1e-05, %v1973_v63  ;;  %v1979_v4 = vadd.f32 1e-05, %v1975_v58 }
 0x50c   : > { %4049 = vrsqrt.f32 %v1976_v1 }
 0x50d   : > { %4051 = vrsqrt.f32 %v1978_v2 }
 0x50e   : > { %4053 = vrsqrt.f32 %v1977_v3 }
 0x50f   : > { %4055 = vrsqrt.f32 %v1979_v4 }
 0x516   : > { %v4050_v8 = vpop.eup %4049 }
 0x517   : > { %v4052_v61 = vpop.eup %4051  ;;  %v1984_v13 = vmul.f32 %v4050_v8, %v1940_v22 }
 0x518   : > { %v4054_v16 = vpop.eup %4053  ;;  %v1986_v17 = vmul.f32 %v4052_v61, %v1942_v23 }
 0x519   : > { %v4056_v20 = vpop.eup %4055  ;;  %v2009_v39 = vmul.f32 %v1992_v6, %v1984_v13  ;;  %v1985_v21 = vmul.f32 %v4054_v16, %v1941_v24 }
 0x51a   : > { %v2011_v0 = vmul.f32 %v2000_v60, %v1986_v17  ;;  %v1987_v27 = vmul.f32 %v4056_v20, %v1943_v25 }
 0x51b   : > { %v2034_v22 = vadd.f32 %v2017_v14, %v2009_v39  ;;  %v2010_v29 = vmul.f32 %v1996_v15, %v1985_v21 }
 0x51c   : > { %v2036_v30 = vadd.f32 %v2025_v18, %v2011_v0  ;;  %v2012_v31 = vmul.f32 %v2004_v19, %v1987_v27 }
 0x51d   : > { %v2038_v33 = vmul.f32 0.2, %v2034_v22  ;;  %v2035_v34 = vadd.f32 %v2021_v26, %v2010_v29 }
 0x51e   : > { %v2040_v23 = vmul.f32 0.2, %v2036_v30  ;;  %v2037_v35 = vadd.f32 %v2029_v28, %v2012_v31 }
 0x51f   : > { %v4791_v36 = vmax.f32 %v2034_v22, %v2038_v33  ;;  %v2039_v37 = vmul.f32 0.2, %v2035_v34 }
 0x520   : > { %v4793_v38 = vmax.f32 %v2036_v30, %v2040_v23  ;;  %v2041_v24 = vmul.f32 0.2, %v2037_v35 }
 0x521   : > { %v4795_v41 = vmax.f32 %v2035_v34, %v2039_v37 }
 0x522   : > { %v4797_v45 = vmax.f32 %v2037_v35, %v2041_v24 }
 0x523   : > { %4323 = dma.done.wait [#allocation4 + $0x1], 8192 }
 0x524   : > { %4324 = vsyncadd [#allocation4 + $0x1], 4294959104  ;;  %v4801_v25 = vpack.c.bf16 %v4733_v7, %v4733_v7  ;;  %v4805_v46 = vpack.c.bf16 %v4737_v10, %v4737_v10  ;;  %v4807_v42 = vld [vmem:[#allocation3] sm:$0xff]  ;;  %v4809_v44 = vld [vmem:[#allocation3 + $0x8] sm:$0xff] }
 0x525   : > { %v4811_v47 = vld [vmem:[#allocation3 + $0x10] sm:$0xff]  ;;  %v4813_v48 = vld [vmem:[#allocation3 + $0x18] sm:$0xff]  ;;  %v4815_v49 = vld [vmem:[#allocation3 + $0x20] sm:$0xff] }
 0x526   : > { %5127 = vst [vmem:[#allocation34_spill] sm:$0xff] %v4801_v25  ;;  %v4817_v50 = vld [vmem:[#allocation3 + $0x28] sm:$0xff]  ;;  %v4819_v51 = vld [vmem:[#allocation3 + $0x30] sm:$0xff]  ;;  %v4821_v7 = vld [vmem:[#allocation3 + $0x38] sm:$0xff] }
 0x527   : > { %v4823_v52 = vld [vmem:[#allocation3 + $0x40] sm:$0xff]  ;;  %v4825_v10 = vld [vmem:[#allocation3 + $0x48] sm:$0xff]  ;;  %v4827_v53 = vld [vmem:[#allocation3 + $0x50] sm:$0xff] }
 0x528   : > { %v4829_v54 = vld [vmem:[#allocation3 + $0x58] sm:$0xff]  ;;  %v4831_v55 = vld [vmem:[#allocation3 + $0x60] sm:$0xff]  ;;  %v4833_v56 = vld [vmem:[#allocation3 + $0x68] sm:$0xff] }
 0x529   : > { %v4835_v57 = vld [vmem:[#allocation3 + $0x70] sm:$0xff]  ;;  %v4837_v62 = vld [vmem:[#allocation3 + $0x78] sm:$0xff]  ;;  %v4839_v63 = vld [vmem:[#allocation3 + $0x80] sm:$0xff] }
 0x52a   : > { %v4841_v58 = vld [vmem:[#allocation3 + $0x88] sm:$0xff]  ;;  %v4843_v1 = vld [vmem:[#allocation3 + $0x90] sm:$0xff]  ;;  %v4845_v2 = vld [vmem:[#allocation3 + $0x98] sm:$0xff] }
 0x52b   : > { %v4847_v3 = vld [vmem:[#allocation3 + $0xa0] sm:$0xff]  ;;  %v4849_v4 = vld [vmem:[#allocation3 + $0xa8] sm:$0xff]  ;;  %v4851_v5 = vld [vmem:[#allocation3 + $0xb0] sm:$0xff] }
 0x52c   : > { %v4853_v59 = vld [vmem:[#allocation3 + $0xb8] sm:$0xff]  ;;  %v4855_v6 = vld [vmem:[#allocation3 + $0xc0] sm:$0xff]  ;;  %v4857_v8 = vld [vmem:[#allocation3 + $0xc8] sm:$0xff] }
 0x52d   : > { %v4859_v60 = vld [vmem:[#allocation3 + $0xd0] sm:$0xff]  ;;  %v4861_v61 = vld [vmem:[#allocation3 + $0xd8] sm:$0xff]  ;;  %v4863_v13 = vld [vmem:[#allocation3 + $0xe0] sm:$0xff] }
 0x52e   : > { %v4865_v14 = vld [vmem:[#allocation3 + $0xe8] sm:$0xff]  ;;  %v4867_v15 = vld [vmem:[#allocation3 + $0xf0] sm:$0xff]  ;;  %v4869_v16 = vld [vmem:[#allocation3 + $0xf8] sm:$0xff] }
 0x52f   : > { %v4871_v17 = vld [vmem:[#allocation3 + $0x100] sm:$0xff]  ;;  %v4873_v18 = vld [vmem:[#allocation3 + $0x108] sm:$0xff]  ;;  %v4875_v19 = vld [vmem:[#allocation3 + $0x110] sm:$0xff] }
 0x530   : > { %v4877_v20 = vld [vmem:[#allocation3 + $0x118] sm:$0xff]  ;;  %v4879_v39 = vld [vmem:[#allocation3 + $0x120] sm:$0xff]  ;;  %v4881_v21 = vld [vmem:[#allocation3 + $0x128] sm:$0xff] }
 0x531   : > { %v4883_v26 = vld [vmem:[#allocation3 + $0x130] sm:$0xff]  ;;  %v4885_v0 = vld [vmem:[#allocation3 + $0x138] sm:$0xff]  ;;  %v4887_v27 = vld [vmem:[#allocation3 + $0x140] sm:$0xff] }
 0x532   : > { %v4889_v28 = vld [vmem:[#allocation3 + $0x148] sm:$0xff]  ;;  %v4891_v22 = vld [vmem:[#allocation3 + $0x150] sm:$0xff]  ;;  %v4893_v29 = vld [vmem:[#allocation3 + $0x158] sm:$0xff] }
 0x533   : > { %v4895_v30 = vld [vmem:[#allocation3 + $0x160] sm:$0xff]  ;;  %v4897_v31 = vld [vmem:[#allocation3 + $0x168] sm:$0xff]  ;;  %v4899_v33 = vld [vmem:[#allocation3 + $0x170] sm:$0xff] }
 0x534   : > { %5128 = vst [vmem:[#allocation35_spill] sm:$0xff] %v4895_v30  ;;  %5129 = vst [vmem:[#allocation36_spill] sm:$0xff] %v4899_v33  ;;  %v4901_v34 = vld [vmem:[#allocation3 + $0x178] sm:$0xff]  ;;  %v4903_v23 = vld [vmem:[#allocation3 + $0x180] sm:$0xff] }
 0x535   : > { %5130 = vst [vmem:[#allocation37_spill] sm:$0xff] %v4903_v23  ;;  %v4905_v35 = vld [vmem:[#allocation3 + $0x188] sm:$0xff]  ;;  %v4907_v37 = vld [vmem:[#allocation3 + $0x190] sm:$0xff]  ;;  %v4909_v24 = vld [vmem:[#allocation3 + $0x198] sm:$0xff] }
 0x536   : > { %5131 = vst [vmem:[#allocation38_spill] sm:$0xff] %v4905_v35  ;;  %5132 = vst [vmem:[#allocation39_spill] sm:$0xff] %v4907_v37  ;;  %v4911_v32 = vld [vmem:[#allocation3 + $0x1a0] sm:$0xff]  ;;  %v4913_v12 = vld [vmem:[#allocation3 + $0x1a8] sm:$0xff] }
 0x537   : > { %5133 = vst [vmem:[#allocation40_spill] sm:$0xff] %v4909_v24  ;;  %5134 = vst [vmem:[#allocation41_spill] sm:$0xff] %v4911_v32  ;;  %v4915_v43 = vld [vmem:[#allocation3 + $0x1b0] sm:$0xff]  ;;  %v4917_v40 = vld [vmem:[#allocation3 + $0x1b8] sm:$0xff] }
 0x538   : > { %5135 = vst [vmem:[#allocation42_spill] sm:$0xff] %v4913_v12  ;;  %5136 = vst [vmem:[#allocation43_spill] sm:$0xff] %v4915_v43  ;;  %v4919_v9 = vld [vmem:[#allocation3 + $0x1c0] sm:$0xff]  ;;  %v4921_v11 = vld [vmem:[#allocation3 + $0x1c8] sm:$0xff] }
 0x539   : > { %5137 = vst [vmem:[#allocation44_spill] sm:$0xff] %v4917_v40  ;;  %5138 = vst [vmem:[#allocation45_spill] sm:$0xff] %v4919_v9  ;;  %v4923_v25 = vld [vmem:[#allocation3 + $0x1d0] sm:$0xff]  ;;  %v4925_v23 = vld [vmem:[#allocation3 + $0x1d8] sm:$0xff] }
 0x53a   : > { %5139 = vst [vmem:[#allocation46_spill] sm:$0xff] %v4921_v11  ;;  %5140 = vst [vmem:[#allocation47_spill] sm:$0xff] %v4923_v25  ;;  %v4927_v35 = vld [vmem:[#allocation3 + $0x1e0] sm:$0xff]  ;;  %v4929_v37 = vld [vmem:[#allocation3 + $0x1e8] sm:$0xff] }
 0x53b   : > { %5141 = vst [vmem:[#allocation48_spill] sm:$0xff] %v4925_v23  ;;  %5142 = vst [vmem:[#allocation49_spill] sm:$0xff] %v4927_v35  ;;  %v4931_v24 = vld [vmem:[#allocation3 + $0x1f0] sm:$0xff]  ;;  %v4933_v32 = vld [vmem:[#allocation3 + $0x1f8] sm:$0xff] }
 0x53c   : > { %5143 = vst [vmem:[#allocation50_spill] sm:$0xff] %v4929_v37  ;;  %5144 = vst [vmem:[#allocation51_spill] sm:$0xff] %v4931_v24 }
 0x53d   : > { %5145 = vst [vmem:[#allocation52_spill] sm:$0xff] %v4933_v32 }
 0x53e   : > { %4325 = dma.done.wait [#allocation4 + $0x2], 16384 }
 0x53f   : > { %4326 = vsyncadd [#allocation4 + $0x2], 4294950912  ;;  %v4937_v43 = vpack.c.bf16 %v4795_v41, %v4795_v41  ;;  %v4941_v9 = vpack.c.bf16 %v4797_v45, %v4797_v45  ;;  %v2121_v35 = vld [vmem:[#allocation3 + $0x208] sm:$0xff]  ;;  %v2120_v25 = vld [vmem:[#allocation3 + $0x200] sm:$0xff] }
 0x540   : > { %v2185_v37 = vld [vmem:[#allocation3 + $0x408] sm:$0xff]  ;;  %2252 = vmatprep.subr.bf16.mxu0 %v2121_v35  ;;  %v2184_v24 = vld [vmem:[#allocation3 + $0x400] sm:$0xff] }
 0x541   : > { %2284 = vmatprep.mubr.bf16.mxu0 %v4937_v43  ;;  %2325 = vmatprep.mubr.bf16.mxu1 %v4941_v9  ;;  %v2125_v32 = vld [vmem:[#allocation3 + $0x228] sm:$0xff]  ;;  %v2124_v41 = vld [vmem:[#allocation3 + $0x220] sm:$0xff] }
 0x542   : > { %2293 = vmatprep.subr.bf16.mxu1 %v2185_v37  ;;  %v2189_v23 = vld [vmem:[#allocation3 + $0x428] sm:$0xff]  ;;  %2253 = vmatpush1.bf16.msra.mxu0 %v2120_v25  ;;  %v2188_v11 = vld [vmem:[#allocation3 + $0x420] sm:$0xff] }
 0x543   : > { %2294 = vmatpush1.bf16.msra.mxu1 %v2184_v24  ;;  %2254 = vmatprep.subr.bf16.mxu0 %v2125_v32  ;;  %v2129_v45 = vld [vmem:[#allocation3 + $0x248] sm:$0xff]  ;;  %v2128_v12 = vld [vmem:[#allocation3 + $0x240] sm:$0xff] }
 0x544   : > { %2295 = vmatprep.subr.bf16.mxu1 %v2189_v23  ;;  %v2193_v40 = vld [vmem:[#allocation3 + $0x448] sm:$0xff]  ;;  %v2192_v33 = vld [vmem:[#allocation3 + $0x440] sm:$0xff] }
 0x545   : > { %v2133_v30 = vld [vmem:[#allocation3 + $0x268] sm:$0xff]  ;;  %v2132_v25 = vld [vmem:[#allocation3 + $0x260] sm:$0xff] }
 0x546   : > { %2255 = vmatpush1.bf16.msra.mxu0 %v2124_v41  ;;  %v2197_v35 = vld [vmem:[#allocation3 + $0x468] sm:$0xff]  ;;  %v2196_v37 = vld [vmem:[#allocation3 + $0x460] sm:$0xff] }
 0x547   : > { %2296 = vmatpush1.bf16.msra.mxu1 %v2188_v11  ;;  %2256 = vmatprep.subr.bf16.mxu0 %v2129_v45  ;;  %v2137_v32 = vld [vmem:[#allocation3 + $0x288] sm:$0xff]  ;;  %v2136_v24 = vld [vmem:[#allocation3 + $0x280] sm:$0xff] }
 0x548   : > { %2297 = vmatprep.subr.bf16.mxu1 %v2193_v40  ;;  %v2201_v23 = vld [vmem:[#allocation3 + $0x488] sm:$0xff]  ;;  %v2200_v11 = vld [vmem:[#allocation3 + $0x480] sm:$0xff] }
 0x549   : > { %v2141_v41 = vld [vmem:[#allocation3 + $0x2a8] sm:$0xff] }
 0x54a   : > { %2257 = vmatpush1.bf16.msra.mxu0 %v2128_v12  ;;  %v2205_v40 = vld [vmem:[#allocation3 + $0x4a8] sm:$0xff]  ;;  %v2140_v12 = vld [vmem:[#allocation3 + $0x2a0] sm:$0xff] }
 0x54b   : > { %2298 = vmatpush1.bf16.msra.mxu1 %v2192_v33  ;;  %2258 = vmatprep.subr.bf16.mxu0 %v2133_v30  ;;  %v2204_v33 = vld [vmem:[#allocation3 + $0x4a0] sm:$0xff]  ;;  %v2145_v30 = vld [vmem:[#allocation3 + $0x2c8] sm:$0xff] }
 0x54c   : > { %2299 = vmatprep.subr.bf16.mxu1 %v2197_v35  ;;  %v2209_v45 = vld [vmem:[#allocation3 + $0x4c8] sm:$0xff]  ;;  %v2144_v35 = vld [vmem:[#allocation3 + $0x2c0] sm:$0xff] }
 0x54e   : > { %2259 = vmatpush1.bf16.msra.mxu0 %v2132_v25  ;;  %v2208_v25 = vld [vmem:[#allocation3 + $0x4c0] sm:$0xff] }
 0x54f   : > { %2300 = vmatpush1.bf16.msra.mxu1 %v2196_v37  ;;  %2260 = vmatprep.subr.bf16.mxu0 %v2137_v32  ;;  %v2149_v37 = vld [vmem:[#allocation3 + $0x2e8] sm:$0xff] }
 0x550   : > { %2301 = vmatprep.subr.bf16.mxu1 %v2201_v23  ;;  %v2213_v32 = vld [vmem:[#allocation3 + $0x4e8] sm:$0xff]  ;;  %v2148_v23 = vld [vmem:[#allocation3 + $0x2e0] sm:$0xff] }
 0x552   : > { %2261 = vmatpush1.bf16.msra.mxu0 %v2136_v24  ;;  %v2212_v24 = vld [vmem:[#allocation3 + $0x4e0] sm:$0xff] }
 0x553   : > { %2302 = vmatpush1.bf16.msra.mxu1 %v2200_v11  ;;  %2262 = vmatprep.subr.bf16.mxu0 %v2141_v41  ;;  %v2153_v11 = vld [vmem:[#allocation3 + $0x308] sm:$0xff] }
 0x554   : > { %2303 = vmatprep.subr.bf16.mxu1 %v2205_v40  ;;  %v2217_v41 = vld [vmem:[#allocation3 + $0x508] sm:$0xff]  ;;  %v2152_v40 = vld [vmem:[#allocation3 + $0x300] sm:$0xff] }
 0x556   : > { %2263 = vmatpush1.bf16.msra.mxu0 %v2140_v12  ;;  %v2216_v12 = vld [vmem:[#allocation3 + $0x500] sm:$0xff] }
 0x557   : > { %2304 = vmatpush1.bf16.msra.mxu1 %v2204_v33  ;;  %2264 = vmatprep.subr.bf16.mxu0 %v2145_v30  ;;  %v2157_v33 = vld [vmem:[#allocation3 + $0x328] sm:$0xff] }
 0x558   : > { %2305 = vmatprep.subr.bf16.mxu1 %v2209_v45  ;;  %v2221_v30 = vld [vmem:[#allocation3 + $0x528] sm:$0xff]  ;;  %v2156_v45 = vld [vmem:[#allocation3 + $0x320] sm:$0xff] }
 0x55a   : > { %2265 = vmatpush1.bf16.msra.mxu0 %v2144_v35  ;;  %v2220_v35 = vld [vmem:[#allocation3 + $0x520] sm:$0xff] }
 0x55b   : > { %2306 = vmatpush1.bf16.msra.mxu1 %v2208_v25  ;;  %2266 = vmatprep.subr.bf16.mxu0 %v2149_v37  ;;  %v2161_v25 = vld [vmem:[#allocation3 + $0x348] sm:$0xff] }
 0x55c   : > { %2307 = vmatprep.subr.bf16.mxu1 %v2213_v32  ;;  %v2225_v37 = vld [vmem:[#allocation3 + $0x548] sm:$0xff]  ;;  %v2160_v32 = vld [vmem:[#allocation3 + $0x340] sm:$0xff] }
 0x55e   : > { %2267 = vmatpush1.bf16.msra.mxu0 %v2148_v23  ;;  %v2224_v23 = vld [vmem:[#allocation3 + $0x540] sm:$0xff] }
 0x55f   : > { %2308 = vmatpush1.bf16.msra.mxu1 %v2212_v24  ;;  %2268 = vmatprep.subr.bf16.mxu0 %v2153_v11  ;;  %v2165_v24 = vld [vmem:[#allocation3 + $0x368] sm:$0xff] }
 0x560   : > { %2309 = vmatprep.subr.bf16.mxu1 %v2217_v41  ;;  %v2229_v11 = vld [vmem:[#allocation3 + $0x568] sm:$0xff]  ;;  %v2164_v41 = vld [vmem:[#allocation3 + $0x360] sm:$0xff] }
 0x562   : > { %2269 = vmatpush1.bf16.msra.mxu0 %v2152_v40  ;;  %v2228_v40 = vld [vmem:[#allocation3 + $0x560] sm:$0xff] }
 0x563   : > { %2310 = vmatpush1.bf16.msra.mxu1 %v2216_v12  ;;  %2270 = vmatprep.subr.bf16.mxu0 %v2157_v33  ;;  %v2169_v12 = vld [vmem:[#allocation3 + $0x388] sm:$0xff] }
 0x564   : > { %2311 = vmatprep.subr.bf16.mxu1 %v2221_v30  ;;  %v2233_v33 = vld [vmem:[#allocation3 + $0x588] sm:$0xff]  ;;  %v2168_v30 = vld [vmem:[#allocation3 + $0x380] sm:$0xff] }
 0x566   : > { %2271 = vmatpush1.bf16.msra.mxu0 %v2156_v45  ;;  %v2232_v45 = vld [vmem:[#allocation3 + $0x580] sm:$0xff] }
 0x567   : > { %2312 = vmatpush1.bf16.msra.mxu1 %v2220_v35  ;;  %2272 = vmatprep.subr.bf16.mxu0 %v2161_v25  ;;  %v2173_v35 = vld [vmem:[#allocation3 + $0x3a8] sm:$0xff] }
 0x568   : > { %2313 = vmatprep.subr.bf16.mxu1 %v2225_v37  ;;  %v2237_v25 = vld [vmem:[#allocation3 + $0x5a8] sm:$0xff]  ;;  %v2172_v37 = vld [vmem:[#allocation3 + $0x3a0] sm:$0xff] }
 0x56a   : > { %2273 = vmatpush1.bf16.msra.mxu0 %v2160_v32  ;;  %v2236_v32 = vld [vmem:[#allocation3 + $0x5a0] sm:$0xff] }
 0x56b   : > { %2314 = vmatpush1.bf16.msra.mxu1 %v2224_v23  ;;  %2274 = vmatprep.subr.bf16.mxu0 %v2165_v24  ;;  %v2177_v23 = vld [vmem:[#allocation3 + $0x3c8] sm:$0xff] }
 0x56c   : > { %2315 = vmatprep.subr.bf16.mxu1 %v2229_v11  ;;  %v2241_v24 = vld [vmem:[#allocation3 + $0x5c8] sm:$0xff]  ;;  %v2176_v11 = vld [vmem:[#allocation3 + $0x3c0] sm:$0xff] }
 0x56e   : > { %2275 = vmatpush1.bf16.msra.mxu0 %v2164_v41  ;;  %v2240_v41 = vld [vmem:[#allocation3 + $0x5c0] sm:$0xff] }
 0x56f   : > { %2316 = vmatpush1.bf16.msra.mxu1 %v2228_v40  ;;  %2276 = vmatprep.subr.bf16.mxu0 %v2169_v12  ;;  %v2181_v40 = vld [vmem:[#allocation3 + $0x3e8] sm:$0xff] }
 0x570   : > { %2317 = vmatprep.subr.bf16.mxu1 %v2233_v33  ;;  %v2245_v12 = vld [vmem:[#allocation3 + $0x5e8] sm:$0xff]  ;;  %v2180_v33 = vld [vmem:[#allocation3 + $0x3e0] sm:$0xff] }
 0x572   : > { %2277 = vmatpush1.bf16.msra.mxu0 %v2168_v30  ;;  %v2244_v30 = vld [vmem:[#allocation3 + $0x5e0] sm:$0xff] }
 0x573   : > { %2318 = vmatpush1.bf16.msra.mxu1 %v2232_v45  ;;  %2278 = vmatprep.subr.bf16.mxu0 %v2173_v35  ;;  %v2123_v45 = vld [vmem:[#allocation3 + $0x218] sm:$0xff] }
 0x574   : > { %2319 = vmatprep.subr.bf16.mxu1 %v2237_v25  ;;  %v2187_v35 = vld [vmem:[#allocation3 + $0x418] sm:$0xff]  ;;  %v4947_v25 = vpack.c.bf16 %v4791_v36, %v4791_v36  ;;  %v2126_v36 = vld [vmem:[#allocation3 + $0x230] sm:$0xff] }
 0x576   : > { %2279 = vmatpush1.bf16.msra.mxu0 %v2172_v37  ;;  %v4951_v37 = vpack.c.bf16 %v4793_v38, %v4793_v38  ;;  %v2131_v38 = vld [vmem:[#allocation3 + $0x258] sm:$0xff] }
 0x577   : > { %2320 = vmatpush1.bf16.msra.mxu1 %v2236_v32  ;;  %2280 = vmatprep.subr.bf16.mxu0 %v2177_v23  ;;  %v2122_v32 = vld [vmem:[#allocation3 + $0x210] sm:$0xff] }
 0x578   : > { %2321 = vmatprep.subr.bf16.mxu1 %v2241_v24  ;;  %v2186_v23 = vld [vmem:[#allocation3 + $0x410] sm:$0xff]  ;;  %v2127_v24 = vld [vmem:[#allocation3 + $0x238] sm:$0xff] }
 0x57a   : > { %2281 = vmatpush1.bf16.msra.mxu0 %v2176_v11  ;;  %v2191_v11 = vld [vmem:[#allocation3 + $0x438] sm:$0xff] }
 0x57b   : > { %2322 = vmatpush1.bf16.msra.mxu1 %v2240_v41  ;;  %2282 = vmatprep.subr.bf16.mxu0 %v2181_v40  ;;  %v2190_v41 = vld [vmem:[#allocation3 + $0x430] sm:$0xff]  ;;  %v2195_v40 = vld [vmem:[#allocation3 + $0x458] sm:$0xff] }
 0x57c   : > { %2323 = vmatprep.subr.bf16.mxu1 %v2245_v12  ;;  %v2130_v12 = vld [vmem:[#allocation3 + $0x250] sm:$0xff] }
 0x57e   : > { %2283 = vmatpush1.bf16.msra.mxu0 %v2180_v33  ;;  %v2194_v33 = vld [vmem:[#allocation3 + $0x450] sm:$0xff] }
 0x57f   : > { %2324 = vmatpush1.bf16.msra.mxu1 %v2244_v30  ;;  %2334 = vmatprep.subr.bf16.mxu0 %v2123_v45  ;;  %v2135_v30 = vld [vmem:[#allocation3 + $0x278] sm:$0xff] }
 0x580   : > { %2375 = vmatprep.subr.bf16.mxu1 %v2187_v35  ;;  %v2199_v45 = vld [vmem:[#allocation3 + $0x478] sm:$0xff]  ;;  %v2134_v35 = vld [vmem:[#allocation3 + $0x270] sm:$0xff] }
 0x581   : > { %2285 = vmatmul.mubr.bf16.vlgmr.msra.gmra.mrb[12].mxu0 %v4947_v25 }
 0x582   : > { %2326 = vmatmul.mubr.bf16.vlgmr.msra.gmra.mrb[20].mxu1 %v4951_v37  ;;  %2335 = vmatpush1.bf16.msra.mxu0 %v2122_v32  ;;  %v2198_v32 = vld [vmem:[#allocation3 + $0x470] sm:$0xff] }
 0x583   : > { %2376 = vmatpush1.bf16.msra.mxu1 %v2186_v23  ;;  %2336 = vmatprep.subr.bf16.mxu0 %v2127_v24  ;;  %v2139_v23 = vld [vmem:[#allocation3 + $0x298] sm:$0xff] }
 0x584   : > { %2377 = vmatprep.subr.bf16.mxu1 %v2191_v11  ;;  %2366 = vmatprep.mubr.bf16.mxu0 %v4937_v43  ;;  %v2203_v24 = vld [vmem:[#allocation3 + $0x498] sm:$0xff]  ;;  %v2138_v43 = vld [vmem:[#allocation3 + $0x290] sm:$0xff] }
 0x585   : > { %2407 = vmatprep.mubr.bf16.mxu1 %v4941_v9  ;;  %v2202_v9 = vld [vmem:[#allocation3 + $0x490] sm:$0xff]  ;;  %v2143_v11 = vld [vmem:[#allocation3 + $0x2b8] sm:$0xff] }
 0x586   : > { %2337 = vmatpush1.bf16.msra.mxu0 %v2126_v36  ;;  %v2207_v36 = vld [vmem:[#allocation3 + $0x4b8] sm:$0xff] }
 0x587   : > { %2378 = vmatpush1.bf16.msra.mxu1 %v2190_v41  ;;  %2338 = vmatprep.subr.bf16.mxu0 %v2131_v38  ;;  %v2142_v41 = vld [vmem:[#allocation3 + $0x2b0] sm:$0xff] }
 0x588   : > { %2379 = vmatprep.subr.bf16.mxu1 %v2195_v40  ;;  %v2206_v38 = vld [vmem:[#allocation3 + $0x4b0] sm:$0xff]  ;;  %v2147_v40 = vld [vmem:[#allocation3 + $0x2d8] sm:$0xff] }
 0x58a   : > { %2339 = vmatpush1.bf16.msra.mxu0 %v2130_v12  ;;  %v2211_v12 = vld [vmem:[#allocation3 + $0x4d8] sm:$0xff] }
 0x58b   : > { %2380 = vmatpush1.bf16.msra.mxu1 %v2194_v33  ;;  %2340 = vmatprep.subr.bf16.mxu0 %v2135_v30  ;;  %v2146_v33 = vld [vmem:[#allocation3 + $0x2d0] sm:$0xff] }
 0x58c   : > { %2381 = vmatprep.subr.bf16.mxu1 %v2199_v45  ;;  %v2210_v30 = vld [vmem:[#allocation3 + $0x4d0] sm:$0xff]  ;;  %v2151_v45 = vld [vmem:[#allocation3 + $0x2f8] sm:$0xff] }
 0x58e   : > { %2341 = vmatpush1.bf16.msra.mxu0 %v2134_v35  ;;  %v2215_v35 = vld [vmem:[#allocation3 + $0x4f8] sm:$0xff] }
 0x58f   : > { %2382 = vmatpush1.bf16.msra.mxu1 %v2198_v32  ;;  %2342 = vmatprep.subr.bf16.mxu0 %v2139_v23  ;;  %v2150_v32 = vld [vmem:[#allocation3 + $0x2f0] sm:$0xff] }
 0x590   : > { %2383 = vmatprep.subr.bf16.mxu1 %v2203_v24  ;;  %v2214_v23 = vld [vmem:[#allocation3 + $0x4f0] sm:$0xff]  ;;  %v2155_v24 = vld [vmem:[#allocation3 + $0x318] sm:$0xff] }
 0x592   : > { %2343 = vmatpush1.bf16.msra.mxu0 %v2138_v43  ;;  %v2219_v43 = vld [vmem:[#allocation3 + $0x518] sm:$0xff] }
 0x593   : > { %2384 = vmatpush1.bf16.msra.mxu1 %v2202_v9  ;;  %2344 = vmatprep.subr.bf16.mxu0 %v2143_v11  ;;  %v2154_v9 = vld [vmem:[#allocation3 + $0x310] sm:$0xff] }
 0x594   : > { %2385 = vmatprep.subr.bf16.mxu1 %v2207_v36  ;;  %v2218_v11 = vld [vmem:[#allocation3 + $0x510] sm:$0xff]  ;;  %v2159_v36 = vld [vmem:[#allocation3 + $0x338] sm:$0xff] }
 0x596   : > { %2345 = vmatpush1.bf16.msra.mxu0 %v2142_v41  ;;  %v2223_v41 = vld [vmem:[#allocation3 + $0x538] sm:$0xff] }
 0x597   : > { %2386 = vmatpush1.bf16.msra.mxu1 %v2206_v38  ;;  %2346 = vmatprep.subr.bf16.mxu0 %v2147_v40  ;;  %v2158_v38 = vld [vmem:[#allocation3 + $0x330] sm:$0xff] }
 0x598   : > { %2387 = vmatprep.subr.bf16.mxu1 %v2211_v12  ;;  %v2222_v40 = vld [vmem:[#allocation3 + $0x530] sm:$0xff]  ;;  %v2163_v12 = vld [vmem:[#allocation3 + $0x358] sm:$0xff] }
 0x59a   : > { %2347 = vmatpush1.bf16.msra.mxu0 %v2146_v33  ;;  %v2227_v33 = vld [vmem:[#allocation3 + $0x558] sm:$0xff] }
 0x59b   : > { %2388 = vmatpush1.bf16.msra.mxu1 %v2210_v30  ;;  %2348 = vmatprep.subr.bf16.mxu0 %v2151_v45  ;;  %v2162_v30 = vld [vmem:[#allocation3 + $0x350] sm:$0xff] }
 0x59c   : > { %2389 = vmatprep.subr.bf16.mxu1 %v2215_v35  ;;  %v2226_v45 = vld [vmem:[#allocation3 + $0x550] sm:$0xff]  ;;  %v2167_v35 = vld [vmem:[#allocation3 + $0x378] sm:$0xff] }
 0x59e   : > { %2349 = vmatpush1.bf16.msra.mxu0 %v2150_v32  ;;  %v2231_v32 = vld [vmem:[#allocation3 + $0x578] sm:$0xff] }
 0x59f   : > { %2390 = vmatpush1.bf16.msra.mxu1 %v2214_v23  ;;  %2350 = vmatprep.subr.bf16.mxu0 %v2155_v24  ;;  %v2166_v23 = vld [vmem:[#allocation3 + $0x370] sm:$0xff] }
 0x5a0   : > { %2391 = vmatprep.subr.bf16.mxu1 %v2219_v43  ;;  %v2230_v24 = vld [vmem:[#allocation3 + $0x570] sm:$0xff]  ;;  %v2171_v43 = vld [vmem:[#allocation3 + $0x398] sm:$0xff] }
 0x5a2   : > { %2351 = vmatpush1.bf16.msra.mxu0 %v2154_v9  ;;  %v2235_v9 = vld [vmem:[#allocation3 + $0x598] sm:$0xff] }
 0x5a3   : > { %2392 = vmatpush1.bf16.msra.mxu1 %v2218_v11  ;;  %2352 = vmatprep.subr.bf16.mxu0 %v2159_v36  ;;  %v2170_v11 = vld [vmem:[#allocation3 + $0x390] sm:$0xff] }
 0x5a4   : > { %2393 = vmatprep.subr.bf16.mxu1 %v2223_v41  ;;  %v2234_v36 = vld [vmem:[#allocation3 + $0x590] sm:$0xff]  ;;  %v2175_v41 = vld [vmem:[#allocation3 + $0x3b8] sm:$0xff] }
 0x5a6   : > { %2353 = vmatpush1.bf16.msra.mxu0 %v2158_v38  ;;  %v2239_v38 = vld [vmem:[#allocation3 + $0x5b8] sm:$0xff] }
 0x5a7   : > { %2394 = vmatpush1.bf16.msra.mxu1 %v2222_v40  ;;  %2354 = vmatprep.subr.bf16.mxu0 %v2163_v12  ;;  %v2174_v40 = vld [vmem:[#allocation3 + $0x3b0] sm:$0xff] }
 0x5a8   : > { %2395 = vmatprep.subr.bf16.mxu1 %v2227_v33  ;;  %v2238_v12 = vld [vmem:[#allocation3 + $0x5b0] sm:$0xff]  ;;  %v2179_v33 = vld [vmem:[#allocation3 + $0x3d8] sm:$0xff] }
 0x5aa   : > { %2355 = vmatpush1.bf16.msra.mxu0 %v2162_v30  ;;  %v2243_v30 = vld [vmem:[#allocation3 + $0x5d8] sm:$0xff] }
 0x5ab   : > { %2396 = vmatpush1.bf16.msra.mxu1 %v2226_v45  ;;  %2356 = vmatprep.subr.bf16.mxu0 %v2167_v35  ;;  %v2178_v45 = vld [vmem:[#allocation3 + $0x3d0] sm:$0xff] }
 0x5ac   : > { %2397 = vmatprep.subr.bf16.mxu1 %v2231_v32  ;;  %v2242_v35 = vld [vmem:[#allocation3 + $0x5d0] sm:$0xff]  ;;  %v2183_v32 = vld [vmem:[#allocation3 + $0x3f8] sm:$0xff] }
 0x5ae   : > { %2357 = vmatpush1.bf16.msra.mxu0 %v2166_v23  ;;  %v2247_v23 = vld [vmem:[#allocation3 + $0x5f8] sm:$0xff] }
 0x5af   : > { %2398 = vmatpush1.bf16.msra.mxu1 %v2230_v24  ;;  %2358 = vmatprep.subr.bf16.mxu0 %v2171_v43  ;;  %v2182_v24 = vld [vmem:[#allocation3 + $0x3f0] sm:$0xff] }
 0x5b0   : > { %2399 = vmatprep.subr.bf16.mxu1 %v2235_v9  ;;  %v2246_v43 = vld [vmem:[#allocation3 + $0x5f0] sm:$0xff] }
 0x5b2   : > { %2359 = vmatpush1.bf16.msra.mxu0 %v2170_v11 }
 0x5b3   : > { %2400 = vmatpush1.bf16.msra.mxu1 %v2234_v36  ;;  %2360 = vmatprep.subr.bf16.mxu0 %v2175_v41 }
 0x5b4   : > { %2401 = vmatprep.subr.bf16.mxu1 %v2239_v38 }
 0x5b6   : > { %2361 = vmatpush1.bf16.msra.mxu0 %v2174_v40 }
 0x5b7   : > { %2402 = vmatpush1.bf16.msra.mxu1 %v2238_v12  ;;  %2362 = vmatprep.subr.bf16.mxu0 %v2179_v33 }
 0x5b8   : > { %2403 = vmatprep.subr.bf16.mxu1 %v2243_v30 }
 0x5ba   : > { %2363 = vmatpush1.bf16.msra.mxu0 %v2178_v45 }
 0x5bb   : > { %2404 = vmatpush1.bf16.msra.mxu1 %v2242_v35  ;;  %2364 = vmatprep.subr.bf16.mxu0 %v2183_v32 }
 0x5bc   : > { %2405 = vmatprep.subr.bf16.mxu1 %v2247_v23 }
 0x5be   : > { %2365 = vmatpush1.bf16.msra.mxu0 %v2182_v24 }
 0x5bf   : > { %2406 = vmatpush1.bf16.msra.mxu1 %v2246_v43  ;;  %2416 = vmatprep.subr.bf16.mxu0 %v4809_v44  ;;  %v5148_v44 = vld [vmem:[#allocation38_spill] sm:$0xff] }
 0x5c0   : > { %2457 = vmatprep.subr.bf16.mxu1 %v4813_v48  ;;  %v5150_v48 = vld [vmem:[#allocation37_spill] sm:$0xff] }
 0x5c1   : > { %2367 = vmatmul.mubr.bf16.vlgmr.msra.gmra.mrb[16].mxu0 %v4947_v25 }
 0x5c2   : > { %2408 = vmatmul.mubr.bf16.vlgmr.msra.gmra.mrb[24].mxu1 %v4951_v37  ;;  %2417 = vmatpush1.bf16.msra.mxu0 %v4807_v42  ;;  %v5147_v42 = vld [vmem:[#allocation36_spill] sm:$0xff] }
 0x5c3   : > { %2458 = vmatpush1.bf16.msra.mxu1 %v4811_v47  ;;  %2418 = vmatprep.subr.bf16.mxu0 %v4817_v50  ;;  %v5149_v47 = vld [vmem:[#allocation40_spill] sm:$0xff]  ;;  %v5152_v50 = vld [vmem:[#allocation42_spill] sm:$0xff] }
 0x5c4   : > { %2459 = vmatprep.subr.bf16.mxu1 %v4821_v7  ;;  %2448 = vmatprep.mubr.bf16.mxu0 %v4805_v46  ;;  %v5154_v7 = vld [vmem:[#allocation41_spill] sm:$0xff] }
 0x5c5   : > { %2489 = vmatprep.mubr.bf16.mxu1 %v4805_v46  ;;  %v5146_v46 = vld [vmem:[#allocation35_spill] sm:$0xff] }
 0x5c6   : > { %2419 = vmatpush1.bf16.msra.mxu0 %v4815_v49  ;;  %v5151_v49 = vld [vmem:[#allocation39_spill] sm:$0xff] }
 0x5c7   : > { %2460 = vmatpush1.bf16.msra.mxu1 %v4819_v51  ;;  %2420 = vmatprep.subr.bf16.mxu0 %v4825_v10  ;;  %v5153_v51 = vld [vmem:[#allocation44_spill] sm:$0xff]  ;;  %v5156_v10 = vld [vmem:[#allocation46_spill] sm:$0xff] }
 0x5c8   : > { %2461 = vmatprep.subr.bf16.mxu1 %v4829_v54  ;;  %v5158_v54 = vld [vmem:[#allocation45_spill] sm:$0xff] }
 0x5ca   : > { %2421 = vmatpush1.bf16.msra.mxu0 %v4823_v52  ;;  %v5155_v52 = vld [vmem:[#allocation43_spill] sm:$0xff] }
 0x5cb   : > { %2462 = vmatpush1.bf16.msra.mxu1 %v4827_v53  ;;  %2422 = vmatprep.subr.bf16.mxu0 %v4833_v56  ;;  %v5157_v53 = vld [vmem:[#allocation48_spill] sm:$0xff]  ;;  %v5160_v56 = vld [vmem:[#allocation50_spill] sm:$0xff] }
 0x5cc   : > { %2463 = vmatprep.subr.bf16.mxu1 %v4837_v62  ;;  %v5162_v62 = vld [vmem:[#allocation49_spill] sm:$0xff] }
 0x5ce   : > { %2423 = vmatpush1.bf16.msra.mxu0 %v4831_v55  ;;  %v5159_v55 = vld [vmem:[#allocation47_spill] sm:$0xff] }
 0x5cf   : > { %2464 = vmatpush1.bf16.msra.mxu1 %v4835_v57  ;;  %2424 = vmatprep.subr.bf16.mxu0 %v4841_v58  ;;  %v5161_v57 = vld [vmem:[#allocation52_spill] sm:$0xff]  ;;  %v5164_v58 = vld [vmem:[#allocation34_spill] sm:$0xff] }
 0x5d0   : > { %2465 = vmatprep.subr.bf16.mxu1 %v4845_v2 }
 0x5d2   : > { %2425 = vmatpush1.bf16.msra.mxu0 %v4839_v63  ;;  %v5163_v63 = vld [vmem:[#allocation51_spill] sm:$0xff] }
 0x5d3   : > { %2466 = vmatpush1.bf16.msra.mxu1 %v4843_v1  ;;  %2426 = vmatprep.subr.bf16.mxu0 %v4849_v4 }
 0x5d4   : > { %2467 = vmatprep.subr.bf16.mxu1 %v4853_v59 }
 0x5d6   : > { %2427 = vmatpush1.bf16.msra.mxu0 %v4847_v3 }
 0x5d7   : > { %2468 = vmatpush1.bf16.msra.mxu1 %v4851_v5  ;;  %2428 = vmatprep.subr.bf16.mxu0 %v4857_v8 }
 0x5d8   : > { %2469 = vmatprep.subr.bf16.mxu1 %v4861_v61 }
 0x5da   : > { %2429 = vmatpush1.bf16.msra.mxu0 %v4855_v6 }
 0x5db   : > { %2470 = vmatpush1.bf16.msra.mxu1 %v4859_v60  ;;  %2430 = vmatprep.subr.bf16.mxu0 %v4865_v14 }
 0x5dc   : > { %2471 = vmatprep.subr.bf16.mxu1 %v4869_v16 }
 0x5de   : > { %2431 = vmatpush1.bf16.msra.mxu0 %v4863_v13 }
 0x5df   : > { %2472 = vmatpush1.bf16.msra.mxu1 %v4867_v15  ;;  %2432 = vmatprep.subr.bf16.mxu0 %v4873_v18 }
 0x5e0   : > { %2473 = vmatprep.subr.bf16.mxu1 %v4877_v20 }
 0x5e2   : > { %2433 = vmatpush1.bf16.msra.mxu0 %v4871_v17 }
 0x5e3   : > { %2474 = vmatpush1.bf16.msra.mxu1 %v4875_v19  ;;  %2434 = vmatprep.subr.bf16.mxu0 %v4881_v21 }
 0x5e4   : > { %2475 = vmatprep.subr.bf16.mxu1 %v4885_v0 }
 0x5e6   : > { %2435 = vmatpush1.bf16.msra.mxu0 %v4879_v39 }
 0x5e7   : > { %2476 = vmatpush1.bf16.msra.mxu1 %v4883_v26  ;;  %2436 = vmatprep.subr.bf16.mxu0 %v4889_v28 }
 0x5e8   : > { %2477 = vmatprep.subr.bf16.mxu1 %v4893_v29 }
 0x5ea   : > { %2437 = vmatpush1.bf16.msra.mxu0 %v4887_v27 }
 0x5eb   : > { %2478 = vmatpush1.bf16.msra.mxu1 %v4891_v22  ;;  %2438 = vmatprep.subr.bf16.mxu0 %v4897_v31 }
 0x5ec   : > { %2479 = vmatprep.subr.bf16.mxu1 %v4901_v34 }
 0x5ee   : > { %2439 = vmatpush1.bf16.msra.mxu0 %v5146_v46 }
 0x5ef   : > { %2480 = vmatpush1.bf16.msra.mxu1 %v5147_v42  ;;  %2440 = vmatprep.subr.bf16.mxu0 %v5148_v44 }
 0x5f0   : > { %2481 = vmatprep.subr.bf16.mxu1 %v5149_v47 }
 0x5f2   : > { %2441 = vmatpush1.bf16.msra.mxu0 %v5150_v48 }
 0x5f3   : > { %2482 = vmatpush1.bf16.msra.mxu1 %v5151_v49  ;;  %2442 = vmatprep.subr.bf16.mxu0 %v5152_v50 }
 0x5f4   : > { %2483 = vmatprep.subr.bf16.mxu1 %v5153_v51 }
 0x5f6   : > { %2443 = vmatpush1.bf16.msra.mxu0 %v5154_v7 }
 0x5f7   : > { %2484 = vmatpush1.bf16.msra.mxu1 %v5155_v52  ;;  %2444 = vmatprep.subr.bf16.mxu0 %v5156_v10 }
 0x5f8   : > { %2485 = vmatprep.subr.bf16.mxu1 %v5157_v53 }
 0x5fa   : > { %2445 = vmatpush1.bf16.msra.mxu0 %v5158_v54 }
 0x5fb   : > { %2486 = vmatpush1.bf16.msra.mxu1 %v5159_v55  ;;  %2446 = vmatprep.subr.bf16.mxu0 %v5160_v56 }
 0x5fc   : > { %2487 = vmatprep.subr.bf16.mxu1 %v5161_v57 }
 0x5fe   : > { %2447 = vmatpush1.bf16.msra.mxu0 %v5162_v62 }
 0x5ff   : > { %2488 = vmatpush1.bf16.msra.mxu1 %v5163_v63 }
 0x601   : > { %2449 = vmatmul.mubr.bf16.vlgmr.msra.gmra.mrb[20].mxu0 %v5164_v58 }
 0x602   : > { %2490 = vmatmul.mubr.bf16.vlgmr.msra.gmra.mrb[28].mxu1 %v5164_v58 }
 0x654   : > { %v2286_v1 = vpop.f32.mrb[12].mxu0 }
 0x655   : > { %v2327_v2 = vpop.f32.mrb[20].mxu1  ;;  %v2288_v4 = vpop.f32.mrb[13].mxu0 }
 0x656   : > { %v2328_v3 = vadd.f32 %v2327_v2, %v2286_v1  ;;  %v2329_v5 = vpop.f32.mrb[21].mxu1  ;;  %v2290_v6 = vpop.f32.mrb[14].mxu0 }
 0x657   : > { %v2330_v59 = vadd.f32 %v2329_v5, %v2288_v4  ;;  %v2331_v8 = vpop.f32.mrb[22].mxu1  ;;  %v2291_v60 = vpop.f32.mrb[15].mxu0 }
 0x658   : > { %v2332_v61 = vpop.f32.mrb[23].mxu1 }
 0x694   : > { %v2368_v13 = vpop.f32.mrb[16].mxu0 }
 0x695   : > { %v2409_v14 = vpop.f32.mrb[24].mxu1  ;;  %v2370_v16 = vpop.f32.mrb[17].mxu0 }
 0x696   : > { %v2410_v15 = vadd.f32 %v2409_v14, %v2368_v13  ;;  %v2411_v17 = vpop.f32.mrb[25].mxu1  ;;  %v2372_v19 = vpop.f32.mrb[18].mxu0 }
 0x697   : > { %v2412_v18 = vadd.f32 %v2411_v17, %v2370_v16  ;;  %v2413_v20 = vpop.f32.mrb[26].mxu1  ;;  %v2373_v39 = vpop.f32.mrb[19].mxu0 }
 0x698   : > { %v2414_v21 = vpop.f32.mrb[27].mxu1 }
 0x6d4   : > { %v2450_v26 = vpop.f32.mrb[20].mxu0 }
 0x6d5   : > { %v2491_v0 = vpop.f32.mrb[28].mxu1  ;;  %v5027_v27 = vadd.f32 %v2450_v26, %v2328_v3  ;;  %v2452_v22 = vpop.f32.mrb[21].mxu0 }
 0x6d6   : > { %v5029_v28 = vadd.f32 %v2491_v0, %v2410_v15  ;;  %v2493_v29 = vpop.f32.mrb[29].mxu1  ;;  %v5031_v31 = vadd.f32 %v2452_v22, %v2330_v59  ;;  %v2454_v25 = vpop.f32.mrb[22].mxu0 }
 0x6d7   : > { %v5033_v34 = vadd.f32 %v2493_v29, %v2412_v18  ;;  %v2495_v37 = vpop.f32.mrb[30].mxu1  ;;  %v2455_v9 = vpop.f32.mrb[23].mxu0 }
 0x6d8   : > { %v2496_v11 = vpop.f32.mrb[31].mxu1 }
 0x6d9   : > { %4327 = dma.done.wait [#allocation4 + $0x3], 8192 }
 0x6da   : > { %4328 = vsyncadd [#allocation4 + $0x3], 4294959104  ;;  %v5165_v36 = vld [vmem:[#allocation31_spill] sm:$0xff]  ;;  %v2501_v38 = vld [vmem:[#allocation3 + $0x608] sm:$0xff] }
 0x6db   : > { %v2565_v41 = vpack.c.bf16 %v5165_v36, %v5165_v36  ;;  %v2500_v40 = vld [vmem:[#allocation3 + $0x600] sm:$0xff]  ;;  %v2505_v12 = vld [vmem:[#allocation3 + $0x628] sm:$0xff]  ;;  %2566 = vmatprep.subr.bf16.mxu0 %v2501_v38  ;;  %v2503_v32 = vld [vmem:[#allocation3 + $0x618] sm:$0xff] }
 0x6dc   : > { %2567 = vmatpush1.bf16.msra.mxu0 %v2500_v40  ;;  %v2504_v33 = vld [vmem:[#allocation3 + $0x620] sm:$0xff]  ;;  %v2509_v30 = vld [vmem:[#allocation3 + $0x648] sm:$0xff]  ;;  %2607 = vmatprep.subr.bf16.mxu1 %v2503_v32  ;;  %v2502_v24 = vld [vmem:[#allocation3 + $0x610] sm:$0xff] }
 0x6dd   : > { %2598 = vmatprep.mubr.bf16.mxu0 %v2565_v41  ;;  %2639 = vmatprep.mubr.bf16.mxu1 %v2565_v41  ;;  %v2508_v45 = vld [vmem:[#allocation3 + $0x640] sm:$0xff]  ;;  %v2513_v35 = vld [vmem:[#allocation3 + $0x668] sm:$0xff]  ;;  %v2507_v43 = vld [vmem:[#allocation3 + $0x638] sm:$0xff] }
 0x6de   : > { %2568 = vmatprep.subr.bf16.mxu0 %v2505_v12  ;;  %v2512_v23 = vld [vmem:[#allocation3 + $0x660] sm:$0xff]  ;;  %v2517_v46 = vld [vmem:[#allocation3 + $0x688] sm:$0xff]  ;;  %2608 = vmatpush1.bf16.msra.mxu1 %v2502_v24  ;;  %v2506_v42 = vld [vmem:[#allocation3 + $0x630] sm:$0xff] }
 0x6df   : > { %2609 = vmatprep.subr.bf16.mxu1 %v2507_v43  ;;  %v2511_v44 = vld [vmem:[#allocation3 + $0x658] sm:$0xff]  ;;  %v2516_v47 = vld [vmem:[#allocation3 + $0x680] sm:$0xff]  ;;  %v2521_v48 = vld [vmem:[#allocation3 + $0x6a8] sm:$0xff] }
 0x6e0   : > { %2569 = vmatpush1.bf16.msra.mxu0 %v2504_v33  ;;  %v2510_v49 = vld [vmem:[#allocation3 + $0x650] sm:$0xff]  ;;  %v2515_v50 = vld [vmem:[#allocation3 + $0x678] sm:$0xff]  ;;  %v2520_v51 = vld [vmem:[#allocation3 + $0x6a0] sm:$0xff] }
 0x6e1   : > { %2570 = vmatprep.subr.bf16.mxu0 %v2509_v30  ;;  %v2525_v7 = vld [vmem:[#allocation3 + $0x6c8] sm:$0xff]  ;;  %v2514_v52 = vld [vmem:[#allocation3 + $0x670] sm:$0xff]  ;;  %v2519_v10 = vld [vmem:[#allocation3 + $0x698] sm:$0xff] }
 0x6e2   : > { %2610 = vmatpush1.bf16.msra.mxu1 %v2506_v42  ;;  %v2524_v53 = vld [vmem:[#allocation3 + $0x6c0] sm:$0xff]  ;;  %v2529_v54 = vld [vmem:[#allocation3 + $0x6e8] sm:$0xff]  ;;  %v2518_v55 = vld [vmem:[#allocation3 + $0x690] sm:$0xff] }
 0x6e3   : > { %2611 = vmatprep.subr.bf16.mxu1 %v2511_v44  ;;  %v2523_v56 = vld [vmem:[#allocation3 + $0x6b8] sm:$0xff]  ;;  %v2528_v57 = vld [vmem:[#allocation3 + $0x6e0] sm:$0xff]  ;;  %v2533_v62 = vld [vmem:[#allocation3 + $0x708] sm:$0xff] }
 0x6e4   : > { %2571 = vmatpush1.bf16.msra.mxu0 %v2508_v45  ;;  %v2522_v63 = vld [vmem:[#allocation3 + $0x6b0] sm:$0xff]  ;;  %v2527_v58 = vld [vmem:[#allocation3 + $0x6d8] sm:$0xff]  ;;  %v2532_v1 = vld [vmem:[#allocation3 + $0x700] sm:$0xff] }
 0x6e5   : > { %2572 = vmatprep.subr.bf16.mxu0 %v2513_v35  ;;  %v2537_v2 = vld [vmem:[#allocation3 + $0x728] sm:$0xff]  ;;  %v2526_v3 = vld [vmem:[#allocation3 + $0x6d0] sm:$0xff]  ;;  %v2531_v4 = vld [vmem:[#allocation3 + $0x6f8] sm:$0xff] }
 0x6e6   : > { %2612 = vmatpush1.bf16.msra.mxu1 %v2510_v49  ;;  %v2536_v5 = vld [vmem:[#allocation3 + $0x720] sm:$0xff]  ;;  %v2541_v59 = vld [vmem:[#allocation3 + $0x748] sm:$0xff]  ;;  %v2530_v8 = vld [vmem:[#allocation3 + $0x6f0] sm:$0xff] }
 0x6e7   : > { %2613 = vmatprep.subr.bf16.mxu1 %v2515_v50  ;;  %v2540_v6 = vld [vmem:[#allocation3 + $0x740] sm:$0xff]  ;;  %v2545_v60 = vld [vmem:[#allocation3 + $0x768] sm:$0xff]  ;;  %v2535_v61 = vld [vmem:[#allocation3 + $0x718] sm:$0xff] }
 0x6e8   : > { %2573 = vmatpush1.bf16.msra.mxu0 %v2512_v23  ;;  %v2534_v13 = vld [vmem:[#allocation3 + $0x710] sm:$0xff]  ;;  %v2539_v14 = vld [vmem:[#allocation3 + $0x738] sm:$0xff]  ;;  %v2544_v15 = vld [vmem:[#allocation3 + $0x760] sm:$0xff] }
 0x6e9   : > { %2574 = vmatprep.subr.bf16.mxu0 %v2517_v46  ;;  %v2549_v16 = vld [vmem:[#allocation3 + $0x788] sm:$0xff]  ;;  %v2538_v17 = vld [vmem:[#allocation3 + $0x730] sm:$0xff]  ;;  %v2543_v18 = vld [vmem:[#allocation3 + $0x758] sm:$0xff] }
 0x6ea   : > { %2614 = vmatpush1.bf16.msra.mxu1 %v2514_v52  ;;  %v2548_v19 = vld [vmem:[#allocation3 + $0x780] sm:$0xff]  ;;  %v2553_v20 = vld [vmem:[#allocation3 + $0x7a8] sm:$0xff]  ;;  %v2542_v39 = vld [vmem:[#allocation3 + $0x750] sm:$0xff] }
 0x6eb   : > { %2615 = vmatprep.subr.bf16.mxu1 %v2519_v10  ;;  %v2547_v21 = vld [vmem:[#allocation3 + $0x778] sm:$0xff]  ;;  %v2552_v26 = vld [vmem:[#allocation3 + $0x7a0] sm:$0xff]  ;;  %v2557_v0 = vld [vmem:[#allocation3 + $0x7c8] sm:$0xff] }
 0x6ec   : > { %2575 = vmatpush1.bf16.msra.mxu0 %v2516_v47  ;;  %v2546_v22 = vld [vmem:[#allocation3 + $0x770] sm:$0xff]  ;;  %v2551_v29 = vld [vmem:[#allocation3 + $0x798] sm:$0xff]  ;;  %v2556_v25 = vld [vmem:[#allocation3 + $0x7c0] sm:$0xff] }
 0x6ed   : > { %2576 = vmatprep.subr.bf16.mxu0 %v2521_v48  ;;  %v2561_v37 = vld [vmem:[#allocation3 + $0x7e8] sm:$0xff]  ;;  %v2550_v9 = vld [vmem:[#allocation3 + $0x790] sm:$0xff]  ;;  %v2555_v11 = vld [vmem:[#allocation3 + $0x7b8] sm:$0xff] }
 0x6ee   : > { %2616 = vmatpush1.bf16.msra.mxu1 %v2518_v55  ;;  %v2560_v36 = vld [vmem:[#allocation3 + $0x7e0] sm:$0xff]  ;;  %v2554_v38 = vld [vmem:[#allocation3 + $0x7b0] sm:$0xff]  ;;  %v2559_v33 = vld [vmem:[#allocation3 + $0x7d8] sm:$0xff] }
 0x6ef   : > { %2617 = vmatprep.subr.bf16.mxu1 %v2523_v56  ;;  %v4059_v41 = vld [vmem:[#allocation9 + $0x304] ss:$8 sps:$4 sm:$0xff]   ;;  %v5166_v40 = vld [vmem:[#allocation30_spill] sm:$0xff]  ;;  %v4057_v30 = vld [vmem:[#allocation9 + $0x300] ss:$8 sps:$4 sm:$0xff]  }
 0x6f0   : > { %2577 = vmatpush1.bf16.msra.mxu0 %v2520_v51  ;;  %v2564_v12 = vpack.c.bf16 %v5166_v40, %v5166_v40  ;;  %v4062_v45 = vld [vmem:[#allocation9 + $0x314] ss:$8 sps:$4 sm:$0xff]   ;;  %v4060_v23 = vld [vmem:[#allocation9 + $0x310] ss:$8 sps:$4 sm:$0xff]   ;;  %v4065_v24 = vld [vmem:[#allocation9 + $0x324] ss:$8 sps:$4 sm:$0xff]  }
 0x6f1   : > { %2578 = vmatprep.subr.bf16.mxu0 %v2525_v7  ;;  %v2558_v35 = vld [vmem:[#allocation3 + $0x7d0] sm:$0xff]  ;;  %v2563_v32 = vld [vmem:[#allocation3 + $0x7f8] sm:$0xff]  ;;  %v4063_v46 = vld [vmem:[#allocation9 + $0x320] ss:$8 sps:$4 sm:$0xff]  }
 0x6f2   : > { %2618 = vmatpush1.bf16.msra.mxu1 %v2522_v63  ;;  %v2562_v43 = vld [vmem:[#allocation3 + $0x7f0] sm:$0xff]  ;;  %v4071_v47 = vld [vmem:[#allocation9 + $0x344] ss:$8 sps:$4 sm:$0xff]   ;;  %v4069_v48 = vld [vmem:[#allocation9 + $0x340] ss:$8 sps:$4 sm:$0xff]  }
 0x6f3   : > { %2619 = vmatprep.subr.bf16.mxu1 %v2527_v58  ;;  %v4068_v42 = vld [vmem:[#allocation9 + $0x334] ss:$8 sps:$4 sm:$0xff]   ;;  %v4066_v44 = vld [vmem:[#allocation9 + $0x330] ss:$8 sps:$4 sm:$0xff]   ;;  %v4077_v51 = vld [vmem:[#allocation9 + $0x364] ss:$8 sps:$4 sm:$0xff]  }
 0x6f4   : > { %2579 = vmatpush1.bf16.msra.mxu0 %v2524_v53  ;;  %v4074_v49 = vld [vmem:[#allocation9 + $0x354] ss:$8 sps:$4 sm:$0xff]   ;;  %v4072_v50 = vld [vmem:[#allocation9 + $0x350] ss:$8 sps:$4 sm:$0xff]   ;;  %v4075_v7 = vld [vmem:[#allocation9 + $0x360] ss:$8 sps:$4 sm:$0xff]  }
 0x6f5   : > { %2580 = vmatprep.subr.bf16.mxu0 %v2529_v54  ;;  %v4080_v52 = vld [vmem:[#allocation9 + $0x374] ss:$8 sps:$4 sm:$0xff]   ;;  %v4078_v10 = vld [vmem:[#allocation9 + $0x370] ss:$8 sps:$4 sm:$0xff]   ;;  %v4083_v53 = vld [vmem:[#allocation9 + $0x384] ss:$8 sps:$4 sm:$0xff]  }
 0x6f6   : > { %2620 = vmatpush1.bf16.msra.mxu1 %v2526_v3  ;;  %v4081_v54 = vld [vmem:[#allocation9 + $0x380] ss:$8 sps:$4 sm:$0xff]   ;;  %v4086_v55 = vld [vmem:[#allocation9 + $0x394] ss:$8 sps:$4 sm:$0xff]   ;;  %v4084_v56 = vld [vmem:[#allocation9 + $0x390] ss:$8 sps:$4 sm:$0xff]  }
 0x6f7   : > { %2621 = vmatprep.subr.bf16.mxu1 %v2531_v4  ;;  %v4092_v63 = vld [vmem:[#allocation9 + $0x3b4] ss:$8 sps:$4 sm:$0xff]   ;;  %v4090_v58 = vld [vmem:[#allocation9 + $0x3b0] ss:$8 sps:$4 sm:$0xff]   ;;  %v5170_v40 = vld [vmem:[#allocation32_spill] sm:$0xff] }
 0x6f8   : > { %2581 = vmatpush1.bf16.msra.mxu0 %v2528_v57  ;;  %v4089_v57 = vld [vmem:[#allocation9 + $0x3a4] ss:$8 sps:$4 sm:$0xff]   ;;  %v4098_v3 = vld [vmem:[#allocation9 + $0x3d4] ss:$8 sps:$4 sm:$0xff]   ;;  %v4096_v4 = vld [vmem:[#allocation9 + $0x3d0] ss:$8 sps:$4 sm:$0xff]  }
 0x6f9   : > { %2582 = vmatprep.subr.bf16.mxu0 %v2533_v62  ;;  %v4087_v62 = vld [vmem:[#allocation9 + $0x3a0] ss:$8 sps:$4 sm:$0xff]  }
 0x6fa   : > { %2622 = vmatpush1.bf16.msra.mxu1 %v2530_v8  ;;  %v4102_v8 = vld [vmem:[#allocation9 + $0x3f0] ss:$8 sps:$4 sm:$0xff]  }
 0x6fb   : > { %2623 = vmatprep.subr.bf16.mxu1 %v2535_v61  ;;  %v2652_v61 = vld [vmem:[%s5091_s5 + $0x20] sm:$0xf] }
 0x6fc   : > { %2583 = vmatpush1.bf16.msra.mxu0 %v2532_v1  ;;  %v4095_v1 = vld [vmem:[#allocation9 + $0x3c4] ss:$8 sps:$4 sm:$0xff]  }
 0x6fd   : > { %2584 = vmatprep.subr.bf16.mxu0 %v2537_v2  ;;  %v4093_v2 = vld [vmem:[#allocation9 + $0x3c0] ss:$8 sps:$4 sm:$0xff]  }
 0x6fe   : > { %2624 = vmatpush1.bf16.msra.mxu1 %v2534_v13  ;;  %v5167_v13 = vld [vmem:[#allocation28_spill] sm:$0xff] }
 0x6ff   : > { %2625 = vmatprep.subr.bf16.mxu1 %v2539_v14  ;;  %v2657_v14 = vrot.slane %v2652_v61, %v5167_v13 }
 0x700   : > { %2585 = vmatpush1.bf16.msra.mxu0 %v2536_v5  ;;  %v4101_v5 = vld [vmem:[#allocation9 + $0x3e4] ss:$8 sps:$4 sm:$0xff]  }
 0x701   : > { %2586 = vmatprep.subr.bf16.mxu0 %v2541_v59  ;;  %v4099_v59 = vld [vmem:[#allocation9 + $0x3e0] ss:$8 sps:$4 sm:$0xff]  }
 0x702   : > { %2626 = vmatpush1.bf16.msra.mxu1 %v2538_v17 }
 0x703   : > { %2627 = vmatprep.subr.bf16.mxu1 %v2543_v18 }
 0x704   : > { %2587 = vmatpush1.bf16.msra.mxu0 %v2540_v6  ;;  %v4104_v6 = vld [vmem:[#allocation9 + $0x3f4] ss:$8 sps:$4 sm:$0xff]  }
 0x705   : > { %2588 = vmatprep.subr.bf16.mxu0 %v2545_v60  ;;  %v4107_v60 = vld [vmem:[#allocation9 + $0x404] ss:$8 sps:$4 sm:$0xff]  }
 0x706   : > { %2628 = vmatpush1.bf16.msra.mxu1 %v2542_v39 }
 0x707   : > { %2629 = vmatprep.subr.bf16.mxu1 %v2547_v21 }
 0x708   : > { %2589 = vmatpush1.bf16.msra.mxu0 %v2544_v15 }
 0x709   : > { %2590 = vmatprep.subr.bf16.mxu0 %v2549_v16  ;;  %v5168_v16 = vld [vmem:[#allocation29_spill] sm:$0xff] }
 0x70a   : > { %2630 = vmatpush1.bf16.msra.mxu1 %v2546_v22  ;;  %v2661_v17 = vrot.slane %v2652_v61, %v5168_v16 }
 0x70b   : > { %2631 = vmatprep.subr.bf16.mxu1 %v2551_v29 }
 0x70c   : > { %2591 = vmatpush1.bf16.msra.mxu0 %v2548_v19 }
 0x70d   : > { %2592 = vmatprep.subr.bf16.mxu0 %v2553_v20 }
 0x70e   : > { %2632 = vmatpush1.bf16.msra.mxu1 %v2550_v9  ;;  %v5169_v9 = vld [vmem:[#allocation33_spill] sm:$0xff] }
 0x70f   : > { %2633 = vmatprep.subr.bf16.mxu1 %v2555_v11  ;;  %v2665_v11 = vrot.slane %v2652_v61, %v5169_v9  ;;  %v4164_v9 = vld [vmem:[#allocation10 + $0x28] sm:$0xff]  }
 0x710   : > { %2593 = vmatpush1.bf16.msra.mxu0 %v2552_v26 }
 0x711   : > { %2594 = vmatprep.subr.bf16.mxu0 %v2557_v0 }
 0x712   : > { %2634 = vmatpush1.bf16.msra.mxu1 %v2554_v38 }
 0x713   : > { %2635 = vmatprep.subr.bf16.mxu1 %v2559_v33 }
 0x714   : > { %2595 = vmatpush1.bf16.msra.mxu0 %v2556_v25 }
 0x715   : > { %2596 = vmatprep.subr.bf16.mxu0 %v2561_v37 }
 0x716   : > { %2636 = vmatpush1.bf16.msra.mxu1 %v2558_v35 }
 0x717   : > { %2637 = vmatprep.subr.bf16.mxu1 %v2563_v32 }
 0x718   : > { %2597 = vmatpush1.bf16.msra.mxu0 %v2560_v36 }
 0x719   : > { %3086 = vmatprep.subr.bf16.mxu0 %v4059_v41  ;;  %v4105_v41 = vld [vmem:[#allocation9 + $0x400] ss:$8 sps:$4 sm:$0xff]  }
 0x71a   : > { %2638 = vmatpush1.bf16.msra.mxu1 %v2562_v43 }
 0x71b   : > { %2599 = vmatmul.mubr.bf16.vlgmr.msra.gmra.mrb[24].mxu0 %v2564_v12 }
 0x71c   : > { %3087 = vmatpush1.bf16.msra.mxu0 %v4057_v30 }
 0x71d   : > { %3088 = vmatprep.subr.bf16.mxu0 %v4062_v45  ;;  %2640 = vmatmul.mubr.bf16.vlgmr.msra.gmra.mrb[32].mxu1 %v2564_v12  ;;  %v2669_v12 = vrot.slane %v2652_v61, %v5170_v40  ;;  %v4152_v61 = vld [vmem:[#allocation9 + $0x4f4] ss:$8 sps:$4 sm:$0xff]   ;;  %v2754_v40 = vld [vmem:[%s5091_s5 + $0x24] sm:$0x3] }
 0x720   : > { %3089 = vmatpush1.bf16.msra.mxu0 %v4060_v23 }
 0x721   : > { %3090 = vmatprep.subr.bf16.mxu0 %v4065_v24  ;;  %v4108_v24 = vld [vmem:[#allocation9 + $0x410] ss:$8 sps:$4 sm:$0xff]  }
 0x724   : > { %3091 = vmatpush1.bf16.msra.mxu0 %v4063_v46  ;;  %v4113_v46 = vld [vmem:[#allocation9 + $0x424] ss:$8 sps:$4 sm:$0xff]  }
 0x725   : > { %3092 = vmatprep.subr.bf16.mxu0 %v4068_v42 }
 0x728   : > { %3093 = vmatpush1.bf16.msra.mxu0 %v4066_v44  ;;  %v4111_v44 = vld [vmem:[#allocation9 + $0x420] ss:$8 sps:$4 sm:$0xff]  }
 0x729   : > { %3094 = vmatprep.subr.bf16.mxu0 %v4071_v47 }
 0x72c   : > { %3095 = vmatpush1.bf16.msra.mxu0 %v4069_v48 }
 0x72d   : > { %3096 = vmatprep.subr.bf16.mxu0 %v4074_v49  ;;  %v4114_v49 = vld [vmem:[#allocation9 + $0x430] ss:$8 sps:$4 sm:$0xff]  }
 0x730   : > { %3097 = vmatpush1.bf16.msra.mxu0 %v4072_v50  ;;  %v4117_v50 = vld [vmem:[#allocation9 + $0x440] ss:$8 sps:$4 sm:$0xff]  }
 0x731   : > { %3098 = vmatprep.subr.bf16.mxu0 %v4077_v51  ;;  %v4122_v51 = vld [vmem:[#allocation9 + $0x454] ss:$8 sps:$4 sm:$0xff]  }
 0x734   : > { %3099 = vmatpush1.bf16.msra.mxu0 %v4075_v7  ;;  %v4120_v7 = vld [vmem:[#allocation9 + $0x450] ss:$8 sps:$4 sm:$0xff]  }
 0x735   : > { %3100 = vmatprep.subr.bf16.mxu0 %v4080_v52  ;;  %v4125_v52 = vld [vmem:[#allocation9 + $0x464] ss:$8 sps:$4 sm:$0xff]  }
 0x738   : > { %3101 = vmatpush1.bf16.msra.mxu0 %v4078_v10  ;;  %v4123_v10 = vld [vmem:[#allocation9 + $0x460] ss:$8 sps:$4 sm:$0xff]  }
 0x739   : > { %3102 = vmatprep.subr.bf16.mxu0 %v4083_v53  ;;  %v4128_v53 = vld [vmem:[#allocation9 + $0x474] ss:$8 sps:$4 sm:$0xff]  }
 0x73c   : > { %3103 = vmatpush1.bf16.msra.mxu0 %v4081_v54  ;;  %v4126_v54 = vld [vmem:[#allocation9 + $0x470] ss:$8 sps:$4 sm:$0xff]  }
 0x73d   : > { %3104 = vmatprep.subr.bf16.mxu0 %v4086_v55  ;;  %v4131_v55 = vld [vmem:[#allocation9 + $0x484] ss:$8 sps:$4 sm:$0xff]  }
 0x740   : > { %3105 = vmatpush1.bf16.msra.mxu0 %v4084_v56  ;;  %v4129_v56 = vld [vmem:[#allocation9 + $0x480] ss:$8 sps:$4 sm:$0xff]  }
 0x741   : > { %3106 = vmatprep.subr.bf16.mxu0 %v4089_v57  ;;  %v4134_v57 = vld [vmem:[#allocation9 + $0x494] ss:$8 sps:$4 sm:$0xff]  }
 0x744   : > { %3107 = vmatpush1.bf16.msra.mxu0 %v4087_v62  ;;  %v4132_v62 = vld [vmem:[#allocation9 + $0x490] ss:$8 sps:$4 sm:$0xff]  }
 0x745   : > { %3108 = vmatprep.subr.bf16.mxu0 %v4092_v63  ;;  %v4137_v63 = vld [vmem:[#allocation9 + $0x4a4] ss:$8 sps:$4 sm:$0xff]  }
 0x748   : > { %3109 = vmatpush1.bf16.msra.mxu0 %v4090_v58  ;;  %v4135_v58 = vld [vmem:[#allocation9 + $0x4a0] ss:$8 sps:$4 sm:$0xff]  }
 0x749   : > { %3110 = vmatprep.subr.bf16.mxu0 %v4095_v1  ;;  %v4140_v1 = vld [vmem:[#allocation9 + $0x4b4] ss:$8 sps:$4 sm:$0xff]  }
 0x74c   : > { %3111 = vmatpush1.bf16.msra.mxu0 %v4093_v2  ;;  %v4138_v2 = vld [vmem:[#allocation9 + $0x4b0] ss:$8 sps:$4 sm:$0xff]  }
 0x74d   : > { %3112 = vmatprep.subr.bf16.mxu0 %v4098_v3  ;;  %v4143_v3 = vld [vmem:[#allocation9 + $0x4c4] ss:$8 sps:$4 sm:$0xff]  }
 0x750   : > { %3113 = vmatpush1.bf16.msra.mxu0 %v4096_v4  ;;  %v4141_v4 = vld [vmem:[#allocation9 + $0x4c0] ss:$8 sps:$4 sm:$0xff]  }
 0x751   : > { %3114 = vmatprep.subr.bf16.mxu0 %v4101_v5  ;;  %v4146_v5 = vld [vmem:[#allocation9 + $0x4d4] ss:$8 sps:$4 sm:$0xff]  }
 0x754   : > { %3115 = vmatpush1.bf16.msra.mxu0 %v4099_v59  ;;  %v4144_v59 = vld [vmem:[#allocation9 + $0x4d0] ss:$8 sps:$4 sm:$0xff]  }
 0x755   : > { %3116 = vmatprep.subr.bf16.mxu0 %v4104_v6  ;;  %v4149_v6 = vld [vmem:[#allocation9 + $0x4e4] ss:$8 sps:$4 sm:$0xff]  }
 0x758   : > { %3117 = vmatpush1.bf16.msra.mxu0 %v4102_v8  ;;  %v4147_v8 = vld [vmem:[#allocation9 + $0x4e0] ss:$8 sps:$4 sm:$0xff]  }
 0x759   : > { %3127 = vmatprep.subr.bf16.mxu0 %v4107_v60 }
 0x7ee   : > { %v2600_v15 = vpop.f32.mrb[24].mxu0 }
 0x7ef   : > { %v2648_v18 = vadd.f32 %v2600_v15, %v5027_v27  ;;  %v2602_v19 = vpop.f32.mrb[25].mxu0  ;;  %v4110_v27 = vld [vmem:[#allocation9 + $0x414] ss:$8 sps:$4 sm:$0xff]  }
 0x7f0   : > { %v2649_v20 = vadd.f32 %v2602_v19, %v5031_v31  ;;  %v2604_v39 = vpop.f32.mrb[26].mxu0  ;;  %v2641_v38 = vpop.f32.mrb[32].mxu1  ;;  %v4154_v19 = vld [vmem:[#allocation10] sm:$0xff]  }
 0x7f1   : > { %v2674_v21 = vadd.f32 %v2657_v14, %v2648_v18  ;;  %v2605_v26 = vpop.f32.mrb[27].mxu0  ;;  %v2650_v30 = vadd.f32 %v2641_v38, %v5029_v28  ;;  %v2643_v31 = vpop.f32.mrb[33].mxu1  ;;  %v4116_v28 = vld [vmem:[#allocation9 + $0x434] ss:$8 sps:$4 sm:$0xff]   ;;  %v4150_v14 = vld [vmem:[#allocation9 + $0x4f0] ss:$8 sps:$4 sm:$0xff]  }
 0x7f2   : > { %v2675_v0 = vadd.f32 %v2661_v17, %v2649_v20  ;;  %v2651_v45 = vadd.f32 %v2643_v31, %v5033_v34  ;;  %v2645_v35 = vpop.f32.mrb[34].mxu1  ;;  %v4119_v34 = vld [vmem:[#allocation9 + $0x444] ss:$8 sps:$4 sm:$0xff]   ;;  %v4158_v26 = vld [vmem:[#allocation10 + $0x10] sm:$0xff]   ;;  %v4168_v38 = vld [vmem:[#allocation10 + $0x38] sm:$0xff]  }
 0x7f3   : > { %v2678_v22 = vmul.f32 0.2, %v2674_v21  ;;  %v5050_v32 = vadd.f32 %v2665_v11, %v2650_v30  ;;  %v2646_v23 = vpop.f32.mrb[35].mxu1  ;;  %v4153_v18 = vld [vmem:[#allocation10 + $0x40] sm:$0xff]   ;;  %v4155_v20 = vld [vmem:[#allocation10 + $0x48] sm:$0xff]   ;;  %v4165_v11 = vld [vmem:[#allocation10 + $0x70] sm:$0xff]  }
 0x7f4   : > { %v2679_v29 = vmul.f32 0.2, %v2675_v0  ;;  %v2677_v43 = vadd.f32 %v2669_v12, %v2651_v45  ;;  %3769 = vmatprep.subr.bf16.mxu1 %v4153_v18  ;;  %v4156_v39 = vld [vmem:[#allocation10 + $0x8] sm:$0xff]   ;;  %v2759_v12 = vrot.slane %v2754_v40, %v5167_v13 }
 0x7f5   : > { %v2682_v25 = vmax.f32 %v2674_v21, %v2678_v22  ;;  %v2680_v60 = vmul.f32 0.2, %v5050_v32  ;;  %3770 = vmatpush3.bf16.msra.mxu1 %v4154_v19  ;;  %v4157_v21 = vld [vmem:[#allocation10 + $0x50] sm:$0xff]   ;;  %v4160_v22 = vld [vmem:[#allocation10 + $0x18] sm:$0xff]  }
 0x7f6   : > { %v2683_v37 = vmax.f32 %v2675_v0, %v2679_v29  ;;  %v2681_v42 = vmul.f32 0.2, %v2677_v43  ;;  %3771 = vmatprep.subr.bf16.mxu1 %v4155_v20  ;;  %v4159_v0 = vld [vmem:[#allocation10 + $0x58] sm:$0xff]   ;;  %v4161_v29 = vld [vmem:[#allocation10 + $0x60] sm:$0xff]  }
 0x7f7   : > { %v2750_v33 = vpack.c.bf16 %v2682_v25, %v2682_v25  ;;  %v2684_v15 = vmax.f32 %v5050_v32, %v2680_v60  ;;  %v4162_v25 = vld [vmem:[#allocation10 + $0x20] sm:$0xff]  }
 0x7f8   : > { %v2751_v36 = vpack.c.bf16 %v2683_v37, %v2683_v37  ;;  %v2685_v47 = vmax.f32 %v2677_v43, %v2681_v42  ;;  %v4163_v37 = vld [vmem:[#allocation10 + $0x68] sm:$0xff]  }
 0x7f9   : > { %v2752_v17 = vpack.c.bf16 %v2684_v15, %v2684_v15  ;;  %3772 = vmatpush3.bf16.msra.mxu1 %v4156_v39  ;;  %v3169_v15 = vld [vmem:[%s5091_s5 + $0x28] sm:$0x3] }
 0x7fa   : > { %3118 = vmatprep.mubr.bf16.mxu0 %v2751_v36  ;;  %v2753_v48 = vpack.c.bf16 %v2685_v47, %v2685_v47  ;;  %3773 = vmatprep.subr.bf16.mxu1 %v4157_v21  ;;  %v4166_v36 = vld [vmem:[#allocation10 + $0x30] sm:$0xff]   ;;  %v3225_v21 = vrot.slane %v3169_v15, %v5167_v13 }
 0x7fb   : > { %3119 = vmatmul.mubr.bf16.vlgmr.msra.gmra.mrb[28].mxu0 %v2750_v33  ;;  %v2763_v33 = vrot.slane %v2754_v40, %v5168_v16 }
 0x7fc   : > { %3128 = vmatpush1.bf16.msra.mxu0 %v4105_v41  ;;  %3159 = vmatprep.mubr.bf16.mxu0 %v2753_v48  ;;  %v4167_v41 = vld [vmem:[#allocation10 + $0x78] sm:$0xff]  }
 0x7fd   : > { %3129 = vmatprep.subr.bf16.mxu0 %v4110_v27  ;;  %3774 = vmatpush3.bf16.msra.mxu1 %v4158_v26 }
 0x7fe   : > { %3775 = vmatprep.subr.bf16.mxu1 %v4159_v0  ;;  %v3229_v0 = vrot.slane %v3169_v15, %v5168_v16 }
 0x800   : > { %3130 = vmatpush1.bf16.msra.mxu0 %v4108_v24 }
 0x801   : > { %3131 = vmatprep.subr.bf16.mxu0 %v4113_v46  ;;  %3776 = vmatpush3.bf16.msra.mxu1 %v4160_v22 }
 0x802   : > { %3777 = vmatprep.subr.bf16.mxu1 %v4161_v29 }
 0x804   : > { %3132 = vmatpush1.bf16.msra.mxu0 %v4111_v44 }
 0x805   : > { %3133 = vmatprep.subr.bf16.mxu0 %v4116_v28  ;;  %3778 = vmatpush3.bf16.msra.mxu1 %v4162_v25 }
 0x806   : > { %3779 = vmatprep.subr.bf16.mxu1 %v4163_v37 }
 0x808   : > { %3134 = vmatpush1.bf16.msra.mxu0 %v4114_v49 }
 0x809   : > { %3135 = vmatprep.subr.bf16.mxu0 %v4119_v34  ;;  %3780 = vmatpush3.bf16.msra.mxu1 %v4164_v9 }
 0x80a   : > { %3781 = vmatprep.subr.bf16.mxu1 %v4165_v11 }
 0x80c   : > { %3136 = vmatpush1.bf16.msra.mxu0 %v4117_v50 }
 0x80d   : > { %3137 = vmatprep.subr.bf16.mxu0 %v4122_v51  ;;  %3782 = vmatpush3.bf16.msra.mxu1 %v4166_v36 }
 0x80e   : > { %3783 = vmatprep.subr.bf16.mxu1 %v4167_v41 }
 0x810   : > { %3138 = vmatpush1.bf16.msra.mxu0 %v4120_v7 }
 0x811   : > { %3139 = vmatprep.subr.bf16.mxu0 %v4125_v52  ;;  %3784 = vmatpush3.bf16.msra.mxu1 %v4168_v38 }
 0x814   : > { %3140 = vmatpush1.bf16.msra.mxu0 %v4123_v10 }
 0x815   : > { %3141 = vmatprep.subr.bf16.mxu0 %v4128_v53 }
 0x818   : > { %3142 = vmatpush1.bf16.msra.mxu0 %v4126_v54 }
 0x819   : > { %3143 = vmatprep.subr.bf16.mxu0 %v4131_v55 }
 0x81c   : > { %3144 = vmatpush1.bf16.msra.mxu0 %v4129_v56 }
 0x81d   : > { %3145 = vmatprep.subr.bf16.mxu0 %v4134_v57 }
 0x820   : > { %3146 = vmatpush1.bf16.msra.mxu0 %v4132_v62 }
 0x821   : > { %3147 = vmatprep.subr.bf16.mxu0 %v4137_v63 }
 0x824   : > { %3148 = vmatpush1.bf16.msra.mxu0 %v4135_v58 }
 0x825   : > { %3149 = vmatprep.subr.bf16.mxu0 %v4140_v1 }
 0x828   : > { %3150 = vmatpush1.bf16.msra.mxu0 %v4138_v2 }
 0x829   : > { %3151 = vmatprep.subr.bf16.mxu0 %v4143_v3 }
 0x82c   : > { %3152 = vmatpush1.bf16.msra.mxu0 %v4141_v4 }
 0x82d   : > { %3153 = vmatprep.subr.bf16.mxu0 %v4146_v5 }
 0x830   : > { %3154 = vmatpush1.bf16.msra.mxu0 %v4144_v59 }
 0x831   : > { %3155 = vmatprep.subr.bf16.mxu0 %v4149_v6 }
 0x834   : > { %3156 = vmatpush1.bf16.msra.mxu0 %v4147_v8 }
 0x835   : > { %3157 = vmatprep.subr.bf16.mxu0 %v4152_v61 }
 0x838   : > { %3158 = vmatpush1.bf16.msra.mxu0 %v4150_v14  ;;  %v3168_v14 = vld [vmem:[%s5091_s5 + $0x26] sm:$0x3] }
 0x839   : > { %v3216_v19 = vrot.slane %v3168_v14, %v5168_v16 }
 0x83b   : > { %3160 = vmatmul.mubr.bf16.vlgmr.msra.gmra.mrb[28].mxu0 %v2752_v17  ;;  %v3212_v17 = vrot.slane %v3168_v14, %v5167_v13  ;;  %v3746_v13 = vld [vmem:[%s5091_s5 + $0x2a] ss:$0 sm:$0xff] }
 0x90e   : > { %v3161_v27 = vpop.f32.mrb[28].mxu0 }
 0x90f   : > { %v3795_v30 = vadd.f32 %v3161_v27, %v2759_v12  ;;  %v3163_v31 = vpop.f32.mrb[29].mxu0 }
 0x910   : > { %v3796_v45 = vadd.f32 %v3163_v31, %v2763_v33  ;;  %v3165_v35 = vpop.f32.mrb[30].mxu0 }
 0x911   : > { %v3170_v32 = vrot.slane %v3795_v30, 4  ;;  %v3166_v23 = vpop.f32.mrb[31].mxu0 }
 0x912   : > { %v3176_v24 = vrot.slane %v3796_v45, 4 }
 0x913   : > { %v3171_v43 = vadd.f32 %v3795_v30, %v3170_v32 }
 0x914   : > { %v3177_v46 = vadd.f32 %v3796_v45, %v3176_v24 }
 0x915   : > { %v3172_v42 = vrot.slane %v3171_v43, 2 }
 0x916   : > { %v3178_v44 = vrot.slane %v3177_v46, 2 }
 0x917   : > { %v3173_v47 = vadd.f32 %v3172_v42, %v3171_v43 }
 0x918   : > { %v3179_v28 = vadd.f32 %v3178_v44, %v3177_v46 }
 0x919   : > { %v3174_v48 = vrot.slane %v3173_v47, 1 }
 0x91a   : > { %v3180_v49 = vrot.slane %v3179_v28, 1 }
 0x91b   : > { %v3175_v34 = vadd.f32 %v3174_v48, %v3173_v47 }
 0x91c   : > { %v3181_v50 = vadd.f32 %v3180_v49, %v3179_v28 }
 0x91d   : > { %v3182_v51 = vmul.f32 0.125, %v3175_v34 }
 0x91e   : > { %v3183_v7 = vmul.f32 0.125, %v3181_v50 }
 0x91f   : > { %v3184_v52 = vsub.f32 %v3795_v30, %v3182_v51 }
 0x920   : > { %v3185_v10 = vsub.f32 %v3796_v45, %v3183_v7 }
 0x921   : > { %v3186_v53 = vmul.f32 %v3184_v52, %v3184_v52 }
 0x922   : > { %v3187_v54 = vmul.f32 %v3185_v10, %v3185_v10 }
 0x923   : > { %v3188_v55 = vrot.slane %v3186_v53, 4 }
 0x924   : > { %v3194_v56 = vrot.slane %v3187_v54, 4 }
 0x925   : > { %v3189_v57 = vadd.f32 %v3188_v55, %v3186_v53 }
 0x926   : > { %v3195_v62 = vadd.f32 %v3194_v56, %v3187_v54 }
 0x927   : > { %v3190_v63 = vrot.slane %v3189_v57, 2 }
 0x928   : > { %v3196_v58 = vrot.slane %v3195_v62, 2 }
 0x929   : > { %v3191_v1 = vadd.f32 %v3190_v63, %v3189_v57 }
 0x92a   : > { %v3197_v2 = vadd.f32 %v3196_v58, %v3195_v62 }
 0x92b   : > { %v3192_v3 = vrot.slane %v3191_v1, 1 }
 0x92c   : > { %v3198_v4 = vrot.slane %v3197_v2, 1 }
 0x92d   : > { %v3193_v5 = vadd.f32 %v3192_v3, %v3191_v1 }
 0x92e   : > { %v3199_v59 = vadd.f32 %v3198_v4, %v3197_v2 }
 0x92f   : > { %v3200_v6 = vmul.f32 0.125, %v3193_v5 }
 0x930   : > { %v3201_v8 = vmul.f32 0.125, %v3199_v59 }
 0x931   : > { %v3202_v60 = vadd.f32 1e-05, %v3200_v6 }
 0x932   : > { %v3203_v61 = vadd.f32 1e-05, %v3201_v8 }
 0x933   : > { %4169 = vrsqrt.f32 %v3202_v60 }
 0x934   : > { %4171 = vrsqrt.f32 %v3203_v61 }
 0x93d   : > { %v4170_v18 = vpop.eup %4169 }
 0x93e   : > { %v4172_v20 = vpop.eup %4171  ;;  %v3206_v39 = vmul.f32 %v4170_v18, %v3184_v52 }
 0x93f   : > { %v3207_v26 = vmul.f32 %v4172_v20, %v3185_v10 }
 0x940   : > { %v3219_v22 = vmul.f32 %v3212_v17, %v3206_v39 }
 0x941   : > { %v3220_v29 = vmul.f32 %v3216_v19, %v3207_v26 }
 0x942   : > { %v3232_v25 = vadd.f32 %v3225_v21, %v3219_v22 }
 0x943   : > { %v3233_v37 = vadd.f32 %v3229_v0, %v3220_v29 }
 0x944   : > { %v3234_v9 = vmul.f32 0.2, %v3232_v25 }
 0x945   : > { %v3235_v11 = vmul.f32 0.2, %v3233_v37 }
 0x946   : > { %v3236_v36 = vmax.f32 %v3232_v25, %v3234_v9 }
 0x947   : > { %v3237_v41 = vmax.f32 %v3233_v37, %v3235_v11 }
 0x948   : > { %v3270_v40 = vpack.c.bf16 %v3236_v36, %v3236_v36 }
 0x949   : > { %v3271_v38 = vpack.c.bf16 %v3237_v41, %v3237_v41 }
 0x94b   : > { %3407 = vmatprep.mubr.bf16.mxu1 %v3271_v38 }
 0x94c   : > { %3408 = vmatmul.mubr.bf16.vlgmr.msra.gmra.mrb[36].mxu1 %v3270_v40 }
 0xa1f   : > { %v3785_v12 = vpop.f32.mrb[36].mxu1 }
 0xa20   : > { %v3786_v33 = vpop.f32.mrb[37].mxu1 }
 0xa21   : > { %v3787_v16 = vadd.f32 %v3786_v33, %v3785_v12  ;;  %v3788_v27 = vpop.f32.mrb[38].mxu1 }
 0xa22   : > { %v3789_v30 = vpop.f32.mrb[39].mxu1 }
 0xa23   : > { %v3410_v31 = vadd.f32 %v3787_v16, %v3746_v13 }
 0xa25   : > { %3415 = vst [vmem:[%s4635_s15] sm:$0xff] %v3410_v31 }
 0xa26 PF: > { %s5171_s26 = smov %s4510_s27  ;;  %p22_p12 = scmp.ge.s32.totalorder %s4510_s27, 4  }
 0xa27   : > { %s5172_s27 = smov %s4335_s28  ;;  %s5173_s28 = smov %s4339_s29 }
 0xa28   : > { %s5174_s29 = smov %s4519_s17  ;;  %s5175_s30 = smov %s5171_s26 }
 0xa29   :  { %24 = sbr.rel (!%p22_p12) target bundleno = 9 (0x9), region = 150 }
 0xa30   :  { %3435 = vsyncpa [#allocation6], 1 }
 0xa31   :  { %3437 = vsyncpa [#allocation6 + $0x1], 1 }
 0xa32   :  { %3438 = vsyncpa [#allocation8], 1 }
 0xa33   :  { %3440 = vsyncpa [#allocation8 + $0x1], 1 }
 0xa34   :  { %3441 = vsyncpa [#allocation11], 1 }
 0xa35   :  { %3442 = vsyncmov [#allocation4] }
 0xa38   :  { %s3443_s15 = vpop.sfrf %3442 }
 0xa39   :  { %p3765_p0 = scmp.ne.s32.totalorder %s3443_s15, 0 }
 0xa3b   :  { %3447 = shalt.err (%p3765_p0)  }
 0xa3c   :  { %3449 = vsyncmov [#allocation4 + $0x1] }
 0xa3f   :  { %s3450_s25 = vpop.sfrf %3449 }
 0xa40   :  { %p3766_p2 = scmp.ne.s32.totalorder %s3450_s25, 0 }
 0xa42   :  { %3454 = shalt.err (%p3766_p2)  }
 0xa43   :  { %3456 = vsyncmov [#allocation4 + $0x2] }
 0xa46   :  { %s3457_s10 = vpop.sfrf %3456 }
 0xa47   :  { %p3767_p13 = scmp.ne.s32.totalorder %s3457_s10, 0 }
 0xa49   :  { %3461 = shalt.err (%p3767_p13)  }
 0xa4a   :  { %3463 = vsyncmov [#allocation4 + $0x3] }
 0xa4d   :  { %s3464_s17 = vpop.sfrf %3463 }
 0xa4e   :  { %p3768_p3 = scmp.ne.s32.totalorder %s3464_s17, 0 }
 0xa50   :  { %3468 = shalt.err (%p3768_p3)  }

</bundles_post_ra>
